<compile_context>
chip_gen: v7x
topology: tpu7x:2x2x1
jax: 0.10.0
libtpu: 0.0.40
codegen_flags: <defaults>
</compile_context>

<pallas_src>
import jax
import jax.numpy as jnp
from jax import lax
from jax.experimental import pallas as pl
from jax.experimental.pallas import tpu as pltpu

IN_FEATURES = 196608
OUT_FEATURES = 10

TK = 32768      # K tile (lane-dense, multiple of 128); 196608 / 32768 = 6 blocks
NSPLIT = 2      # parallel split of the K reduction (maps to the 2 TCs on v7x)


def linear_kernel(x_ref, w_ref, o_ref):
    # grid = (NSPLIT, ksteps): axis 0 is "parallel" (independent partial sums),
    # axis 1 is the K reduction ("arbitrary").  The output block index is
    # constant along axis 1, so it stays VMEM-resident and we accumulate into
    # it directly (no scratch buffer).
    k = pl.program_id(1)

    @pl.when(k == 0)
    def _():
        o_ref[...] = jnp.zeros_like(o_ref)

    # x tile: (B, TK), w tile: (N, TK) -> contract the minor (K) dim of both.
    o_ref[...] += lax.dot_general(
        x_ref[...],
        w_ref[...],
        dimension_numbers=(((1,), (1,)), ((), ())),
        preferred_element_type=jnp.float32,
    )


@jax.jit
def linear_forward(x, w, b):
    """x: (B, K) f32, w: (N, K) f32 (PyTorch layout), b: (N,) f32 -> (B, N)."""
    B, K = x.shape
    N, K_w = w.shape
    assert K == K_w
    assert K % (NSPLIT * TK) == 0
    ksteps = K // (NSPLIT * TK)   # K-steps handled by each parallel split

    partials = pl.pallas_call(
        linear_kernel,
        out_shape=jax.ShapeDtypeStruct((NSPLIT, B, N), jnp.float32),
        grid_spec=pltpu.PrefetchScalarGridSpec(
            num_scalar_prefetch=0,
            grid=(NSPLIT, ksteps),
            in_specs=[
                # x tile: (B, TK); split c owns K blocks [c*ksteps, (c+1)*ksteps)
                pl.BlockSpec((B, TK), lambda c, k: (0, c * ksteps + k)),
                # weight tile: (N, TK) -- lane-dense PyTorch layout, no transpose
                pl.BlockSpec((N, TK), lambda c, k: (0, c * ksteps + k)),
            ],
            # one (B, N) partial per split; leading dim squeezed in the kernel
            out_specs=pl.BlockSpec((None, B, N), lambda c, k: (c, 0, 0)),
        ),
        compiler_params=pltpu.CompilerParams(
            dimension_semantics=("parallel", "arbitrary"),
        ),
    )(x, w)

    # Tiny epilogue (fused under jit): combine per-split partials + bias.
    return partials.sum(axis=0) + b[None, :]


if __name__ == "__main__":
    key = jax.random.PRNGKey(0)
    kx, kw, kb = jax.random.split(key, 3)

    batch = 2
    x = jax.random.normal(kx, (batch, IN_FEATURES), dtype=jnp.float32)

    # nn.Linear default init: U(-1/sqrt(in_features), 1/sqrt(in_features));
    # weight kept in PyTorch (out_features, in_features) layout.
    bound = 1.0 / (IN_FEATURES ** 0.5)
    w = jax.random.uniform(
        kw, (OUT_FEATURES, IN_FEATURES), dtype=jnp.float32,
        minval=-bound, maxval=bound)
    b = jax.random.uniform(
        kb, (OUT_FEATURES,), dtype=jnp.float32, minval=-bound, maxval=bound)

    out = jax.block_until_ready(linear_forward(x, w, b))

    # Reference check against plain JAX (same math as nn.Linear forward).
    ref = x @ w.T + b
    assert out.shape == (batch, OUT_FEATURES)
    assert jnp.allclose(out, ref, atol=1e-3, rtol=1e-3)

    print("KERNEL_OK")
</pallas_src>

<mosaic_0001>
module attributes {stable_mosaic.version = 11 : i64} {
  func.func @linear_kernel(%arg0: i32, %arg1: i32, %arg2: memref<2x32768xf32, #tpu.memory_space<vmem>>, %arg3: memref<10x32768xf32, #tpu.memory_space<vmem>>, %arg4: memref<1x2x10xf32, #tpu.memory_space<vmem>>) attributes {dimension_semantics = [#tpu.dimension_semantics<parallel>, #tpu.dimension_semantics<arbitrary>], iteration_bounds = array<i64: 2, 3>, scalar_prefetch = 0 : i64, scratch_operands = 0 : i64, tpu.core_type = #tpu.core_type<tc>, window_params = [{transform_indices = @transform_0, window_bounds = array<i64: 2, 32768>}, {transform_indices = @transform_1, window_bounds = array<i64: 10, 32768>}, {transform_indices = @transform_2, window_bounds = array<i64: 1, 2, 10>}]} {
    %c0_i32 = arith.constant 0 : i32
    %0 = arith.cmpi eq, %arg1, %c0_i32 : i32
    %1 = arith.extui %0 : i1 to i32
    %c0_i32_0 = arith.constant 0 : i32
    %2 = arith.cmpi ne, %1, %c0_i32_0 : i32
    scf.if %2 {
      %cst_10 = arith.constant 0.000000e+00 : f32
      %12 = vector.broadcast %cst_10 : f32 to vector<2x10xf32>
      %c0_11 = arith.constant 0 : index
      %c0_12 = arith.constant 0 : index
      %c0_13 = arith.constant 0 : index
      %13 = vector.load %arg4[%c0_11, %c0_12, %c0_13] : memref<1x2x10xf32, #tpu.memory_space<vmem>>, vector<1x2x10xf32>
      %14 = vector.shape_cast %13 : vector<1x2x10xf32> to vector<2x10xf32>
      %15 = vector.shape_cast %12 : vector<2x10xf32> to vector<1x2x10xf32>
      tpu.vector_store %arg4[%c0_11, %c0_12, %c0_13], %15 {strides = array<i32>} : memref<1x2x10xf32, #tpu.memory_space<vmem>>, vector<1x2x10xf32>,
    } else {
    }
    %c0 = arith.constant 0 : index
    %c0_1 = arith.constant 0 : index
    %c0_2 = arith.constant 0 : index
    %3 = vector.load %arg4[%c0, %c0_1, %c0_2] : memref<1x2x10xf32, #tpu.memory_space<vmem>>, vector<1x2x10xf32>
    %4 = vector.shape_cast %3 : vector<1x2x10xf32> to vector<2x10xf32>
    %c0_3 = arith.constant 0 : index
    %c0_4 = arith.constant 0 : index
    %5 = vector.load %arg2[%c0_3, %c0_4] : memref<2x32768xf32, #tpu.memory_space<vmem>>, vector<2x32768xf32>
    %c0_5 = arith.constant 0 : index
    %c0_6 = arith.constant 0 : index
    %6 = vector.load %arg3[%c0_5, %c0_6] : memref<10x32768xf32, #tpu.memory_space<vmem>>, vector<10x32768xf32>
    %cst = arith.constant dense<0.000000e+00> : vector<2x10xf32>
    %7 = tpu.matmul %5, %6, %cst {dimension_numbers = #tpu.dot_dimension_numbers<[1], [1], [0], [0], [0, 0, 1, 0], [], []>} : vector<2x32768xf32>, vector<10x32768xf32>, vector<2x10xf32> -> vector<2x10xf32>
    %8 = arith.addf %4, %7 : vector<2x10xf32>
    %c0_7 = arith.constant 0 : index
    %c0_8 = arith.constant 0 : index
    %c0_9 = arith.constant 0 : index
    %9 = vector.load %arg4[%c0_7, %c0_8, %c0_9] : memref<1x2x10xf32, #tpu.memory_space<vmem>>, vector<1x2x10xf32>
    %10 = vector.shape_cast %9 : vector<1x2x10xf32> to vector<2x10xf32>
    %11 = vector.shape_cast %8 : vector<2x10xf32> to vector<1x2x10xf32>
    tpu.vector_store %arg4[%c0_7, %c0_8, %c0_9], %11 {strides = array<i32>} : memref<1x2x10xf32, #tpu.memory_space<vmem>>, vector<1x2x10xf32>,
    return
  }
  func.func @transform_0(%arg0: i32, %arg1: i32) -> (i32, i32) {
    %c3_i32 = arith.constant 3 : i32
    %0 = arith.muli %arg0, %c3_i32 : i32
    %1 = arith.addi %0, %arg1 : i32
    %c0_i32 = arith.constant 0 : i32
    %c0_i32_0 = arith.constant 0 : i32
    return %c0_i32, %1 : i32, i32
  }
  func.func @transform_1(%arg0: i32, %arg1: i32) -> (i32, i32) {
    %c3_i32 = arith.constant 3 : i32
    %0 = arith.muli %arg0, %c3_i32 : i32
    %1 = arith.addi %0, %arg1 : i32
    %c0_i32 = arith.constant 0 : i32
    %c0_i32_0 = arith.constant 0 : i32
    return %c0_i32, %1 : i32, i32
  }
  func.func @transform_2(%arg0: i32, %arg1: i32) -> (i32, i32, i32) {
    %c0_i32 = arith.constant 0 : i32
    %c0_i32_0 = arith.constant 0 : i32
    %c0_i32_1 = arith.constant 0 : i32
    return %arg0, %c0_i32, %c0_i32_0 : i32, i32, i32
  }
}

</mosaic_0001>

<bundles_post_ra>
// kernel: linear_forward.1
= control target key start
LH: loop header
LB: loop body
LE: loop exit
PB: predicated region body
PF: predicated region fallthrough
CT: control target
= control target key end

     0   :  { %7 = vsyncpa [#allocation3], 0  ;;  %s13032_s0 = inlined_call_operand.hbm [shape: f32[2,196608], index: 0, kind: input, shape index: {}]   ;;  %s13033_s1 = inlined_call_operand.hbm [shape: f32[10,196608], index: 1, kind: input, shape index: {}]   ;;  %s13034_s2 = inlined_call_operand.vmem [shape: f32[2,2,10], index: 2, kind: output, shape index: {}]  }
   0x1   :  { %9 = vsyncpa [#allocation3 + $0x1], 0 }
   0x2   :  { %10 = vsyncpa [#allocation5], 0 }
   0x3   :  { %12 = vsyncpa [#allocation5 + $0x1], 0  ;;  %s12117_s9 = smov 0   ;;  %s12119_s10 = smov 0  }
   0x4   :  { %s12121_s11 = smov 0   ;;  %s12123_s12 = smov 0  }
   0x5   :  { %s12125_s13 = smov 0   ;;  %s12127_s14 = smov 0  }
   0x6   :  { %s12129_s15 = smov 0   ;;  %s12131_s16 = smov 0  }
   0x7 LB: > { %s11287_s17 = sadd.s32 4294967295, %s12093_s16   ;;  %s27_s18 = sadd.s32 1, %s12085_s14  ;;  %s12093_s16 = sphi %s12131_s16, %s18_s16   ;;  %s12089_s15 = sphi %s12129_s15, %s13047_s15   ;;  %s12085_s14 = sphi %s12127_s14, %s13046_s14   ;;  %s12081_s13 = sphi %s12125_s13, %s13045_s13   ;;  %s12077_s12 = sphi %s12123_s12, %s13044_s12   ;;  %s12073_s11 = sphi %s12121_s11, %s13043_s11   ;;  %s12069_s10 = sphi %s12119_s10, %s13042_s10   ;;  %s12065_s9 = sphi %s12117_s9, %s13041_s9  }
   0x8   : > { %p28_p0 = scmp.ge.s32.totalorder %s27_s18, 3  ;;  %s30_s19 = sadd.s32 1, %s12089_s15 }
   0x9   : > { %s34_s20 = smul.u32 3, %s12089_s15  ;;  %s41_s21 = sadd.s32 1, %s12073_s11 }
   0xa   : > { %s13049_s18 = smov (%p28_p0, %s27_s18), 0  ;;  %s13051_s19 = smov (!%p28_p0, %s30_s19), %s12089_s15 }
   0xb   : > { %s12164_s22 = sadd.s32 %s12085_s14, %s34_s20  ;;  %p48_p1 = scmp.ne.s32.totalorder %s12073_s11, %s12069_s10 }
   0xc   : > { %p32_p2 = scmp.ge.s32.totalorder %s13051_s19, 2  ;;  %p49_p3 = scmp.eq.s32.totalorder %s12093_s16, 0 }
   0xd   : > { %p54_p4 = scmp.ne.s32.totalorder %s12069_s10, %s12065_s9  ;;  %p55_p5 = scmp.eq.s32.totalorder %s11287_s17, 0 }
   0xe   : > { %s13053_s19 = smov (%p32_p2, %s13051_s19), 0  ;;  %p12172_p6 = por %p49_p3, %p48_p1 }
   0xf   : > { %p12176_p7 = por %p55_p5, %p54_p4  ;;  %s36_s25 = smul.u32 3, %s13053_s19 }
  0x10   : > { %p11829_p8 = scmp.lt.s32.totalorder %s12093_s16, 6  ;;  %s12183_s26 = sand.u32 1, %s12073_s11  }
  0x11   : > { %s13037_s24 = scalar_select %p12176_p7, 1, 0 }
  0x12   : > { %s37_s27 = sadd.s32 %s36_s25, %s13049_s18  ;;  %s11291_s29 = sshll.u32 %s12183_s26, 9 }
  0x13   : > { %s38_s28 = ssub.s32 %s12164_s22, %s37_s27  ;;  %s11304_s30 = sshll.u32 %s12164_s22, 13 }
  0x14   : > { %p39_p9 = scmp.eq.s32.totalorder %s38_s28, 0  ;;  %s138_s3 = scalar_lea.vmem [#allocation2], %s11291_s29 }
  0x15   : > { %s148_s4 = sshll.u32 %s138_s3, 4  ;;  %s12195_s8 = scalar_lea.hbm %s13032_s0, %s11304_s30  ;;  %s12197_s4 = int_to_ptr.vmem [resolvable:$true] %s148_s4 }
  0x16   : > { %s12190_s5 = scalar_select %p39_p9, %s12073_s11, %s41_s21  }
  0x17   : > { %p12201_p10 = pnand %p11829_p8, %p12172_p6  ;;  %s11294_s17 = sshll.u32 %s12183_s26, 12 }
  0x18   : > { %s11305_s20 = sshll.u32 %s12164_s22, 15  ;;  %s135_s21 = scalar_lea.sflag [#allocation3], %s12183_s26 }
  0x19   : > { %s11963_s25 = scalar_lea.hbm %s12195_s8, 8192  ;;  %p11965_p12 = pneg %p12201_p10 }
  0x1a   : > { %p11964_p11 = scmp.ne.s32.totalorder %s12195_s8, %s11963_s25  ;;  %s11968_s23 = scalar_lea.hbm %s13032_s0, 49152 }
  0x1b   : > { %p11969_p1 = scmp.lt.u32.totalorder %s12195_s8, %s13032_s0  ;;  %p11970_p2 = scmp.lt.u32.totalorder %s11968_s23, %s11963_s25 }
  0x1c   : > { %p11966_p13 = pnand %p11965_p12, %p11964_p11  ;;  %p11972_p4 = scmp.lt.u32.totalorder %s11963_s25, %s12195_s8 }
  0x1d   : > { %p11971_p3 = por %p11970_p2, %p11969_p1 }
  0x1e   : > { %p11967_p0 = pneg %p11966_p13 }
  0x1f   : > { %p11973_p5 = por %p11972_p4, %p11971_p3 }
  0x21   : > { %p11974_p6 = pnand %p11973_p5, %p11967_p0 }
  0x23   : > { %11977 = shalt.err (!%p11974_p6)
}
  0x24   : > { %s11978_s3 = scalar_lea.vmem %s12197_s4, 8192  ;;  %s12095_s6 = smov [#allocation2]  }
  0x25   : > { %p11979_p8 = scmp.ne.s32.totalorder %s12197_s4, %s11978_s3  ;;  %s11983_s7 = sshll.u32 %s12095_s6, 4  ;;  %s11984_s7 = int_to_ptr.vmem [resolvable:$false] %s11983_s7 }
  0x26   : > { %s11985_s27 = scalar_lea.vmem %s11984_s7, 16384  ;;  %p11986_p13 = scmp.lt.s32.totalorder %s12197_s4, %s11984_s7 }
  0x27   : > { %p11981_p9 = pnand %p11979_p8, %p11965_p12  ;;  %p11987_p1 = scmp.lt.s32.totalorder %s11985_s27, %s11978_s3 }
  0x29   : > { %p11982_p11 = pneg %p11981_p9  ;;  %p11988_p2 = por %p11987_p1, %p11986_p13 }
  0x2b   : > { %p11989_p3 = pnand %p11988_p2, %p11982_p11 }
  0x2d   : > { %11992 = shalt.err (!%p11989_p3)
}
  0x2e   : > { %11825 = dma.hbm_to_vmem [thread:$0]  (!%p12201_p10), %s12195_s8, 8192, %s12197_s4, %s135_s21  }
  0x2f   : > { %s12238_s23 = scalar_lea.hbm %s13033_s1, %s11305_s20  ;;  %p11297_p0 = scmp.ge.s32.totalorder %s12093_s16, 1 }
  0x30   : > { %p176_p4 = scmp.lt.s32.totalorder %s12093_s16, 7  ;;  %s159_s29 = scalar_lea.vmem [#allocation4], %s11294_s17 }
  0x31   : > { %s168_s30 = sshll.u32 %s159_s29, 4  ;;  %s156_s22 = scalar_lea.sflag [#allocation5], %s12183_s26  ;;  %s12244_s30 = int_to_ptr.vmem [resolvable:$true] %s168_s30 }
  0x32   : > { %p12246_p5 = pnand %p11297_p0, %p176_p4  ;;  %s11993_s4 = scalar_lea.hbm %s12238_s23, 65536 }
  0x33   : > { %p11994_p6 = scmp.ne.s32.totalorder %s12238_s23, %s11993_s4  ;;  %s11998_s21 = scalar_lea.hbm %s13033_s1, 393216 }
  0x34   : > { %p11999_p11 = scmp.lt.u32.totalorder %s12238_s23, %s13033_s1  ;;  %p12000_p13 = scmp.lt.u32.totalorder %s11998_s21, %s11993_s4 }
  0x35   : > { %p11996_p8 = pnand %p11994_p6, %p11965_p12  ;;  %p12002_p2 = scmp.lt.u32.totalorder %s11993_s4, %s12238_s23 }
  0x36   : > { %p12001_p1 = por %p12000_p13, %p11999_p11 }
  0x37   : > { %p11997_p9 = pneg %p11996_p8 }
  0x38   : > { %p12003_p3 = por %p12002_p2, %p12001_p1 }
  0x3a   : > { %p12004_p0 = pnand %p12003_p3, %p11997_p9 }
  0x3c   : > { %12007 = shalt.err (!%p12004_p0)
}
  0x3d   : > { %s12008_s7 = scalar_lea.vmem %s12244_s30, 65536  ;;  %s12096_s27 = smov [#allocation4]  }
  0x3e   : > { %p12009_p4 = scmp.ne.s32.totalorder %s12244_s30, %s12008_s7  ;;  %s12013_s25 = sshll.u32 %s12096_s27, 4  ;;  %s12014_s25 = int_to_ptr.vmem [resolvable:$false] %s12013_s25 }
  0x3f   : > { %s12015_s28 = scalar_lea.vmem %s12014_s25, 131072  ;;  %p12016_p7 = scmp.lt.s32.totalorder %s12244_s30, %s12014_s25 }
  0x40   : > { %p12011_p6 = pnand %p12009_p4, %p11965_p12  ;;  %p12017_p11 = scmp.lt.s32.totalorder %s12015_s28, %s12008_s7 }
  0x42   : > { %p12012_p8 = pneg %p12011_p6  ;;  %p12018_p13 = por %p12017_p11, %p12016_p7 }
  0x44   : > { %p12019_p1 = pnand %p12018_p13, %p12012_p8 }
  0x46   : > { %12022 = shalt.err (!%p12019_p1)
}
  0x47   : > { %s12097_s29 = smov 196608   ;;  %s12098_s4 = smov 32768  }
  0x48   : > { %s12099_s8 = smov 2048   ;;  %180 = sbr.rel (%p12246_p5) target bundleno = 827 (0x33b), region = 28 }
  0x49   : > { %11828 = dma.hbm_to_vmem [thread:$0]  (!%p12201_p10), %s12238_s23, 65536, %s12244_s30, %s156_s22, %s12097_s29, %s12098_s4, %s12099_s8  }
  0x4a   : > { %s182_s20 = sand.u32 (!%p12246_p5), 1, %s12069_s10   ;;  %p13040_p7 = scmp.ne.s32.totalorder (!%p12246_p5), %s13037_s24, 0 }
  0x4b   : > { %s11298_s21 = sshll.u32 (!%p12246_p5), %s182_s20, 9  ;;  %s183_s6 = scalar_lea.sflag (!%p12246_p5), [#allocation3], %s182_s20 }
  0x4c   : > { %s12279_s17 = scalar_lea.vmem (!%p12246_p5), [#allocation2], %s11298_s21 }
  0x4f   : > { %12056 = dma.done.wait (%p13040_p7), %s183_s6, 8192  }
  0x50   : > { %12058 = vsyncadd (%p13040_p7), %s183_s6, 4294959104  ;;  %s11299_s7 = sshll.u32 %s182_s20, 12  ;;  %s192_s9 = scalar_lea.sflag [#allocation5], %s182_s20 }
  0x51   : > { %s12285_s26 = scalar_lea.vmem [#allocation4], %s11299_s7 }
  0x52   : > { %12060 = dma.done.wait (%p13040_p7), %s192_s9, 65536  }
  0x53   : > { %12062 = vsyncadd (%p13040_p7), %s192_s9, 4294901760  ;;  %p226_p10 = scmp.lt.s32.totalorder %s12081_s13, 1  ;;  %p11301_p12 = scmp.ne.s32.totalorder %s12077_s12, 0 }
  0x54   : > { %vm234_vm0 = vcmask (!%p11301_p12), 74752   ;;  %v12100_v0 = vmov (!%p11301_p12), 0.0  }
  0x55   : > { %s13055_s13 = smov (!%p226_p10, %s12081_s13), 1  ;;  %233 = sbr.rel (%p11301_p12) target bundleno = 92 (0x5c), region = 40 }
  0x56   : > { %s11300_s23 = sshll.u32 %s13055_s13, 1 }
  0x57   : > { %s12296_s22 = scalar_lea.vmem %s13034_s2, %s11300_s23 }
  0x58   : > { %235 = vst.msk [vmem:[%s12296_s22] sm:$0x3] (!%p11301_p12), %vm234_vm0, %v12100_v0 }
  0x5c PF: > { %v302_v1 = vld [vmem:[%s12285_s26 + $0x8] sm:$0xff]  ;;  %v301_v3 = vld [vmem:[%s12285_s26] sm:$0xff]  ;;  %v881_v4 = vlaneseq  ;;  %v304_v7 = vld [vmem:[%s12285_s26 + $0x18] sm:$0xff]  ;;  %v12101_v9 = vmov 1983009808   ;;  %vm11182_vm1 = vcmask 74752  }
  0x5d   : > { %v558_v2 = vld [vmem:[%s12285_s26 + $0x808] sm:$0x3]  ;;  %v557_v6 = vld [vmem:[%s12285_s26 + $0x800] sm:$0x3]  ;;  %v560_v8 = vld [vmem:[%s12285_s26 + $0x818] sm:$0x3]  ;;  %v879_v10 = vunpack.c.l.s4 %v12101_v9 }
  0x5e   : > { %v11306_v5 = vpack.c.bf16 %v558_v2, %v302_v1  ;;  %v11308_v11 = vpack.c.bf16 %v557_v6, %v301_v3  ;;  %v11310_v12 = vpack.c.bf16 %v560_v8, %v304_v7  ;;  %v303_v13 = vld [vmem:[%s12285_s26 + $0x10] sm:$0xff]  ;;  %v237_v15 = vld [vmem:[%s12279_s17] sm:$0xff]  ;;  %v882_v16 = vshrl.u32 %v881_v4, 7  ;;  %v306_v20 = vld [vmem:[%s12285_s26 + $0x28] sm:$0xff] }
  0x5f   : > { %v559_v14 = vld [vmem:[%s12285_s26 + $0x810] sm:$0x3]  ;;  %v880_v18 = vunpack.c.0.s8 %v879_v10  ;;  %v877_v19 = vcombine.high %v237_v15, %v237_v15  ;;  %v562_v21 = vld [vmem:[%s12285_s26 + $0x828] sm:$0x3]  ;;  %v308_v23 = vld [vmem:[%s12285_s26 + $0x38] sm:$0xff] }
  0x60   : > { %11307 = vmatprep.subr.bf16.mxu0 %v11306_v5  ;;  %v11312_v17 = vpack.c.bf16 %v559_v14, %v303_v13  ;;  %11311 = vmatprep.subr.bf16.mxu1 %v11310_v12  ;;  %v11314_v22 = vpack.c.bf16 %v562_v21, %v306_v20  ;;  %v564_v24 = vld [vmem:[%s12285_s26 + $0x838] sm:$0x3]  ;;  %v305_v26 = vld [vmem:[%s12285_s26 + $0x20] sm:$0xff]  ;;  %v238_v28 = vld [vmem:[%s12279_s17 + $0x8] sm:$0xff] }
  0x61   : > { %11309 = vmatpush1.bf16.xpose.msra.mxu0 %v11308_v11  ;;  %v12313_v25 = vsub.s32 %v880_v18, %v882_v16  ;;  %v11318_v27 = vpack.c.bf16 %v564_v24, %v308_v23  ;;  %v561_v29 = vld [vmem:[%s12285_s26 + $0x820] sm:$0x3]  ;;  %v307_v30 = vld [vmem:[%s12285_s26 + $0x30] sm:$0xff]  ;;  %v894_v32 = vcombine.high %v238_v28, %v238_v28  ;;  %v310_v36 = vld [vmem:[%s12285_s26 + $0x48] sm:$0xff] }
  0x62   : > { %11313 = vmatpush1.bf16.xpose.msra.mxu1 %v11312_v17  ;;  %11315 = vmatprep.subr.bf16.mxu0 %v11314_v22  ;;  %v563_v31 = vld [vmem:[%s12285_s26 + $0x830] sm:$0x3]  ;;  %v566_v37 = vld [vmem:[%s12285_s26 + $0x848] sm:$0x3]  ;;  %v312_v39 = vld [vmem:[%s12285_s26 + $0x58] sm:$0xff]  ;;  %v11316_v44 = vpack.c.bf16 %v561_v29, %v305_v26 }
  0x63   : > { %v884_v33 = vrot.slane %v237_v15, %v12313_v25  ;;  %v891_v34 = vrot.slane %v877_v19, %v12313_v25  ;;  %11319 = vmatprep.subr.bf16.mxu1 %v11318_v27  ;;  %v901_v35 = vrot.slane %v238_v28, %v12313_v25  ;;  %v908_v38 = vrot.slane %v894_v32, %v12313_v25  ;;  %v568_v40 = vld [vmem:[%s12285_s26 + $0x858] sm:$0x3]  ;;  %v239_v41 = vld [vmem:[%s12279_s17 + $0x10] sm:$0xff]  ;;  %v309_v51 = vld [vmem:[%s12285_s26 + $0x40] sm:$0xff] }
  0x64   : > { %v11320_v45 = vpack.c.bf16 %v563_v31, %v307_v30  ;;  %v11322_v47 = vpack.c.bf16 %v566_v37, %v310_v36  ;;  %v11326_v49 = vpack.c.bf16 %v568_v40, %v312_v39  ;;  %v911_v50 = vcombine.high %v239_v41, %v239_v41  ;;  %v565_v52 = vld [vmem:[%s12285_s26 + $0x840] sm:$0x3]  ;;  %v311_v53 = vld [vmem:[%s12285_s26 + $0x50] sm:$0xff]  ;;  %v314_v56 = vld [vmem:[%s12285_s26 + $0x68] sm:$0xff] }
  0x65   : > { %v892_v42 = vcombine.high %v884_v33, %v884_v33  ;;  %v893_v43 = vcombine.high %v891_v34, %v891_v34  ;;  %v909_v46 = vcombine.high %v901_v35, %v901_v35  ;;  %v910_v48 = vcombine.high %v908_v38, %v908_v38  ;;  %v567_v54 = vld [vmem:[%s12285_s26 + $0x850] sm:$0x3]  ;;  %v570_v57 = vld [vmem:[%s12285_s26 + $0x868] sm:$0x3]  ;;  %v316_v59 = vld [vmem:[%s12285_s26 + $0x78] sm:$0xff] }
  0x66   : > { %v918_v55 = vrot.slane %v239_v41, %v12313_v25  ;;  %v925_v58 = vrot.slane %v911_v50, %v12313_v25  ;;  %v572_v60 = vld [vmem:[%s12285_s26 + $0x878] sm:$0x3]  ;;  %v11324_v62 = vpack.c.bf16 %v565_v52, %v309_v51  ;;  %v11328_v63 = vpack.c.bf16 %v567_v54, %v311_v53  ;;  %v313_v5 = vld [vmem:[%s12285_s26 + $0x60] sm:$0xff]  ;;  %v315_v7 = vld [vmem:[%s12285_s26 + $0x70] sm:$0xff] }
  0x67   : > { %2285 = vmatprep.mubr.f32.mxu0 %v892_v42  ;;  %2355 = vmatprep.mubr.f32.mxu1 %v893_v43  ;;  %v240_v61 = vld [vmem:[%s12279_s17 + $0x18] sm:$0xff]  ;;  %v11330_v1 = vpack.c.bf16 %v570_v57, %v314_v56  ;;  %v11334_v3 = vpack.c.bf16 %v572_v60, %v316_v59  ;;  %v569_v6 = vld [vmem:[%s12285_s26 + $0x860] sm:$0x3]  ;;  %v571_v8 = vld [vmem:[%s12285_s26 + $0x870] sm:$0x3] }
  0x68   : > { %2286 = vmatmul.mubr.f32.vlgmr.msra.gmra.mrb[0].mxu0 %v884_v33  ;;  %v926_v0 = vcombine.high %v918_v55, %v918_v55  ;;  %v927_v2 = vcombine.high %v925_v58, %v925_v58  ;;  %v928_v4 = vcombine.high %v240_v61, %v240_v61  ;;  %v935_v9 = vrot.slane %v240_v61, %v12313_v25  ;;  %v318_v10 = vld [vmem:[%s12285_s26 + $0x88] sm:$0xff]  ;;  %v320_v13 = vld [vmem:[%s12285_s26 + $0x98] sm:$0xff]  ;;  %v241_v15 = vld [vmem:[%s12279_s17 + $0x20] sm:$0xff] }
  0x69   : > { %2356 = vmatmul.mubr.f32.vlgmr.msra.gmra.mrb[0].mxu1 %v891_v34  ;;  %11317 = vmatpush1.bf16.xpose.msra.mxu0 %v11316_v44  ;;  %v574_v11 = vld [vmem:[%s12285_s26 + $0x888] sm:$0x3]  ;;  %v576_v14 = vld [vmem:[%s12285_s26 + $0x898] sm:$0x3]  ;;  %v11332_v16 = vpack.c.bf16 %v569_v6, %v313_v5  ;;  %v11336_v17 = vpack.c.bf16 %v571_v8, %v315_v7  ;;  %v945_v22 = vcombine.high %v241_v15, %v241_v15  ;;  %v317_v23 = vld [vmem:[%s12285_s26 + $0x80] sm:$0xff] }
  0x6a   : > { %11321 = vmatpush1.bf16.xpose.msra.mxu1 %v11320_v45  ;;  %2425 = vmatprep.mubr.f32.mxu0 %v909_v46  ;;  %v942_v12 = vrot.slane %v928_v4, %v12313_v25  ;;  %v943_v18 = vcombine.high %v935_v9, %v935_v9  ;;  %v11338_v19 = vpack.c.bf16 %v574_v11, %v318_v10  ;;  %v573_v24 = vld [vmem:[%s12285_s26 + $0x880] sm:$0x3]  ;;  %v319_v26 = vld [vmem:[%s12285_s26 + $0x90] sm:$0xff]  ;;  %v322_v29 = vld [vmem:[%s12285_s26 + $0xa8] sm:$0xff] }
  0x6b   : > { %11323 = vmatprep.subr.bf16.mxu0 %v11322_v47  ;;  %2495 = vmatprep.mubr.f32.mxu1 %v910_v48  ;;  %v11342_v21 = vpack.c.bf16 %v576_v14, %v320_v13  ;;  %v575_v27 = vld [vmem:[%s12285_s26 + $0x890] sm:$0x3]  ;;  %v952_v28 = vrot.slane %v241_v15, %v12313_v25  ;;  %v578_v30 = vld [vmem:[%s12285_s26 + $0x8a8] sm:$0x3]  ;;  %v959_v31 = vrot.slane %v945_v22, %v12313_v25  ;;  %v324_v32 = vld [vmem:[%s12285_s26 + $0xb8] sm:$0xff] }
  0x6c   : > { %11327 = vmatprep.subr.bf16.mxu1 %v11326_v49  ;;  %v944_v20 = vcombine.high %v942_v12, %v942_v12  ;;  %v580_v33 = vld [vmem:[%s12285_s26 + $0x8b8] sm:$0x3]  ;;  %v242_v34 = vld [vmem:[%s12279_s17 + $0x28] sm:$0xff]  ;;  %v11344_v36 = vpack.c.bf16 %v575_v27, %v319_v26  ;;  %v321_v42 = vld [vmem:[%s12285_s26 + $0xa0] sm:$0xff] }
  0x6d   : > { %v960_v37 = vcombine.high %v952_v28, %v952_v28  ;;  %v961_v39 = vcombine.high %v959_v31, %v959_v31  ;;  %v11350_v40 = vpack.c.bf16 %v580_v33, %v324_v32  ;;  %v962_v41 = vcombine.high %v242_v34, %v242_v34  ;;  %v577_v43 = vld [vmem:[%s12285_s26 + $0x8a0] sm:$0x3]  ;;  %v323_v44 = vld [vmem:[%s12285_s26 + $0xb0] sm:$0xff]  ;;  %v326_v47 = vld [vmem:[%s12285_s26 + $0xc8] sm:$0xff] }
  0x6e   : > { %v579_v45 = vld [vmem:[%s12285_s26 + $0x8b0] sm:$0x3]  ;;  %v969_v46 = vrot.slane %v242_v34, %v12313_v25  ;;  %v582_v48 = vld [vmem:[%s12285_s26 + $0x8c8] sm:$0x3]  ;;  %v328_v50 = vld [vmem:[%s12285_s26 + $0xd8] sm:$0xff]  ;;  %v11348_v53 = vpack.c.bf16 %v577_v43, %v321_v42 }
  0x6f   : > { %v976_v49 = vrot.slane %v962_v41, %v12313_v25  ;;  %v584_v51 = vld [vmem:[%s12285_s26 + $0x8d8] sm:$0x3]  ;;  %v243_v52 = vld [vmem:[%s12279_s17 + $0x30] sm:$0xff]  ;;  %v11352_v54 = vpack.c.bf16 %v579_v45, %v323_v44  ;;  %v11354_v56 = vpack.c.bf16 %v582_v48, %v326_v47  ;;  %v325_v60 = vld [vmem:[%s12285_s26 + $0xc0] sm:$0xff] }
  0x70   : > { %2426 = vmatmul.mubr.f32.vlgmr.msra.gmra.mrb[2].mxu0 %v901_v35  ;;  %v11340_v35 = vpack.c.bf16 %v573_v24, %v317_v23  ;;  %v979_v59 = vcombine.high %v243_v52, %v243_v52  ;;  %v581_v61 = vld [vmem:[%s12285_s26 + $0x8c0] sm:$0x3]  ;;  %v332_v4 = vld [vmem:[%s12285_s26 + $0xf8] sm:$0xff]  ;;  %v246_v43 = vld [vmem:[%s12279_s17 + $0x48] sm:$0xff] }
  0x71   : > { %2496 = vmatmul.mubr.f32.vlgmr.msra.gmra.mrb[2].mxu1 %v908_v38  ;;  %11325 = vmatpush1.bf16.xpose.msra.mxu0 %v11324_v62  ;;  %v11346_v38 = vpack.c.bf16 %v578_v30, %v322_v29  ;;  %v978_v57 = vcombine.high %v976_v49, %v976_v49  ;;  %v327_v62 = vld [vmem:[%s12285_s26 + $0xd0] sm:$0xff]  ;;  %v588_v5 = vld [vmem:[%s12285_s26 + $0x8f8] sm:$0x3]  ;;  %v11356_v7 = vpack.c.bf16 %v581_v61, %v325_v60  ;;  %v329_v14 = vld [vmem:[%s12285_s26 + $0xe0] sm:$0xff] }
  0x72   : > { %11329 = vmatpush1.bf16.xpose.msra.mxu1 %v11328_v63  ;;  %2565 = vmatprep.mubr.f32.mxu0 %v926_v0  ;;  %v583_v63 = vld [vmem:[%s12285_s26 + $0x8d0] sm:$0x3]  ;;  %v986_v0 = vrot.slane %v243_v52, %v12313_v25  ;;  %v244_v6 = vld [vmem:[%s12279_s17 + $0x38] sm:$0xff]  ;;  %v585_v15 = vld [vmem:[%s12285_s26 + $0x8e0] sm:$0x3] }
  0x73   : > { %11331 = vmatprep.subr.bf16.mxu0 %v11330_v1  ;;  %2635 = vmatprep.mubr.f32.mxu1 %v927_v2  ;;  %v330_v1 = vld [vmem:[%s12285_s26 + $0xe8] sm:$0xff]  ;;  %v11360_v8 = vpack.c.bf16 %v583_v63, %v327_v62  ;;  %v996_v13 = vcombine.high %v244_v6, %v244_v6  ;;  %v336_v22 = vld [vmem:[%s12285_s26 + $0x118] sm:$0xff]  ;;  %v245_v24 = vld [vmem:[%s12279_s17 + $0x40] sm:$0xff]  ;;  %v11364_v26 = vpack.c.bf16 %v585_v15, %v329_v14 }
  0x74   : > { %11335 = vmatprep.subr.bf16.mxu1 %v11334_v3  ;;  %v586_v2 = vld [vmem:[%s12285_s26 + $0x8e8] sm:$0x3]  ;;  %v993_v3 = vrot.slane %v979_v59, %v12313_v25  ;;  %v592_v23 = vld [vmem:[%s12285_s26 + $0x918] sm:$0x3]  ;;  %v1013_v32 = vcombine.high %v245_v24, %v245_v24  ;;  %v333_v33 = vld [vmem:[%s12285_s26 + $0x100] sm:$0xff] }
  0x75   : > { %v11362_v10 = vpack.c.bf16 %v586_v2, %v330_v1  ;;  %v589_v34 = vld [vmem:[%s12285_s26 + $0x900] sm:$0x3]  ;;  %v340_v41 = vld [vmem:[%s12285_s26 + $0x138] sm:$0xff]  ;;  %v247_v61 = vld [vmem:[%s12279_s17 + $0x50] sm:$0xff] }
  0x76   : > { %v995_v11 = vcombine.high %v993_v3, %v993_v3  ;;  %v596_v42 = vld [vmem:[%s12285_s26 + $0x938] sm:$0x3]  ;;  %v11372_v44 = vpack.c.bf16 %v589_v34, %v333_v33  ;;  %v593_v52 = vld [vmem:[%s12285_s26 + $0x920] sm:$0x3] }
  0x77   : > { %v344_v59 = vld [vmem:[%s12285_s26 + $0x158] sm:$0xff]  ;;  %v249_v34 = vld [vmem:[%s12279_s17 + $0x60] sm:$0xff] }
  0x78   : > { %2566 = vmatmul.mubr.f32.vlgmr.msra.gmra.mrb[4].mxu0 %v918_v55  ;;  %v977_v55 = vcombine.high %v969_v46, %v969_v46  ;;  %v600_v60 = vld [vmem:[%s12285_s26 + $0x958] sm:$0x3] }
  0x79   : > { %2636 = vmatmul.mubr.f32.vlgmr.msra.gmra.mrb[4].mxu1 %v925_v58  ;;  %11333 = vmatpush1.bf16.xpose.msra.mxu0 %v11332_v16  ;;  %v11358_v58 = vpack.c.bf16 %v584_v51, %v328_v50  ;;  %v331_v16 = vld [vmem:[%s12285_s26 + $0xf0] sm:$0xff]  ;;  %v1030_v50 = vcombine.high %v246_v43, %v246_v43  ;;  %v337_v51 = vld [vmem:[%s12285_s26 + $0x120] sm:$0xff]  ;;  %v604_v14 = vld [vmem:[%s12285_s26 + $0x978] sm:$0x3] }
  0x7a   : > { %11337 = vmatpush1.bf16.xpose.msra.mxu1 %v11336_v17  ;;  %2705 = vmatprep.mubr.f32.mxu0 %v943_v18  ;;  %v587_v17 = vld [vmem:[%s12285_s26 + $0x8f0] sm:$0x3]  ;;  %v1003_v18 = vrot.slane %v244_v6, %v12313_v25  ;;  %v11380_v62 = vpack.c.bf16 %v593_v52, %v337_v51  ;;  %v597_v6 = vld [vmem:[%s12285_s26 + $0x940] sm:$0x3]  ;;  %v248_v15 = vld [vmem:[%s12279_s17 + $0x58] sm:$0xff] }
  0x7b   : > { %11339 = vmatprep.subr.bf16.mxu0 %v11338_v19  ;;  %2775 = vmatprep.mubr.f32.mxu1 %v944_v20  ;;  %v334_v19 = vld [vmem:[%s12285_s26 + $0x108] sm:$0xff]  ;;  %v11368_v27 = vpack.c.bf16 %v587_v17, %v331_v16  ;;  %v608_v33 = vld [vmem:[%s12285_s26 + $0x998] sm:$0x3] }
  0x7c   : > { %11343 = vmatprep.subr.bf16.mxu1 %v11342_v21  ;;  %v590_v20 = vld [vmem:[%s12285_s26 + $0x908] sm:$0x3]  ;;  %v1010_v21 = vrot.slane %v996_v13, %v12313_v25  ;;  %v348_v13 = vld [vmem:[%s12285_s26 + $0x178] sm:$0xff] }
  0x7d   : > { %v11370_v29 = vpack.c.bf16 %v590_v20, %v334_v19  ;;  %v612_v51 = vld [vmem:[%s12285_s26 + $0x9b8] sm:$0x3]  ;;  %v250_v52 = vld [vmem:[%s12279_s17 + $0x68] sm:$0xff] }
  0x7e   : > { %v1012_v30 = vcombine.high %v1010_v21, %v1010_v21 }
  0x80   : > { %2706 = vmatmul.mubr.f32.vlgmr.msra.gmra.mrb[6].mxu0 %v935_v9  ;;  %v994_v9 = vcombine.high %v986_v0, %v986_v0 }
  0x81   : > { %2776 = vmatmul.mubr.f32.vlgmr.msra.gmra.mrb[6].mxu1 %v942_v12  ;;  %11341 = vmatpush1.bf16.xpose.msra.mxu0 %v11340_v35  ;;  %v11366_v12 = vpack.c.bf16 %v588_v5, %v332_v4  ;;  %v335_v35 = vld [vmem:[%s12285_s26 + $0x110] sm:$0xff]  ;;  %v1047_v4 = vcombine.high %v247_v61, %v247_v61  ;;  %v341_v5 = vld [vmem:[%s12285_s26 + $0x140] sm:$0xff] }
  0x82   : > { %11345 = vmatpush1.bf16.xpose.msra.mxu1 %v11344_v36  ;;  %2845 = vmatprep.mubr.f32.mxu0 %v960_v37  ;;  %v591_v36 = vld [vmem:[%s12285_s26 + $0x910] sm:$0x3]  ;;  %v1020_v37 = vrot.slane %v245_v24, %v12313_v25  ;;  %v11388_v16 = vpack.c.bf16 %v597_v6, %v341_v5  ;;  %v601_v24 = vld [vmem:[%s12285_s26 + $0x960] sm:$0x3]  ;;  %v616_v5 = vld [vmem:[%s12285_s26 + $0x9d8] sm:$0x3] }
  0x83   : > { %11347 = vmatprep.subr.bf16.mxu0 %v11346_v38  ;;  %2915 = vmatprep.mubr.f32.mxu1 %v961_v39  ;;  %v338_v38 = vld [vmem:[%s12285_s26 + $0x128] sm:$0xff]  ;;  %v11376_v45 = vpack.c.bf16 %v591_v36, %v335_v35  ;;  %v251_v6 = vld [vmem:[%s12279_s17 + $0x70] sm:$0xff] }
  0x84   : > { %11351 = vmatprep.subr.bf16.mxu1 %v11350_v40  ;;  %v594_v39 = vld [vmem:[%s12285_s26 + $0x928] sm:$0x3]  ;;  %v1027_v40 = vrot.slane %v1013_v32, %v12313_v25  ;;  %v352_v32 = vld [vmem:[%s12285_s26 + $0x198] sm:$0xff] }
  0x85   : > { %v11378_v47 = vpack.c.bf16 %v594_v39, %v338_v38 }
  0x86   : > { %v1029_v48 = vcombine.high %v1027_v40, %v1027_v40 }
  0x88   : > { %2846 = vmatmul.mubr.f32.vlgmr.msra.gmra.mrb[8].mxu0 %v952_v28  ;;  %v1011_v28 = vcombine.high %v1003_v18, %v1003_v18 }
  0x89   : > { %2916 = vmatmul.mubr.f32.vlgmr.msra.gmra.mrb[8].mxu1 %v959_v31  ;;  %11349 = vmatpush1.bf16.xpose.msra.mxu0 %v11348_v53  ;;  %v11374_v31 = vpack.c.bf16 %v592_v23, %v336_v22  ;;  %v339_v53 = vld [vmem:[%s12285_s26 + $0x130] sm:$0xff]  ;;  %v1064_v22 = vcombine.high %v248_v15, %v248_v15  ;;  %v345_v23 = vld [vmem:[%s12285_s26 + $0x160] sm:$0xff] }
  0x8a   : > { %11353 = vmatpush1.bf16.xpose.msra.mxu1 %v11352_v54  ;;  %2985 = vmatprep.mubr.f32.mxu0 %v977_v55  ;;  %v595_v54 = vld [vmem:[%s12285_s26 + $0x930] sm:$0x3]  ;;  %v1037_v55 = vrot.slane %v246_v43, %v12313_v25  ;;  %v11396_v35 = vpack.c.bf16 %v601_v24, %v345_v23  ;;  %v605_v43 = vld [vmem:[%s12285_s26 + $0x980] sm:$0x3]  ;;  %v620_v23 = vld [vmem:[%s12285_s26 + $0x9f8] sm:$0x3] }
  0x8b   : > { %11355 = vmatprep.subr.bf16.mxu0 %v11354_v56  ;;  %3055 = vmatprep.mubr.f32.mxu1 %v978_v57  ;;  %v342_v56 = vld [vmem:[%s12285_s26 + $0x148] sm:$0xff]  ;;  %v11384_v63 = vpack.c.bf16 %v595_v54, %v339_v53  ;;  %v252_v24 = vld [vmem:[%s12279_s17 + $0x78] sm:$0xff] }
  0x8c   : > { %11359 = vmatprep.subr.bf16.mxu1 %v11358_v58  ;;  %v598_v57 = vld [vmem:[%s12285_s26 + $0x948] sm:$0x3]  ;;  %v1044_v58 = vrot.slane %v1030_v50, %v12313_v25  ;;  %v356_v50 = vld [vmem:[%s12285_s26 + $0x1b8] sm:$0xff] }
  0x8d   : > { %v11386_v1 = vpack.c.bf16 %v598_v57, %v342_v56 }
  0x8e   : > { %v1046_v2 = vcombine.high %v1044_v58, %v1044_v58 }
  0x90   : > { %2986 = vmatmul.mubr.f32.vlgmr.msra.gmra.mrb[10].mxu0 %v969_v46  ;;  %v1028_v46 = vcombine.high %v1020_v37, %v1020_v37 }
  0x91   : > { %3056 = vmatmul.mubr.f32.vlgmr.msra.gmra.mrb[10].mxu1 %v976_v49  ;;  %11357 = vmatpush1.bf16.xpose.msra.mxu0 %v11356_v7  ;;  %v11382_v49 = vpack.c.bf16 %v596_v42, %v340_v41  ;;  %v343_v7 = vld [vmem:[%s12285_s26 + $0x150] sm:$0xff]  ;;  %v1081_v41 = vcombine.high %v249_v34, %v249_v34  ;;  %v349_v42 = vld [vmem:[%s12285_s26 + $0x180] sm:$0xff] }
  0x92   : > { %11361 = vmatpush1.bf16.xpose.msra.mxu1 %v11360_v8  ;;  %3125 = vmatprep.mubr.f32.mxu0 %v994_v9  ;;  %v599_v8 = vld [vmem:[%s12285_s26 + $0x950] sm:$0x3]  ;;  %v1054_v9 = vrot.slane %v247_v61, %v12313_v25  ;;  %v11404_v53 = vpack.c.bf16 %v605_v43, %v349_v42  ;;  %v609_v61 = vld [vmem:[%s12285_s26 + $0x9a0] sm:$0x3]  ;;  %v624_v42 = vld [vmem:[%s12285_s26 + $0xa18] sm:$0x3] }
  0x93   : > { %11363 = vmatprep.subr.bf16.mxu0 %v11362_v10  ;;  %3195 = vmatprep.mubr.f32.mxu1 %v995_v11  ;;  %v346_v10 = vld [vmem:[%s12285_s26 + $0x168] sm:$0xff]  ;;  %v11392_v17 = vpack.c.bf16 %v599_v8, %v343_v7  ;;  %v253_v43 = vld [vmem:[%s12279_s17 + $0x80] sm:$0xff] }
  0x94   : > { %11367 = vmatprep.subr.bf16.mxu1 %v11366_v12  ;;  %v602_v11 = vld [vmem:[%s12285_s26 + $0x968] sm:$0x3]  ;;  %v1061_v12 = vrot.slane %v1047_v4, %v12313_v25  ;;  %v360_v4 = vld [vmem:[%s12285_s26 + $0x1d8] sm:$0xff] }
  0x95   : > { %v11394_v19 = vpack.c.bf16 %v602_v11, %v346_v10 }
  0x96   : > { %v1063_v20 = vcombine.high %v1061_v12, %v1061_v12 }
  0x98   : > { %3126 = vmatmul.mubr.f32.vlgmr.msra.gmra.mrb[12].mxu0 %v986_v0  ;;  %v1045_v0 = vcombine.high %v1037_v55, %v1037_v55 }
  0x99   : > { %3196 = vmatmul.mubr.f32.vlgmr.msra.gmra.mrb[12].mxu1 %v993_v3  ;;  %11365 = vmatpush1.bf16.xpose.msra.mxu0 %v11364_v26  ;;  %v11390_v3 = vpack.c.bf16 %v600_v60, %v344_v59  ;;  %v347_v26 = vld [vmem:[%s12285_s26 + $0x170] sm:$0xff]  ;;  %v1098_v59 = vcombine.high %v250_v52, %v250_v52  ;;  %v353_v60 = vld [vmem:[%s12285_s26 + $0x1a0] sm:$0xff] }
  0x9a   : > { %11369 = vmatpush1.bf16.xpose.msra.mxu1 %v11368_v27  ;;  %3265 = vmatprep.mubr.f32.mxu0 %v1011_v28  ;;  %v603_v27 = vld [vmem:[%s12285_s26 + $0x970] sm:$0x3]  ;;  %v1071_v28 = vrot.slane %v248_v15, %v12313_v25  ;;  %v11412_v7 = vpack.c.bf16 %v609_v61, %v353_v60  ;;  %v613_v15 = vld [vmem:[%s12285_s26 + $0x9c0] sm:$0x3]  ;;  %v628_v60 = vld [vmem:[%s12285_s26 + $0xa38] sm:$0x3] }
  0x9b   : > { %11371 = vmatprep.subr.bf16.mxu0 %v11370_v29  ;;  %3335 = vmatprep.mubr.f32.mxu1 %v1012_v30  ;;  %v350_v29 = vld [vmem:[%s12285_s26 + $0x188] sm:$0xff]  ;;  %v11400_v36 = vpack.c.bf16 %v603_v27, %v347_v26 }
  0x9c   : > { %11375 = vmatprep.subr.bf16.mxu1 %v11374_v31  ;;  %v606_v30 = vld [vmem:[%s12285_s26 + $0x988] sm:$0x3]  ;;  %v1078_v31 = vrot.slane %v1064_v22, %v12313_v25  ;;  %v364_v22 = vld [vmem:[%s12285_s26 + $0x1f8] sm:$0xff] }
  0x9d   : > { %v11402_v38 = vpack.c.bf16 %v606_v30, %v350_v29  ;;  %v254_v61 = vld [vmem:[%s12279_s17 + $0x88] sm:$0xff] }
  0x9e   : > { %v1080_v39 = vcombine.high %v1078_v31, %v1078_v31 }
  0xa0   : > { %3266 = vmatmul.mubr.f32.vlgmr.msra.gmra.mrb[14].mxu0 %v1003_v18  ;;  %v1062_v18 = vcombine.high %v1054_v9, %v1054_v9 }
  0xa1   : > { %3336 = vmatmul.mubr.f32.vlgmr.msra.gmra.mrb[14].mxu1 %v1010_v21  ;;  %11373 = vmatpush1.bf16.xpose.msra.mxu0 %v11372_v44  ;;  %v11398_v21 = vpack.c.bf16 %v604_v14, %v348_v13  ;;  %v351_v44 = vld [vmem:[%s12285_s26 + $0x190] sm:$0xff]  ;;  %v1115_v13 = vcombine.high %v251_v6, %v251_v6  ;;  %v357_v14 = vld [vmem:[%s12285_s26 + $0x1c0] sm:$0xff] }
  0xa2   : > { %11377 = vmatpush1.bf16.xpose.msra.mxu1 %v11376_v45  ;;  %3405 = vmatprep.mubr.f32.mxu0 %v1028_v46  ;;  %v607_v45 = vld [vmem:[%s12285_s26 + $0x990] sm:$0x3]  ;;  %v1088_v46 = vrot.slane %v249_v34, %v12313_v25  ;;  %v11420_v26 = vpack.c.bf16 %v613_v15, %v357_v14  ;;  %v617_v34 = vld [vmem:[%s12285_s26 + $0x9e0] sm:$0x3]  ;;  %v632_v14 = vld [vmem:[%s12285_s26 + $0xa58] sm:$0x3] }
  0xa3   : > { %11379 = vmatprep.subr.bf16.mxu0 %v11378_v47  ;;  %3475 = vmatprep.mubr.f32.mxu1 %v1029_v48  ;;  %v354_v47 = vld [vmem:[%s12285_s26 + $0x1a8] sm:$0xff]  ;;  %v11408_v54 = vpack.c.bf16 %v607_v45, %v351_v44  ;;  %v255_v15 = vld [vmem:[%s12279_s17 + $0x90] sm:$0xff] }
  0xa4   : > { %11383 = vmatprep.subr.bf16.mxu1 %v11382_v49  ;;  %v610_v48 = vld [vmem:[%s12285_s26 + $0x9a8] sm:$0x3]  ;;  %v1095_v49 = vrot.slane %v1081_v41, %v12313_v25  ;;  %v368_v41 = vld [vmem:[%s12285_s26 + $0x218] sm:$0xff] }
  0xa5   : > { %v11410_v56 = vpack.c.bf16 %v610_v48, %v354_v47 }
  0xa6   : > { %v1097_v57 = vcombine.high %v1095_v49, %v1095_v49 }
  0xa8   : > { %3406 = vmatmul.mubr.f32.vlgmr.msra.gmra.mrb[16].mxu0 %v1020_v37  ;;  %v1079_v37 = vcombine.high %v1071_v28, %v1071_v28 }
  0xa9   : > { %3476 = vmatmul.mubr.f32.vlgmr.msra.gmra.mrb[16].mxu1 %v1027_v40  ;;  %11381 = vmatpush1.bf16.xpose.msra.mxu0 %v11380_v62  ;;  %v11406_v40 = vpack.c.bf16 %v608_v33, %v352_v32  ;;  %v355_v62 = vld [vmem:[%s12285_s26 + $0x1b0] sm:$0xff]  ;;  %v1132_v32 = vcombine.high %v252_v24, %v252_v24  ;;  %v361_v33 = vld [vmem:[%s12285_s26 + $0x1e0] sm:$0xff] }
  0xaa   : > { %11385 = vmatpush1.bf16.xpose.msra.mxu1 %v11384_v63  ;;  %3545 = vmatprep.mubr.f32.mxu0 %v1045_v0  ;;  %v611_v63 = vld [vmem:[%s12285_s26 + $0x9b0] sm:$0x3]  ;;  %v1105_v0 = vrot.slane %v250_v52, %v12313_v25  ;;  %v11428_v44 = vpack.c.bf16 %v617_v34, %v361_v33  ;;  %v621_v52 = vld [vmem:[%s12285_s26 + $0xa00] sm:$0x3]  ;;  %v636_v33 = vld [vmem:[%s12285_s26 + $0xa78] sm:$0x3] }
  0xab   : > { %11387 = vmatprep.subr.bf16.mxu0 %v11386_v1  ;;  %3615 = vmatprep.mubr.f32.mxu1 %v1046_v2  ;;  %v358_v1 = vld [vmem:[%s12285_s26 + $0x1c8] sm:$0xff]  ;;  %v11416_v8 = vpack.c.bf16 %v611_v63, %v355_v62  ;;  %v256_v34 = vld [vmem:[%s12279_s17 + $0x98] sm:$0xff] }
  0xac   : > { %11391 = vmatprep.subr.bf16.mxu1 %v11390_v3  ;;  %v614_v2 = vld [vmem:[%s12285_s26 + $0x9c8] sm:$0x3]  ;;  %v1112_v3 = vrot.slane %v1098_v59, %v12313_v25  ;;  %v372_v59 = vld [vmem:[%s12285_s26 + $0x238] sm:$0xff] }
  0xad   : > { %v11418_v10 = vpack.c.bf16 %v614_v2, %v358_v1 }
  0xae   : > { %v1114_v11 = vcombine.high %v1112_v3, %v1112_v3 }
  0xb0   : > { %3546 = vmatmul.mubr.f32.vlgmr.msra.gmra.mrb[18].mxu0 %v1037_v55  ;;  %v1096_v55 = vcombine.high %v1088_v46, %v1088_v46 }
  0xb1   : > { %3616 = vmatmul.mubr.f32.vlgmr.msra.gmra.mrb[18].mxu1 %v1044_v58  ;;  %11389 = vmatpush1.bf16.xpose.msra.mxu0 %v11388_v16  ;;  %v11414_v58 = vpack.c.bf16 %v612_v51, %v356_v50  ;;  %v359_v16 = vld [vmem:[%s12285_s26 + $0x1d0] sm:$0xff]  ;;  %v1149_v50 = vcombine.high %v253_v43, %v253_v43  ;;  %v365_v51 = vld [vmem:[%s12285_s26 + $0x200] sm:$0xff] }
  0xb2   : > { %11393 = vmatpush1.bf16.xpose.msra.mxu1 %v11392_v17  ;;  %3685 = vmatprep.mubr.f32.mxu0 %v1062_v18  ;;  %v615_v17 = vld [vmem:[%s12285_s26 + $0x9d0] sm:$0x3]  ;;  %v1122_v18 = vrot.slane %v251_v6, %v12313_v25  ;;  %v11436_v62 = vpack.c.bf16 %v621_v52, %v365_v51  ;;  %v625_v6 = vld [vmem:[%s12285_s26 + $0xa20] sm:$0x3]  ;;  %v640_v51 = vld [vmem:[%s12285_s26 + $0xa98] sm:$0x3] }
  0xb3   : > { %11395 = vmatprep.subr.bf16.mxu0 %v11394_v19  ;;  %3755 = vmatprep.mubr.f32.mxu1 %v1063_v20  ;;  %v362_v19 = vld [vmem:[%s12285_s26 + $0x1e8] sm:$0xff]  ;;  %v11424_v27 = vpack.c.bf16 %v615_v17, %v359_v16  ;;  %v257_v52 = vld [vmem:[%s12279_s17 + $0xa0] sm:$0xff] }
  0xb4   : > { %11399 = vmatprep.subr.bf16.mxu1 %v11398_v21  ;;  %v618_v20 = vld [vmem:[%s12285_s26 + $0x9e8] sm:$0x3]  ;;  %v1129_v21 = vrot.slane %v1115_v13, %v12313_v25  ;;  %v376_v13 = vld [vmem:[%s12285_s26 + $0x258] sm:$0xff] }
  0xb5   : > { %v11426_v29 = vpack.c.bf16 %v618_v20, %v362_v19 }
  0xb6   : > { %v1131_v30 = vcombine.high %v1129_v21, %v1129_v21 }
  0xb8   : > { %3686 = vmatmul.mubr.f32.vlgmr.msra.gmra.mrb[20].mxu0 %v1054_v9  ;;  %v1113_v9 = vcombine.high %v1105_v0, %v1105_v0 }
  0xb9   : > { %3756 = vmatmul.mubr.f32.vlgmr.msra.gmra.mrb[20].mxu1 %v1061_v12  ;;  %11397 = vmatpush1.bf16.xpose.msra.mxu0 %v11396_v35  ;;  %v11422_v12 = vpack.c.bf16 %v616_v5, %v360_v4  ;;  %v363_v35 = vld [vmem:[%s12285_s26 + $0x1f0] sm:$0xff]  ;;  %v1166_v4 = vcombine.high %v254_v61, %v254_v61  ;;  %v369_v5 = vld [vmem:[%s12285_s26 + $0x220] sm:$0xff] }
  0xba   : > { %11401 = vmatpush1.bf16.xpose.msra.mxu1 %v11400_v36  ;;  %3825 = vmatprep.mubr.f32.mxu0 %v1079_v37  ;;  %v619_v36 = vld [vmem:[%s12285_s26 + $0x9f0] sm:$0x3]  ;;  %v1139_v37 = vrot.slane %v252_v24, %v12313_v25  ;;  %v11444_v16 = vpack.c.bf16 %v625_v6, %v369_v5  ;;  %v629_v24 = vld [vmem:[%s12285_s26 + $0xa40] sm:$0x3]  ;;  %v644_v5 = vld [vmem:[%s12285_s26 + $0xab8] sm:$0x3] }
  0xbb   : > { %11403 = vmatprep.subr.bf16.mxu0 %v11402_v38  ;;  %3895 = vmatprep.mubr.f32.mxu1 %v1080_v39  ;;  %v366_v38 = vld [vmem:[%s12285_s26 + $0x208] sm:$0xff]  ;;  %v11432_v45 = vpack.c.bf16 %v619_v36, %v363_v35 }
  0xbc   : > { %11407 = vmatprep.subr.bf16.mxu1 %v11406_v40  ;;  %v622_v39 = vld [vmem:[%s12285_s26 + $0xa08] sm:$0x3]  ;;  %v1146_v40 = vrot.slane %v1132_v32, %v12313_v25  ;;  %v380_v32 = vld [vmem:[%s12285_s26 + $0x278] sm:$0xff] }
  0xbd   : > { %v11434_v47 = vpack.c.bf16 %v622_v39, %v366_v38  ;;  %v258_v6 = vld [vmem:[%s12279_s17 + $0xa8] sm:$0xff] }
  0xbe   : > { %v1148_v48 = vcombine.high %v1146_v40, %v1146_v40 }
  0xc0   : > { %3826 = vmatmul.mubr.f32.vlgmr.msra.gmra.mrb[22].mxu0 %v1071_v28  ;;  %v1130_v28 = vcombine.high %v1122_v18, %v1122_v18 }
  0xc1   : > { %3896 = vmatmul.mubr.f32.vlgmr.msra.gmra.mrb[22].mxu1 %v1078_v31  ;;  %11405 = vmatpush1.bf16.xpose.msra.mxu0 %v11404_v53  ;;  %v11430_v31 = vpack.c.bf16 %v620_v23, %v364_v22  ;;  %v367_v53 = vld [vmem:[%s12285_s26 + $0x210] sm:$0xff]  ;;  %v1183_v22 = vcombine.high %v255_v15, %v255_v15  ;;  %v373_v23 = vld [vmem:[%s12285_s26 + $0x240] sm:$0xff] }
  0xc2   : > { %11409 = vmatpush1.bf16.xpose.msra.mxu1 %v11408_v54  ;;  %3965 = vmatprep.mubr.f32.mxu0 %v1096_v55  ;;  %v623_v54 = vld [vmem:[%s12285_s26 + $0xa10] sm:$0x3]  ;;  %v1156_v55 = vrot.slane %v253_v43, %v12313_v25  ;;  %v11452_v35 = vpack.c.bf16 %v629_v24, %v373_v23  ;;  %v633_v43 = vld [vmem:[%s12285_s26 + $0xa60] sm:$0x3]  ;;  %v648_v23 = vld [vmem:[%s12285_s26 + $0xad8] sm:$0x3] }
  0xc3   : > { %11411 = vmatprep.subr.bf16.mxu0 %v11410_v56  ;;  %4035 = vmatprep.mubr.f32.mxu1 %v1097_v57  ;;  %v370_v56 = vld [vmem:[%s12285_s26 + $0x228] sm:$0xff]  ;;  %v11440_v63 = vpack.c.bf16 %v623_v54, %v367_v53  ;;  %v259_v24 = vld [vmem:[%s12279_s17 + $0xb0] sm:$0xff] }
  0xc4   : > { %11415 = vmatprep.subr.bf16.mxu1 %v11414_v58  ;;  %v626_v57 = vld [vmem:[%s12285_s26 + $0xa28] sm:$0x3]  ;;  %v1163_v58 = vrot.slane %v1149_v50, %v12313_v25  ;;  %v384_v50 = vld [vmem:[%s12285_s26 + $0x298] sm:$0xff] }
  0xc5   : > { %v11442_v1 = vpack.c.bf16 %v626_v57, %v370_v56 }
  0xc6   : > { %v1165_v2 = vcombine.high %v1163_v58, %v1163_v58 }
  0xc8   : > { %3966 = vmatmul.mubr.f32.vlgmr.msra.gmra.mrb[24].mxu0 %v1088_v46  ;;  %v1147_v46 = vcombine.high %v1139_v37, %v1139_v37 }
  0xc9   : > { %4036 = vmatmul.mubr.f32.vlgmr.msra.gmra.mrb[24].mxu1 %v1095_v49  ;;  %11413 = vmatpush1.bf16.xpose.msra.mxu0 %v11412_v7  ;;  %v11438_v49 = vpack.c.bf16 %v624_v42, %v368_v41  ;;  %v371_v7 = vld [vmem:[%s12285_s26 + $0x230] sm:$0xff]  ;;  %v1200_v41 = vcombine.high %v256_v34, %v256_v34  ;;  %v377_v42 = vld [vmem:[%s12285_s26 + $0x260] sm:$0xff] }
  0xca   : > { %11417 = vmatpush1.bf16.xpose.msra.mxu1 %v11416_v8  ;;  %4105 = vmatprep.mubr.f32.mxu0 %v1113_v9  ;;  %v627_v8 = vld [vmem:[%s12285_s26 + $0xa30] sm:$0x3]  ;;  %v1173_v9 = vrot.slane %v254_v61, %v12313_v25  ;;  %v11460_v53 = vpack.c.bf16 %v633_v43, %v377_v42  ;;  %v637_v61 = vld [vmem:[%s12285_s26 + $0xa80] sm:$0x3]  ;;  %v652_v42 = vld [vmem:[%s12285_s26 + $0xaf8] sm:$0x3] }
  0xcb   : > { %11419 = vmatprep.subr.bf16.mxu0 %v11418_v10  ;;  %4175 = vmatprep.mubr.f32.mxu1 %v1114_v11  ;;  %v374_v10 = vld [vmem:[%s12285_s26 + $0x248] sm:$0xff]  ;;  %v11448_v17 = vpack.c.bf16 %v627_v8, %v371_v7  ;;  %v260_v43 = vld [vmem:[%s12279_s17 + $0xb8] sm:$0xff] }
  0xcc   : > { %11423 = vmatprep.subr.bf16.mxu1 %v11422_v12  ;;  %v630_v11 = vld [vmem:[%s12285_s26 + $0xa48] sm:$0x3]  ;;  %v1180_v12 = vrot.slane %v1166_v4, %v12313_v25  ;;  %v388_v4 = vld [vmem:[%s12285_s26 + $0x2b8] sm:$0xff] }
  0xcd   : > { %v11450_v19 = vpack.c.bf16 %v630_v11, %v374_v10 }
  0xce   : > { %v1182_v20 = vcombine.high %v1180_v12, %v1180_v12 }
  0xd0   : > { %4106 = vmatmul.mubr.f32.vlgmr.msra.gmra.mrb[26].mxu0 %v1105_v0  ;;  %v1164_v0 = vcombine.high %v1156_v55, %v1156_v55 }
  0xd1   : > { %4176 = vmatmul.mubr.f32.vlgmr.msra.gmra.mrb[26].mxu1 %v1112_v3  ;;  %11421 = vmatpush1.bf16.xpose.msra.mxu0 %v11420_v26  ;;  %v11446_v3 = vpack.c.bf16 %v628_v60, %v372_v59  ;;  %v375_v26 = vld [vmem:[%s12285_s26 + $0x250] sm:$0xff]  ;;  %v1217_v59 = vcombine.high %v257_v52, %v257_v52  ;;  %v381_v60 = vld [vmem:[%s12285_s26 + $0x280] sm:$0xff] }
  0xd2   : > { %11425 = vmatpush1.bf16.xpose.msra.mxu1 %v11424_v27  ;;  %4245 = vmatprep.mubr.f32.mxu0 %v1130_v28  ;;  %v631_v27 = vld [vmem:[%s12285_s26 + $0xa50] sm:$0x3]  ;;  %v1190_v28 = vrot.slane %v255_v15, %v12313_v25  ;;  %v11468_v7 = vpack.c.bf16 %v637_v61, %v381_v60  ;;  %v641_v15 = vld [vmem:[%s12285_s26 + $0xaa0] sm:$0x3]  ;;  %v656_v60 = vld [vmem:[%s12285_s26 + $0xb18] sm:$0x3] }
  0xd3   : > { %11427 = vmatprep.subr.bf16.mxu0 %v11426_v29  ;;  %4315 = vmatprep.mubr.f32.mxu1 %v1131_v30  ;;  %v378_v29 = vld [vmem:[%s12285_s26 + $0x268] sm:$0xff]  ;;  %v11456_v36 = vpack.c.bf16 %v631_v27, %v375_v26  ;;  %v261_v61 = vld [vmem:[%s12279_s17 + $0xc0] sm:$0xff] }
  0xd4   : > { %11431 = vmatprep.subr.bf16.mxu1 %v11430_v31  ;;  %v634_v30 = vld [vmem:[%s12285_s26 + $0xa68] sm:$0x3]  ;;  %v1197_v31 = vrot.slane %v1183_v22, %v12313_v25  ;;  %v392_v22 = vld [vmem:[%s12285_s26 + $0x2d8] sm:$0xff] }
  0xd5   : > { %v11458_v38 = vpack.c.bf16 %v634_v30, %v378_v29 }
  0xd6   : > { %v1199_v39 = vcombine.high %v1197_v31, %v1197_v31 }
  0xd8   : > { %4246 = vmatmul.mubr.f32.vlgmr.msra.gmra.mrb[28].mxu0 %v1122_v18  ;;  %v1181_v18 = vcombine.high %v1173_v9, %v1173_v9 }
  0xd9   : > { %4316 = vmatmul.mubr.f32.vlgmr.msra.gmra.mrb[28].mxu1 %v1129_v21  ;;  %11429 = vmatpush1.bf16.xpose.msra.mxu0 %v11428_v44  ;;  %v11454_v21 = vpack.c.bf16 %v632_v14, %v376_v13  ;;  %v379_v44 = vld [vmem:[%s12285_s26 + $0x270] sm:$0xff]  ;;  %v1234_v13 = vcombine.high %v258_v6, %v258_v6  ;;  %v385_v14 = vld [vmem:[%s12285_s26 + $0x2a0] sm:$0xff] }
  0xda   : > { %11433 = vmatpush1.bf16.xpose.msra.mxu1 %v11432_v45  ;;  %4385 = vmatprep.mubr.f32.mxu0 %v1147_v46  ;;  %v635_v45 = vld [vmem:[%s12285_s26 + $0xa70] sm:$0x3]  ;;  %v1207_v46 = vrot.slane %v256_v34, %v12313_v25  ;;  %v11476_v26 = vpack.c.bf16 %v641_v15, %v385_v14  ;;  %v645_v34 = vld [vmem:[%s12285_s26 + $0xac0] sm:$0x3]  ;;  %v660_v14 = vld [vmem:[%s12285_s26 + $0xb38] sm:$0x3] }
  0xdb   : > { %11435 = vmatprep.subr.bf16.mxu0 %v11434_v47  ;;  %4455 = vmatprep.mubr.f32.mxu1 %v1148_v48  ;;  %v382_v47 = vld [vmem:[%s12285_s26 + $0x288] sm:$0xff]  ;;  %v11464_v54 = vpack.c.bf16 %v635_v45, %v379_v44 }
  0xdc   : > { %11439 = vmatprep.subr.bf16.mxu1 %v11438_v49  ;;  %v638_v48 = vld [vmem:[%s12285_s26 + $0xa88] sm:$0x3]  ;;  %v1214_v49 = vrot.slane %v1200_v41, %v12313_v25  ;;  %v396_v41 = vld [vmem:[%s12285_s26 + $0x2f8] sm:$0xff] }
  0xdd   : > { %v11466_v56 = vpack.c.bf16 %v638_v48, %v382_v47  ;;  %v262_v15 = vld [vmem:[%s12279_s17 + $0xc8] sm:$0xff] }
  0xde   : > { %v1216_v57 = vcombine.high %v1214_v49, %v1214_v49 }
  0xe0   : > { %4386 = vmatmul.mubr.f32.vlgmr.msra.gmra.mrb[30].mxu0 %v1139_v37  ;;  %v1198_v37 = vcombine.high %v1190_v28, %v1190_v28 }
  0xe1   : > { %4456 = vmatmul.mubr.f32.vlgmr.msra.gmra.mrb[30].mxu1 %v1146_v40  ;;  %11437 = vmatpush1.bf16.xpose.msra.mxu0 %v11436_v62  ;;  %v11462_v40 = vpack.c.bf16 %v636_v33, %v380_v32  ;;  %v383_v62 = vld [vmem:[%s12285_s26 + $0x290] sm:$0xff]  ;;  %v1251_v32 = vcombine.high %v259_v24, %v259_v24  ;;  %v389_v33 = vld [vmem:[%s12285_s26 + $0x2c0] sm:$0xff] }
  0xe2   : > { %11441 = vmatpush1.bf16.xpose.msra.mxu1 %v11440_v63  ;;  %4525 = vmatprep.mubr.f32.mxu0 %v1164_v0  ;;  %v639_v63 = vld [vmem:[%s12285_s26 + $0xa90] sm:$0x3]  ;;  %v1224_v0 = vrot.slane %v257_v52, %v12313_v25  ;;  %v11484_v44 = vpack.c.bf16 %v645_v34, %v389_v33  ;;  %v649_v52 = vld [vmem:[%s12285_s26 + $0xae0] sm:$0x3]  ;;  %v664_v33 = vld [vmem:[%s12285_s26 + $0xb58] sm:$0x3] }
  0xe3   : > { %11443 = vmatprep.subr.bf16.mxu0 %v11442_v1  ;;  %4595 = vmatprep.mubr.f32.mxu1 %v1165_v2  ;;  %v386_v1 = vld [vmem:[%s12285_s26 + $0x2a8] sm:$0xff]  ;;  %v11472_v8 = vpack.c.bf16 %v639_v63, %v383_v62  ;;  %v263_v34 = vld [vmem:[%s12279_s17 + $0xd0] sm:$0xff] }
  0xe4   : > { %11447 = vmatprep.subr.bf16.mxu1 %v11446_v3  ;;  %v642_v2 = vld [vmem:[%s12285_s26 + $0xaa8] sm:$0x3]  ;;  %v1231_v3 = vrot.slane %v1217_v59, %v12313_v25  ;;  %v400_v59 = vld [vmem:[%s12285_s26 + $0x318] sm:$0xff] }
  0xe5   : > { %v11474_v10 = vpack.c.bf16 %v642_v2, %v386_v1 }
  0xe6   : > { %v1233_v11 = vcombine.high %v1231_v3, %v1231_v3 }
  0xe8   : > { %4526 = vmatmul.mubr.f32.vlgmr.msra.gmra.mrb[32].mxu0 %v1156_v55  ;;  %v1215_v55 = vcombine.high %v1207_v46, %v1207_v46 }
  0xe9   : > { %4596 = vmatmul.mubr.f32.vlgmr.msra.gmra.mrb[32].mxu1 %v1163_v58  ;;  %11445 = vmatpush1.bf16.xpose.msra.mxu0 %v11444_v16  ;;  %v11470_v58 = vpack.c.bf16 %v640_v51, %v384_v50  ;;  %v387_v16 = vld [vmem:[%s12285_s26 + $0x2b0] sm:$0xff]  ;;  %v1268_v50 = vcombine.high %v260_v43, %v260_v43  ;;  %v393_v51 = vld [vmem:[%s12285_s26 + $0x2e0] sm:$0xff] }
  0xea   : > { %11449 = vmatpush1.bf16.xpose.msra.mxu1 %v11448_v17  ;;  %4665 = vmatprep.mubr.f32.mxu0 %v1181_v18  ;;  %v643_v17 = vld [vmem:[%s12285_s26 + $0xab0] sm:$0x3]  ;;  %v1241_v18 = vrot.slane %v258_v6, %v12313_v25  ;;  %v11492_v62 = vpack.c.bf16 %v649_v52, %v393_v51  ;;  %v653_v6 = vld [vmem:[%s12285_s26 + $0xb00] sm:$0x3]  ;;  %v668_v51 = vld [vmem:[%s12285_s26 + $0xb78] sm:$0x3] }
  0xeb   : > { %11451 = vmatprep.subr.bf16.mxu0 %v11450_v19  ;;  %4735 = vmatprep.mubr.f32.mxu1 %v1182_v20  ;;  %v390_v19 = vld [vmem:[%s12285_s26 + $0x2c8] sm:$0xff]  ;;  %v11480_v27 = vpack.c.bf16 %v643_v17, %v387_v16  ;;  %v264_v52 = vld [vmem:[%s12279_s17 + $0xd8] sm:$0xff] }
  0xec   : > { %11455 = vmatprep.subr.bf16.mxu1 %v11454_v21  ;;  %v646_v20 = vld [vmem:[%s12285_s26 + $0xac8] sm:$0x3]  ;;  %v1248_v21 = vrot.slane %v1234_v13, %v12313_v25  ;;  %v404_v13 = vld [vmem:[%s12285_s26 + $0x338] sm:$0xff] }
  0xed   : > { %v11482_v29 = vpack.c.bf16 %v646_v20, %v390_v19 }
  0xee   : > { %v1250_v30 = vcombine.high %v1248_v21, %v1248_v21 }
  0xf0   : > { %4666 = vmatmul.mubr.f32.vlgmr.msra.gmra.mrb[34].mxu0 %v1173_v9  ;;  %v1232_v9 = vcombine.high %v1224_v0, %v1224_v0 }
  0xf1   : > { %4736 = vmatmul.mubr.f32.vlgmr.msra.gmra.mrb[34].mxu1 %v1180_v12  ;;  %11453 = vmatpush1.bf16.xpose.msra.mxu0 %v11452_v35  ;;  %v11478_v12 = vpack.c.bf16 %v644_v5, %v388_v4  ;;  %v391_v35 = vld [vmem:[%s12285_s26 + $0x2d0] sm:$0xff]  ;;  %v1285_v4 = vcombine.high %v261_v61, %v261_v61  ;;  %v397_v5 = vld [vmem:[%s12285_s26 + $0x300] sm:$0xff] }
  0xf2   : > { %11457 = vmatpush1.bf16.xpose.msra.mxu1 %v11456_v36  ;;  %4805 = vmatprep.mubr.f32.mxu0 %v1198_v37  ;;  %v647_v36 = vld [vmem:[%s12285_s26 + $0xad0] sm:$0x3]  ;;  %v1258_v37 = vrot.slane %v259_v24, %v12313_v25  ;;  %v11500_v16 = vpack.c.bf16 %v653_v6, %v397_v5  ;;  %v657_v24 = vld [vmem:[%s12285_s26 + $0xb20] sm:$0x3]  ;;  %v672_v5 = vld [vmem:[%s12285_s26 + $0xb98] sm:$0x3] }
  0xf3   : > { %11459 = vmatprep.subr.bf16.mxu0 %v11458_v38  ;;  %4875 = vmatprep.mubr.f32.mxu1 %v1199_v39  ;;  %v394_v38 = vld [vmem:[%s12285_s26 + $0x2e8] sm:$0xff]  ;;  %v11488_v45 = vpack.c.bf16 %v647_v36, %v391_v35  ;;  %v265_v6 = vld [vmem:[%s12279_s17 + $0xe0] sm:$0xff] }
  0xf4   : > { %11463 = vmatprep.subr.bf16.mxu1 %v11462_v40  ;;  %v650_v39 = vld [vmem:[%s12285_s26 + $0xae8] sm:$0x3]  ;;  %v1265_v40 = vrot.slane %v1251_v32, %v12313_v25  ;;  %v408_v32 = vld [vmem:[%s12285_s26 + $0x358] sm:$0xff] }
  0xf5   : > { %v11490_v47 = vpack.c.bf16 %v650_v39, %v394_v38 }
  0xf6   : > { %v1267_v48 = vcombine.high %v1265_v40, %v1265_v40 }
  0xf8   : > { %4806 = vmatmul.mubr.f32.vlgmr.msra.gmra.mrb[36].mxu0 %v1190_v28  ;;  %v1249_v28 = vcombine.high %v1241_v18, %v1241_v18 }
  0xf9   : > { %4876 = vmatmul.mubr.f32.vlgmr.msra.gmra.mrb[36].mxu1 %v1197_v31  ;;  %11461 = vmatpush1.bf16.xpose.msra.mxu0 %v11460_v53  ;;  %v11486_v31 = vpack.c.bf16 %v648_v23, %v392_v22  ;;  %v395_v53 = vld [vmem:[%s12285_s26 + $0x2f0] sm:$0xff]  ;;  %v1302_v22 = vcombine.high %v262_v15, %v262_v15  ;;  %v401_v23 = vld [vmem:[%s12285_s26 + $0x320] sm:$0xff] }
  0xfa   : > { %11465 = vmatpush1.bf16.xpose.msra.mxu1 %v11464_v54  ;;  %4945 = vmatprep.mubr.f32.mxu0 %v1215_v55  ;;  %v651_v54 = vld [vmem:[%s12285_s26 + $0xaf0] sm:$0x3]  ;;  %v1275_v55 = vrot.slane %v260_v43, %v12313_v25  ;;  %v11508_v35 = vpack.c.bf16 %v657_v24, %v401_v23  ;;  %v661_v43 = vld [vmem:[%s12285_s26 + $0xb40] sm:$0x3] }
  0xfb   : > { %11467 = vmatprep.subr.bf16.mxu0 %v11466_v56  ;;  %5015 = vmatprep.mubr.f32.mxu1 %v1216_v57  ;;  %v398_v56 = vld [vmem:[%s12285_s26 + $0x308] sm:$0xff]  ;;  %v11496_v63 = vpack.c.bf16 %v651_v54, %v395_v53 }
  0xfc   : > { %11471 = vmatprep.subr.bf16.mxu1 %v11470_v58  ;;  %v654_v57 = vld [vmem:[%s12285_s26 + $0xb08] sm:$0x3]  ;;  %v1282_v58 = vrot.slane %v1268_v50, %v12313_v25  ;;  %v412_v50 = vld [vmem:[%s12285_s26 + $0x378] sm:$0xff] }
  0xfd   : > { %v11498_v1 = vpack.c.bf16 %v654_v57, %v398_v56 }
  0xfe   : > { %v1284_v2 = vcombine.high %v1282_v58, %v1282_v58 }
 0x100   : > { %4946 = vmatmul.mubr.f32.vlgmr.msra.gmra.mrb[38].mxu0 %v1207_v46  ;;  %v1266_v46 = vcombine.high %v1258_v37, %v1258_v37 }
 0x101   : > { %5016 = vmatmul.mubr.f32.vlgmr.msra.gmra.mrb[38].mxu1 %v1214_v49  ;;  %11469 = vmatpush1.bf16.xpose.msra.mxu0 %v11468_v7  ;;  %v11494_v49 = vpack.c.bf16 %v652_v42, %v396_v41  ;;  %v399_v7 = vld [vmem:[%s12285_s26 + $0x310] sm:$0xff]  ;;  %v1319_v41 = vcombine.high %v263_v34, %v263_v34  ;;  %v405_v42 = vld [vmem:[%s12285_s26 + $0x340] sm:$0xff] }
 0x102   : > { %11473 = vmatpush1.bf16.xpose.msra.mxu1 %v11472_v8  ;;  %5085 = vmatprep.mubr.f32.mxu0 %v1232_v9  ;;  %v655_v8 = vld [vmem:[%s12285_s26 + $0xb10] sm:$0x3]  ;;  %v1292_v9 = vrot.slane %v261_v61, %v12313_v25  ;;  %v11516_v53 = vpack.c.bf16 %v661_v43, %v405_v42  ;;  %v665_v61 = vld [vmem:[%s12285_s26 + $0xb60] sm:$0x3] }
 0x103   : > { %11475 = vmatprep.subr.bf16.mxu0 %v11474_v10  ;;  %5155 = vmatprep.mubr.f32.mxu1 %v1233_v11  ;;  %v402_v10 = vld [vmem:[%s12285_s26 + $0x328] sm:$0xff]  ;;  %v11504_v17 = vpack.c.bf16 %v655_v8, %v399_v7 }
 0x104   : > { %11479 = vmatprep.subr.bf16.mxu1 %v11478_v12  ;;  %v658_v11 = vld [vmem:[%s12285_s26 + $0xb28] sm:$0x3]  ;;  %v1299_v12 = vrot.slane %v1285_v4, %v12313_v25  ;;  %v416_v4 = vld [vmem:[%s12285_s26 + $0x398] sm:$0xff] }
 0x105   : > { %v11506_v19 = vpack.c.bf16 %v658_v11, %v402_v10 }
 0x106   : > { %v1301_v20 = vcombine.high %v1299_v12, %v1299_v12 }
 0x108   : > { %5086 = vmatmul.mubr.f32.vlgmr.msra.gmra.mrb[40].mxu0 %v1224_v0  ;;  %v1283_v0 = vcombine.high %v1275_v55, %v1275_v55 }
 0x109   : > { %5156 = vmatmul.mubr.f32.vlgmr.msra.gmra.mrb[40].mxu1 %v1231_v3  ;;  %11477 = vmatpush1.bf16.xpose.msra.mxu0 %v11476_v26  ;;  %v11502_v3 = vpack.c.bf16 %v656_v60, %v400_v59  ;;  %v403_v26 = vld [vmem:[%s12285_s26 + $0x330] sm:$0xff]  ;;  %v1336_v59 = vcombine.high %v264_v52, %v264_v52  ;;  %v409_v60 = vld [vmem:[%s12285_s26 + $0x360] sm:$0xff] }
 0x10a   : > { %11481 = vmatpush1.bf16.xpose.msra.mxu1 %v11480_v27  ;;  %5225 = vmatprep.mubr.f32.mxu0 %v1249_v28  ;;  %v659_v27 = vld [vmem:[%s12285_s26 + $0xb30] sm:$0x3]  ;;  %v1309_v28 = vrot.slane %v262_v15, %v12313_v25  ;;  %v11524_v7 = vpack.c.bf16 %v665_v61, %v409_v60  ;;  %v669_v15 = vld [vmem:[%s12285_s26 + $0xb80] sm:$0x3] }
 0x10b   : > { %11483 = vmatprep.subr.bf16.mxu0 %v11482_v29  ;;  %5295 = vmatprep.mubr.f32.mxu1 %v1250_v30  ;;  %v406_v29 = vld [vmem:[%s12285_s26 + $0x348] sm:$0xff]  ;;  %v11512_v36 = vpack.c.bf16 %v659_v27, %v403_v26 }
 0x10c   : > { %11487 = vmatprep.subr.bf16.mxu1 %v11486_v31  ;;  %v662_v30 = vld [vmem:[%s12285_s26 + $0xb48] sm:$0x3]  ;;  %v1316_v31 = vrot.slane %v1302_v22, %v12313_v25 }
 0x10d   : > { %v11514_v38 = vpack.c.bf16 %v662_v30, %v406_v29  ;;  %v674_v22 = vld [vmem:[%s12285_s26 + $0xba8] sm:$0x3]  ;;  %v676_v29 = vld [vmem:[%s12285_s26 + $0xbb8] sm:$0x3] }
 0x10e   : > { %v1318_v39 = vcombine.high %v1316_v31, %v1316_v31  ;;  %v266_v30 = vld [vmem:[%s12279_s17 + $0xe8] sm:$0xff] }
 0x10f   : > { %v1377_v42 = vrot.slane %v266_v30, %v12313_v25 }
 0x110   : > { %5226 = vmatmul.mubr.f32.vlgmr.msra.gmra.mrb[42].mxu0 %v1241_v18  ;;  %v1300_v18 = vcombine.high %v1292_v9, %v1292_v9 }
 0x111   : > { %5296 = vmatmul.mubr.f32.vlgmr.msra.gmra.mrb[42].mxu1 %v1248_v21  ;;  %11485 = vmatpush1.bf16.xpose.msra.mxu0 %v11484_v44  ;;  %v11510_v21 = vpack.c.bf16 %v660_v14, %v404_v13  ;;  %v407_v44 = vld [vmem:[%s12285_s26 + $0x350] sm:$0xff]  ;;  %v1353_v13 = vcombine.high %v265_v6, %v265_v6  ;;  %v413_v14 = vld [vmem:[%s12285_s26 + $0x380] sm:$0xff] }
 0x112   : > { %11489 = vmatpush1.bf16.xpose.msra.mxu1 %v11488_v45  ;;  %5365 = vmatprep.mubr.f32.mxu0 %v1266_v46  ;;  %v663_v45 = vld [vmem:[%s12285_s26 + $0xb50] sm:$0x3]  ;;  %v1326_v46 = vrot.slane %v263_v34, %v12313_v25 }
 0x113   : > { %11491 = vmatprep.subr.bf16.mxu0 %v11490_v47  ;;  %5435 = vmatprep.mubr.f32.mxu1 %v1267_v48  ;;  %v410_v47 = vld [vmem:[%s12285_s26 + $0x368] sm:$0xff]  ;;  %v11520_v54 = vpack.c.bf16 %v663_v45, %v407_v44  ;;  %v1367_v23 = vrot.slane %v1353_v13, %v12313_v25  ;;  %v268_v13 = vld [vmem:[%s12279_s17 + $0xf8] sm:$0xff] }
 0x114   : > { %11495 = vmatprep.subr.bf16.mxu1 %v11494_v49  ;;  %v666_v48 = vld [vmem:[%s12285_s26 + $0xb68] sm:$0x3]  ;;  %v1333_v49 = vrot.slane %v1319_v41, %v12313_v25  ;;  %v675_v41 = vld [vmem:[%s12285_s26 + $0xbb0] sm:$0x3] }
 0x115   : > { %v11522_v56 = vpack.c.bf16 %v666_v48, %v410_v47  ;;  %v422_v45 = vld [vmem:[%s12285_s26 + $0x3c8] sm:$0xff] }
 0x116   : > { %v1335_v57 = vcombine.high %v1333_v49, %v1333_v49 }
 0x118   : > { %5366 = vmatmul.mubr.f32.vlgmr.msra.gmra.mrb[44].mxu0 %v1258_v37  ;;  %v1317_v37 = vcombine.high %v1309_v28, %v1309_v28 }
 0x119   : > { %5436 = vmatmul.mubr.f32.vlgmr.msra.gmra.mrb[44].mxu1 %v1265_v40  ;;  %11493 = vmatpush1.bf16.xpose.msra.mxu0 %v11492_v62  ;;  %v11518_v40 = vpack.c.bf16 %v664_v33, %v408_v32  ;;  %v411_v62 = vld [vmem:[%s12285_s26 + $0x370] sm:$0xff] }
 0x11a   : > { %11497 = vmatpush1.bf16.xpose.msra.mxu1 %v11496_v63  ;;  %5505 = vmatprep.mubr.f32.mxu0 %v1283_v0  ;;  %v667_v63 = vld [vmem:[%s12285_s26 + $0xb70] sm:$0x3]  ;;  %v1343_v0 = vrot.slane %v264_v52, %v12313_v25  ;;  %v680_v52 = vld [vmem:[%s12285_s26 + $0xbd8] sm:$0x3] }
 0x11b   : > { %11499 = vmatprep.subr.bf16.mxu0 %v11498_v1  ;;  %5575 = vmatprep.mubr.f32.mxu1 %v1284_v2  ;;  %v414_v1 = vld [vmem:[%s12285_s26 + $0x388] sm:$0xff]  ;;  %v11528_v8 = vpack.c.bf16 %v667_v63, %v411_v62  ;;  %v421_v62 = vld [vmem:[%s12285_s26 + $0x3c0] sm:$0xff] }
 0x11c   : > { %11503 = vmatprep.subr.bf16.mxu1 %v11502_v3  ;;  %v670_v2 = vld [vmem:[%s12285_s26 + $0xb88] sm:$0x3]  ;;  %v1350_v3 = vrot.slane %v1336_v59, %v12313_v25  ;;  %v677_v63 = vld [vmem:[%s12285_s26 + $0xbc0] sm:$0x3] }
 0x11d   : > { %v11530_v10 = vpack.c.bf16 %v670_v2, %v414_v1  ;;  %v679_v1 = vld [vmem:[%s12285_s26 + $0xbd0] sm:$0x3] }
 0x11e   : > { %v1352_v11 = vcombine.high %v1350_v3, %v1350_v3 }
 0x120   : > { %5506 = vmatmul.mubr.f32.vlgmr.msra.gmra.mrb[46].mxu0 %v1275_v55  ;;  %v1334_v55 = vcombine.high %v1326_v46, %v1326_v46 }
 0x121   : > { %5576 = vmatmul.mubr.f32.vlgmr.msra.gmra.mrb[46].mxu1 %v1282_v58  ;;  %11501 = vmatpush1.bf16.xpose.msra.mxu0 %v11500_v16  ;;  %v11526_v58 = vpack.c.bf16 %v668_v51, %v412_v50  ;;  %v415_v16 = vld [vmem:[%s12285_s26 + $0x390] sm:$0xff]  ;;  %v424_v51 = vld [vmem:[%s12285_s26 + $0x3d8] sm:$0xff] }
 0x122   : > { %11505 = vmatpush1.bf16.xpose.msra.mxu1 %v11504_v17  ;;  %5645 = vmatprep.mubr.f32.mxu0 %v1300_v18  ;;  %v671_v17 = vld [vmem:[%s12285_s26 + $0xb90] sm:$0x3]  ;;  %v1360_v18 = vrot.slane %v265_v6, %v12313_v25  ;;  %v11550_v60 = vpack.c.bf16 %v680_v52, %v424_v51  ;;  %v682_v6 = vld [vmem:[%s12285_s26 + $0xbe8] sm:$0x3] }
 0x123   : > { %11507 = vmatprep.subr.bf16.mxu0 %v11506_v19  ;;  %5715 = vmatprep.mubr.f32.mxu1 %v1301_v20  ;;  %v11536_v32 = vpack.c.bf16 %v671_v17, %v415_v16 }
 0x124   : > { %11511 = vmatprep.subr.bf16.mxu1 %v11510_v21  ;;  %v418_v21 = vld [vmem:[%s12285_s26 + $0x3a8] sm:$0xff]  ;;  %v1368_v33 = vcombine.high %v1360_v18, %v1360_v18 }
 0x125   : > { %v11538_v34 = vpack.c.bf16 %v674_v22, %v418_v21  ;;  %v1404_v21 = vcombine.high %v268_v13, %v268_v13  ;;  %v425_v22 = vld [vmem:[%s12285_s26 + $0x3e0] sm:$0xff] }
 0x128   : > { %5646 = vmatmul.mubr.f32.vlgmr.msra.gmra.mrb[48].mxu0 %v1292_v9  ;;  %v1351_v9 = vcombine.high %v1343_v0, %v1343_v0 }
 0x129   : > { %5716 = vmatmul.mubr.f32.vlgmr.msra.gmra.mrb[48].mxu1 %v1299_v12  ;;  %11509 = vmatpush1.bf16.xpose.msra.mxu0 %v11508_v35  ;;  %v11534_v12 = vpack.c.bf16 %v672_v5, %v416_v4  ;;  %v1369_v35 = vcombine.high %v1367_v23, %v1367_v23  ;;  %v426_v5 = vld [vmem:[%s12285_s26 + $0x3e8] sm:$0xff] }
 0x12a   : > { %11513 = vmatpush1.bf16.xpose.msra.mxu1 %v11512_v36  ;;  %5785 = vmatprep.mubr.f32.mxu0 %v1317_v37  ;;  %v1370_v37 = vcombine.high %v266_v30, %v266_v30  ;;  %v430_v30 = vld [vmem:[%s12285_s26 + $0x408] sm:$0xff] }
 0x12b   : > { %11515 = vmatprep.subr.bf16.mxu0 %v11514_v38  ;;  %5855 = vmatprep.mubr.f32.mxu1 %v1318_v39  ;;  %v417_v38 = vld [vmem:[%s12285_s26 + $0x3a0] sm:$0xff] }
 0x12c   : > { %11519 = vmatprep.subr.bf16.mxu1 %v11518_v40  ;;  %v673_v39 = vld [vmem:[%s12285_s26 + $0xba0] sm:$0x3]  ;;  %v419_v40 = vld [vmem:[%s12285_s26 + $0x3b0] sm:$0xff]  ;;  %v1384_v47 = vrot.slane %v1370_v37, %v12313_v25  ;;  %v688_v37 = vld [vmem:[%s12285_s26 + $0xc18] sm:$0x3] }
 0x12e   : > { %v1386_v59 = vcombine.high %v1384_v47, %v1384_v47 }
 0x130   : > { %5786 = vmatmul.mubr.f32.vlgmr.msra.gmra.mrb[50].mxu0 %v1309_v28  ;;  %v420_v28 = vld [vmem:[%s12285_s26 + $0x3b8] sm:$0xff] }
 0x131   : > { %5856 = vmatmul.mubr.f32.vlgmr.msra.gmra.mrb[50].mxu1 %v1316_v31  ;;  %11517 = vmatpush1.bf16.xpose.msra.mxu0 %v11516_v53  ;;  %v11532_v31 = vpack.c.bf16 %v669_v15, %v413_v14  ;;  %v11542_v36 = vpack.c.bf16 %v676_v29, %v420_v28  ;;  %v267_v53 = vld [vmem:[%s12279_s17 + $0xf0] sm:$0xff]  ;;  %v11548_v14 = vpack.c.bf16 %v677_v63, %v421_v62  ;;  %v270_v62 = vld [vmem:[%s12279_s17 + $0x108] sm:$0xff] }
 0x132   : > { %11521 = vmatpush1.bf16.xpose.msra.mxu1 %v11520_v54  ;;  %5925 = vmatprep.mubr.f32.mxu0 %v1334_v55  ;;  %v11540_v54 = vpack.c.bf16 %v673_v39, %v417_v38  ;;  %v11544_v55 = vpack.c.bf16 %v675_v41, %v419_v40  ;;  %v1387_v61 = vcombine.high %v267_v53, %v267_v53  ;;  %v269_v38 = vld [vmem:[%s12279_s17 + $0x100] sm:$0xff] }
 0x133   : > { %11523 = vmatprep.subr.bf16.mxu0 %v11522_v56  ;;  %5995 = vmatprep.mubr.f32.mxu1 %v1335_v57  ;;  %v1385_v57 = vcombine.high %v1377_v42, %v1377_v42  ;;  %v1394_v2 = vrot.slane %v267_v53, %v12313_v25  ;;  %v1428_v51 = vrot.slane %v269_v38, %v12313_v25 }
 0x134   : > { %11527 = vmatprep.subr.bf16.mxu1 %v11526_v58 }
 0x135   : > { %v1402_v17 = vcombine.high %v1394_v2, %v1394_v2 }
 0x138   : > { %5926 = vmatmul.mubr.f32.vlgmr.msra.gmra.mrb[52].mxu0 %v1326_v46  ;;  %v678_v46 = vld [vmem:[%s12285_s26 + $0xbc8] sm:$0x3] }
 0x139   : > { %5996 = vmatmul.mubr.f32.vlgmr.msra.gmra.mrb[52].mxu1 %v1333_v49  ;;  %11525 = vmatpush1.bf16.xpose.msra.mxu0 %v11524_v7  ;;  %v11546_v58 = vpack.c.bf16 %v678_v46, %v422_v45  ;;  %v1401_v7 = vrot.slane %v1387_v61, %v12313_v25  ;;  %v1421_v46 = vcombine.high %v269_v38, %v269_v38  ;;  %v692_v61 = vld [vmem:[%s12285_s26 + $0xc38] sm:$0x3] }
 0x13a   : > { %11529 = vmatpush1.bf16.xpose.msra.mxu1 %v11528_v8  ;;  %6065 = vmatprep.mubr.f32.mxu0 %v1351_v9 }
 0x13b   : > { %11531 = vmatprep.subr.bf16.mxu0 %v11530_v10  ;;  %v2287_v19 = vpop.f32.mrb[0].mxu0  ;;  %6135 = vmatprep.mubr.f32.mxu1 %v1352_v11  ;;  %v428_v11 = vld [vmem:[%s12285_s26 + $0x3f8] sm:$0xff] }
 0x13c   : > { %v2357_v20 = vpop.f32.mrb[0].mxu1  ;;  %11535 = vmatprep.subr.bf16.mxu1 %v11534_v12  ;;  %v2289_v26 = vpop.f32.mrb[1].mxu0  ;;  %v684_v12 = vld [vmem:[%s12285_s26 + $0xbf8] sm:$0x3] }
 0x13d   : > { %v2358_v24 = vadd.f32 %v2357_v20, %v2287_v19  ;;  %v2359_v27 = vpop.f32.mrb[1].mxu1  ;;  %v1403_v19 = vcombine.high %v1401_v7, %v1401_v7  ;;  %v11558_v20 = vpack.c.bf16 %v684_v12, %v428_v11  ;;  %v683_v26 = vld [vmem:[%s12285_s26 + $0xbf0] sm:$0x3]  ;;  %v1445_v11 = vrot.slane %v270_v62, %v12313_v25 }
 0x13e   : > { %v1411_v27 = vrot.slane %v268_v13, %v12313_v25 }
 0x140   : > { %6066 = vmatmul.mubr.f32.vlgmr.msra.gmra.mrb[54].mxu0 %v1343_v0  ;;  %v423_v0 = vld [vmem:[%s12285_s26 + $0x3d0] sm:$0xff] }
 0x141   : > { %6136 = vmatmul.mubr.f32.vlgmr.msra.gmra.mrb[54].mxu1 %v1350_v3  ;;  %11533 = vmatpush1.bf16.xpose.msra.mxu0 %v11532_v31  ;;  %v11552_v15 = vpack.c.bf16 %v679_v1, %v423_v0  ;;  %v686_v31 = vld [vmem:[%s12285_s26 + $0xc08] sm:$0x3] }
 0x142   : > { %11537 = vmatpush1.bf16.xpose.msra.mxu1 %v11536_v32  ;;  %6205 = vmatprep.mubr.f32.mxu0 %v1368_v33  ;;  %v1418_v32 = vrot.slane %v1404_v21, %v12313_v25  ;;  %v696_v21 = vld [vmem:[%s12285_s26 + $0xc58] sm:$0x3] }
 0x143   : > { %11539 = vmatprep.subr.bf16.mxu0 %v11538_v34  ;;  %v2427_v43 = vpop.f32.mrb[2].mxu0  ;;  %6275 = vmatprep.mubr.f32.mxu1 %v1369_v35 }
 0x144   : > { %v2497_v44 = vpop.f32.mrb[2].mxu1  ;;  %11543 = vmatprep.subr.bf16.mxu1 %v11542_v36  ;;  %v2428_v48 = vadd.f32 %v2427_v43, %v2358_v24  ;;  %v2429_v49 = vpop.f32.mrb[3].mxu0  ;;  %v427_v24 = vld [vmem:[%s12285_s26 + $0x3f0] sm:$0xff]  ;;  %v432_v36 = vld [vmem:[%s12285_s26 + $0x418] sm:$0xff]  ;;  %v11562_v43 = vpack.c.bf16 %v686_v31, %v430_v30 }
 0x145   : > { %v2499_v50 = vpop.f32.mrb[3].mxu1  ;;  %v11560_v40 = vpack.c.bf16 %v683_v26, %v427_v24  ;;  %v11566_v45 = vpack.c.bf16 %v688_v37, %v432_v36  ;;  %v431_v49 = vld [vmem:[%s12285_s26 + $0x410] sm:$0xff] }
 0x146   : > { %v2498_v56 = vadd.f32 %v2497_v44, %v2428_v48  ;;  %v1420_v44 = vcombine.high %v1418_v32, %v1418_v32  ;;  %v685_v48 = vld [vmem:[%s12285_s26 + $0xc00] sm:$0x3]  ;;  %v687_v50 = vld [vmem:[%s12285_s26 + $0xc10] sm:$0x3] }
 0x147   : > { %v11568_v0 = vpack.c.bf16 %v687_v50, %v431_v49 }
 0x148   : > { %6206 = vmatmul.mubr.f32.vlgmr.msra.gmra.mrb[56].mxu0 %v1360_v18  ;;  %v11554_v18 = vpack.c.bf16 %v682_v6, %v426_v5  ;;  %v1438_v6 = vcombine.high %v270_v62, %v270_v62 }
 0x149   : > { %6276 = vmatmul.mubr.f32.vlgmr.msra.gmra.mrb[56].mxu1 %v1367_v23  ;;  %11541 = vmatpush1.bf16.xpose.msra.mxu0 %v11540_v54  ;;  %v681_v23 = vld [vmem:[%s12285_s26 + $0xbe0] sm:$0x3]  ;;  %v434_v54 = vld [vmem:[%s12285_s26 + $0x428] sm:$0xff] }
 0x14a   : > { %11545 = vmatpush1.bf16.xpose.msra.mxu1 %v11544_v55  ;;  %6345 = vmatprep.mubr.f32.mxu0 %v1385_v57  ;;  %v11556_v39 = vpack.c.bf16 %v681_v23, %v425_v22  ;;  %v690_v55 = vld [vmem:[%s12285_s26 + $0xc28] sm:$0x3]  ;;  %v271_v22 = vld [vmem:[%s12279_s17 + $0x110] sm:$0xff] }
 0x14b   : > { %11547 = vmatprep.subr.bf16.mxu0 %v11546_v58  ;;  %v2567_v3 = vpop.f32.mrb[4].mxu0  ;;  %6415 = vmatprep.mubr.f32.mxu1 %v1386_v59  ;;  %v1455_v31 = vcombine.high %v271_v22, %v271_v22  ;;  %v1462_v36 = vrot.slane %v271_v22, %v12313_v25 }
 0x14c   : > { %v2637_v4 = vpop.f32.mrb[4].mxu1  ;;  %11551 = vmatprep.subr.bf16.mxu1 %v11550_v60  ;;  %v2568_v8 = vadd.f32 %v2567_v3, %v2498_v56  ;;  %v2569_v9 = vpop.f32.mrb[5].mxu0  ;;  %v1435_v56 = vrot.slane %v1421_v46, %v12313_v25  ;;  %v436_v60 = vld [vmem:[%s12285_s26 + $0x438] sm:$0xff]  ;;  %v11570_v3 = vpack.c.bf16 %v690_v55, %v434_v54 }
 0x14d   : > { %v2639_v10 = vpop.f32.mrb[5].mxu1  ;;  %v11574_v5 = vpack.c.bf16 %v692_v61, %v436_v60  ;;  %v435_v9 = vld [vmem:[%s12285_s26 + $0x430] sm:$0xff]  ;;  %v700_v46 = vld [vmem:[%s12285_s26 + $0xc78] sm:$0x3] }
 0x14e   : > { %v2638_v16 = vadd.f32 %v2637_v4, %v2568_v8  ;;  %v1437_v4 = vcombine.high %v1435_v56, %v1435_v56  ;;  %v689_v8 = vld [vmem:[%s12285_s26 + $0xc20] sm:$0x3]  ;;  %v691_v10 = vld [vmem:[%s12285_s26 + $0xc30] sm:$0x3] }
 0x14f   : > { %v11576_v24 = vpack.c.bf16 %v691_v10, %v435_v9 }
 0x150   : > { %6346 = vmatmul.mubr.f32.vlgmr.msra.gmra.mrb[58].mxu0 %v1377_v42  ;;  %v1419_v42 = vcombine.high %v1411_v27, %v1411_v27 }
 0x151   : > { %6416 = vmatmul.mubr.f32.vlgmr.msra.gmra.mrb[58].mxu1 %v1384_v47  ;;  %11549 = vmatpush1.bf16.xpose.msra.mxu0 %v11548_v14  ;;  %v429_v47 = vld [vmem:[%s12285_s26 + $0x400] sm:$0xff]  ;;  %v438_v14 = vld [vmem:[%s12285_s26 + $0x448] sm:$0xff] }
 0x152   : > { %11553 = vmatpush1.bf16.xpose.msra.mxu1 %v11552_v15  ;;  %6485 = vmatprep.mubr.f32.mxu0 %v1402_v17  ;;  %v11564_v63 = vpack.c.bf16 %v685_v48, %v429_v47  ;;  %v694_v15 = vld [vmem:[%s12285_s26 + $0xc48] sm:$0x3]  ;;  %v272_v47 = vld [vmem:[%s12279_s17 + $0x118] sm:$0xff] }
 0x153   : > { %11555 = vmatprep.subr.bf16.mxu0 %v11554_v18  ;;  %v2707_v28 = vpop.f32.mrb[6].mxu0  ;;  %6555 = vmatprep.mubr.f32.mxu1 %v1403_v19  ;;  %v1472_v55 = vcombine.high %v272_v47, %v272_v47  ;;  %v1479_v60 = vrot.slane %v272_v47, %v12313_v25 }
 0x154   : > { %v2777_v29 = vpop.f32.mrb[6].mxu1  ;;  %11559 = vmatprep.subr.bf16.mxu1 %v11558_v20  ;;  %v2708_v33 = vadd.f32 %v2707_v28, %v2638_v16  ;;  %v2709_v34 = vpop.f32.mrb[7].mxu0  ;;  %v1452_v16 = vrot.slane %v1438_v6, %v12313_v25  ;;  %v440_v20 = vld [vmem:[%s12285_s26 + $0x458] sm:$0xff]  ;;  %v11578_v28 = vpack.c.bf16 %v694_v15, %v438_v14 }
 0x155   : > { %v2779_v35 = vpop.f32.mrb[7].mxu1  ;;  %v11582_v30 = vpack.c.bf16 %v696_v21, %v440_v20  ;;  %v439_v34 = vld [vmem:[%s12285_s26 + $0x450] sm:$0xff]  ;;  %v704_v6 = vld [vmem:[%s12285_s26 + $0xc98] sm:$0x3] }
 0x156   : > { %v2778_v41 = vadd.f32 %v2777_v29, %v2708_v33  ;;  %v1454_v29 = vcombine.high %v1452_v16, %v1452_v16  ;;  %v693_v33 = vld [vmem:[%s12285_s26 + $0xc40] sm:$0x3]  ;;  %v695_v35 = vld [vmem:[%s12285_s26 + $0xc50] sm:$0x3] }
 0x157   : > { %v11584_v49 = vpack.c.bf16 %v695_v35, %v439_v34 }
 0x158   : > { %6486 = vmatmul.mubr.f32.vlgmr.msra.gmra.mrb[60].mxu0 %v1394_v2  ;;  %v1436_v2 = vcombine.high %v1428_v51, %v1428_v51 }
 0x159   : > { %6556 = vmatmul.mubr.f32.vlgmr.msra.gmra.mrb[60].mxu1 %v1401_v7  ;;  %11557 = vmatpush1.bf16.xpose.msra.mxu0 %v11556_v39  ;;  %v433_v7 = vld [vmem:[%s12285_s26 + $0x420] sm:$0xff]  ;;  %v442_v39 = vld [vmem:[%s12285_s26 + $0x468] sm:$0xff] }
 0x15a   : > { %11561 = vmatpush1.bf16.xpose.msra.mxu1 %v11560_v40  ;;  %6625 = vmatprep.mubr.f32.mxu0 %v1419_v42  ;;  %v11572_v23 = vpack.c.bf16 %v689_v8, %v433_v7  ;;  %v698_v40 = vld [vmem:[%s12285_s26 + $0xc68] sm:$0x3]  ;;  %v273_v7 = vld [vmem:[%s12279_s17 + $0x120] sm:$0xff] }
 0x15b   : > { %11563 = vmatprep.subr.bf16.mxu0 %v11562_v43  ;;  %v2847_v52 = vpop.f32.mrb[8].mxu0  ;;  %6695 = vmatprep.mubr.f32.mxu1 %v1420_v44  ;;  %v1489_v15 = vcombine.high %v273_v7, %v273_v7  ;;  %v1496_v20 = vrot.slane %v273_v7, %v12313_v25 }
 0x15c   : > { %v2917_v53 = vpop.f32.mrb[8].mxu1  ;;  %11567 = vmatprep.subr.bf16.mxu1 %v11566_v45  ;;  %v2848_v57 = vadd.f32 %v2847_v52, %v2778_v41  ;;  %v2849_v58 = vpop.f32.mrb[9].mxu0  ;;  %v1469_v41 = vrot.slane %v1455_v31, %v12313_v25  ;;  %v444_v45 = vld [vmem:[%s12285_s26 + $0x478] sm:$0xff]  ;;  %v11586_v52 = vpack.c.bf16 %v698_v40, %v442_v39 }
 0x15d   : > { %v2919_v59 = vpop.f32.mrb[9].mxu1  ;;  %v11590_v54 = vpack.c.bf16 %v700_v46, %v444_v45  ;;  %v443_v58 = vld [vmem:[%s12285_s26 + $0x470] sm:$0xff]  ;;  %v708_v31 = vld [vmem:[%s12285_s26 + $0xcb8] sm:$0x3] }
 0x15e   : > { %v2918_v1 = vadd.f32 %v2917_v53, %v2848_v57  ;;  %v1471_v53 = vcombine.high %v1469_v41, %v1469_v41  ;;  %v697_v57 = vld [vmem:[%s12285_s26 + $0xc60] sm:$0x3]  ;;  %v699_v59 = vld [vmem:[%s12285_s26 + $0xc70] sm:$0x3] }
 0x15f   : > { %v11592_v9 = vpack.c.bf16 %v699_v59, %v443_v58 }
 0x160   : > { %6626 = vmatmul.mubr.f32.vlgmr.msra.gmra.mrb[62].mxu0 %v1411_v27  ;;  %v1453_v27 = vcombine.high %v1445_v11, %v1445_v11 }
 0x161   : > { %6696 = vmatmul.mubr.f32.vlgmr.msra.gmra.mrb[62].mxu1 %v1418_v32  ;;  %11565 = vmatpush1.bf16.xpose.msra.mxu0 %v11564_v63  ;;  %v437_v32 = vld [vmem:[%s12285_s26 + $0x440] sm:$0xff]  ;;  %v446_v63 = vld [vmem:[%s12285_s26 + $0x488] sm:$0xff] }
 0x162   : > { %11569 = vmatpush1.bf16.xpose.msra.mxu1 %v11568_v0  ;;  %6765 = vmatprep.mubr.f32.mxu0 %v1436_v2  ;;  %v11580_v48 = vpack.c.bf16 %v693_v33, %v437_v32  ;;  %v702_v0 = vld [vmem:[%s12285_s26 + $0xc88] sm:$0x3] }
 0x163   : > { %11571 = vmatprep.subr.bf16.mxu0 %v11570_v3  ;;  %v2987_v12 = vpop.f32.mrb[10].mxu0  ;;  %6835 = vmatprep.mubr.f32.mxu1 %v1437_v4  ;;  %v274_v32 = vld [vmem:[%s12279_s17 + $0x128] sm:$0xff] }
 0x164   : > { %v3057_v13 = vpop.f32.mrb[10].mxu1  ;;  %11575 = vmatprep.subr.bf16.mxu1 %v11574_v5  ;;  %v2988_v17 = vadd.f32 %v2987_v12, %v2918_v1  ;;  %v2989_v18 = vpop.f32.mrb[11].mxu0  ;;  %v1486_v1 = vrot.slane %v1472_v55, %v12313_v25  ;;  %v448_v5 = vld [vmem:[%s12285_s26 + $0x498] sm:$0xff]  ;;  %v11594_v12 = vpack.c.bf16 %v702_v0, %v446_v63  ;;  %v1506_v40 = vcombine.high %v274_v32, %v274_v32 }
 0x165   : > { %v3059_v19 = vpop.f32.mrb[11].mxu1  ;;  %v11598_v14 = vpack.c.bf16 %v704_v6, %v448_v5  ;;  %v447_v18 = vld [vmem:[%s12285_s26 + $0x490] sm:$0xff]  ;;  %v1513_v45 = vrot.slane %v274_v32, %v12313_v25  ;;  %v712_v55 = vld [vmem:[%s12285_s26 + $0xcd8] sm:$0x3] }
 0x166   : > { %v3058_v26 = vadd.f32 %v3057_v13, %v2988_v17  ;;  %v1488_v13 = vcombine.high %v1486_v1, %v1486_v1  ;;  %v701_v17 = vld [vmem:[%s12285_s26 + $0xc80] sm:$0x3]  ;;  %v703_v19 = vld [vmem:[%s12285_s26 + $0xc90] sm:$0x3] }
 0x167   : > { %v11600_v34 = vpack.c.bf16 %v703_v19, %v447_v18 }
 0x168   : > { %6766 = vmatmul.mubr.f32.vlgmr.msra.gmra.mrb[64].mxu0 %v1428_v51  ;;  %v1470_v51 = vcombine.high %v1462_v36, %v1462_v36 }
 0x169   : > { %6836 = vmatmul.mubr.f32.vlgmr.msra.gmra.mrb[64].mxu1 %v1435_v56  ;;  %11573 = vmatpush1.bf16.xpose.msra.mxu0 %v11572_v23  ;;  %v441_v56 = vld [vmem:[%s12285_s26 + $0x460] sm:$0xff]  ;;  %v450_v23 = vld [vmem:[%s12285_s26 + $0x4a8] sm:$0xff] }
 0x16a   : > { %11577 = vmatpush1.bf16.xpose.msra.mxu1 %v11576_v24  ;;  %6905 = vmatprep.mubr.f32.mxu0 %v1453_v27  ;;  %v11588_v8 = vpack.c.bf16 %v697_v57, %v441_v56  ;;  %v706_v24 = vld [vmem:[%s12285_s26 + $0xca8] sm:$0x3]  ;;  %v275_v56 = vld [vmem:[%s12279_s17 + $0x130] sm:$0xff] }
 0x16b   : > { %11579 = vmatprep.subr.bf16.mxu0 %v11578_v28  ;;  %v3127_v37 = vpop.f32.mrb[12].mxu0  ;;  %6975 = vmatprep.mubr.f32.mxu1 %v1454_v29  ;;  %v1523_v0 = vcombine.high %v275_v56, %v275_v56  ;;  %v1530_v5 = vrot.slane %v275_v56, %v12313_v25 }
 0x16c   : > { %v3197_v38 = vpop.f32.mrb[12].mxu1  ;;  %11583 = vmatprep.subr.bf16.mxu1 %v11582_v30  ;;  %v3128_v42 = vadd.f32 %v3127_v37, %v3058_v26  ;;  %v3129_v43 = vpop.f32.mrb[13].mxu0  ;;  %v1503_v26 = vrot.slane %v1489_v15, %v12313_v25  ;;  %v452_v30 = vld [vmem:[%s12285_s26 + $0x4b8] sm:$0xff]  ;;  %v11602_v37 = vpack.c.bf16 %v706_v24, %v450_v23 }
 0x16d   : > { %v3199_v44 = vpop.f32.mrb[13].mxu1  ;;  %v11606_v39 = vpack.c.bf16 %v708_v31, %v452_v30  ;;  %v451_v43 = vld [vmem:[%s12285_s26 + $0x4b0] sm:$0xff]  ;;  %v716_v15 = vld [vmem:[%s12285_s26 + $0xcf8] sm:$0x3] }
 0x16e   : > { %v3198_v50 = vadd.f32 %v3197_v38, %v3128_v42  ;;  %v1505_v38 = vcombine.high %v1503_v26, %v1503_v26  ;;  %v705_v42 = vld [vmem:[%s12285_s26 + $0xca0] sm:$0x3]  ;;  %v707_v44 = vld [vmem:[%s12285_s26 + $0xcb0] sm:$0x3] }
 0x16f   : > { %v11608_v58 = vpack.c.bf16 %v707_v44, %v451_v43 }
 0x170   : > { %6906 = vmatmul.mubr.f32.vlgmr.msra.gmra.mrb[66].mxu0 %v1445_v11  ;;  %v1487_v11 = vcombine.high %v1479_v60, %v1479_v60 }
 0x171   : > { %6976 = vmatmul.mubr.f32.vlgmr.msra.gmra.mrb[66].mxu1 %v1452_v16  ;;  %11581 = vmatpush1.bf16.xpose.msra.mxu0 %v11580_v48  ;;  %v445_v16 = vld [vmem:[%s12285_s26 + $0x480] sm:$0xff]  ;;  %v454_v48 = vld [vmem:[%s12285_s26 + $0x4c8] sm:$0xff] }
 0x172   : > { %11585 = vmatpush1.bf16.xpose.msra.mxu1 %v11584_v49  ;;  %7045 = vmatprep.mubr.f32.mxu0 %v1470_v51  ;;  %v11596_v33 = vpack.c.bf16 %v701_v17, %v445_v16  ;;  %v710_v49 = vld [vmem:[%s12285_s26 + $0xcc8] sm:$0x3]  ;;  %v276_v16 = vld [vmem:[%s12279_s17 + $0x138] sm:$0xff] }
 0x173   : > { %11587 = vmatprep.subr.bf16.mxu0 %v11586_v52  ;;  %v3267_v61 = vpop.f32.mrb[14].mxu0  ;;  %7115 = vmatprep.mubr.f32.mxu1 %v1471_v53  ;;  %v1540_v24 = vcombine.high %v276_v16, %v276_v16  ;;  %v1547_v30 = vrot.slane %v276_v16, %v12313_v25 }
 0x174   : > { %v3337_v62 = vpop.f32.mrb[14].mxu1  ;;  %11591 = vmatprep.subr.bf16.mxu1 %v11590_v54  ;;  %v3268_v2 = vadd.f32 %v3267_v61, %v3198_v50  ;;  %v3269_v3 = vpop.f32.mrb[15].mxu0  ;;  %v1520_v50 = vrot.slane %v1506_v40, %v12313_v25  ;;  %v456_v54 = vld [vmem:[%s12285_s26 + $0x4d8] sm:$0xff]  ;;  %v11610_v61 = vpack.c.bf16 %v710_v49, %v454_v48 }
 0x175   : > { %v3339_v4 = vpop.f32.mrb[15].mxu1  ;;  %v11614_v63 = vpack.c.bf16 %v712_v55, %v456_v54  ;;  %v455_v3 = vld [vmem:[%s12285_s26 + $0x4d0] sm:$0xff]  ;;  %v720_v40 = vld [vmem:[%s12285_s26 + $0xd18] sm:$0x3] }
 0x176   : > { %v3338_v10 = vadd.f32 %v3337_v62, %v3268_v2  ;;  %v1522_v62 = vcombine.high %v1520_v50, %v1520_v50  ;;  %v709_v2 = vld [vmem:[%s12285_s26 + $0xcc0] sm:$0x3]  ;;  %v711_v4 = vld [vmem:[%s12285_s26 + $0xcd0] sm:$0x3] }
 0x177   : > { %v11616_v18 = vpack.c.bf16 %v711_v4, %v455_v3 }
 0x178   : > { %7046 = vmatmul.mubr.f32.vlgmr.msra.gmra.mrb[68].mxu0 %v1462_v36  ;;  %v1504_v36 = vcombine.high %v1496_v20, %v1496_v20 }
 0x179   : > { %7116 = vmatmul.mubr.f32.vlgmr.msra.gmra.mrb[68].mxu1 %v1469_v41  ;;  %11589 = vmatpush1.bf16.xpose.msra.mxu0 %v11588_v8  ;;  %v449_v41 = vld [vmem:[%s12285_s26 + $0x4a0] sm:$0xff]  ;;  %v458_v8 = vld [vmem:[%s12285_s26 + $0x4e8] sm:$0xff] }
 0x17a   : > { %11593 = vmatpush1.bf16.xpose.msra.mxu1 %v11592_v9  ;;  %7185 = vmatprep.mubr.f32.mxu0 %v1487_v11  ;;  %v11604_v57 = vpack.c.bf16 %v705_v42, %v449_v41  ;;  %v714_v9 = vld [vmem:[%s12285_s26 + $0xce8] sm:$0x3]  ;;  %v277_v41 = vld [vmem:[%s12279_s17 + $0x140] sm:$0xff] }
 0x17b   : > { %11595 = vmatprep.subr.bf16.mxu0 %v11594_v12  ;;  %v3407_v21 = vpop.f32.mrb[16].mxu0  ;;  %7255 = vmatprep.mubr.f32.mxu1 %v1488_v13  ;;  %v1557_v49 = vcombine.high %v277_v41, %v277_v41  ;;  %v1564_v54 = vrot.slane %v277_v41, %v12313_v25 }
 0x17c   : > { %v3477_v22 = vpop.f32.mrb[16].mxu1  ;;  %11599 = vmatprep.subr.bf16.mxu1 %v11598_v14  ;;  %v3408_v27 = vadd.f32 %v3407_v21, %v3338_v10  ;;  %v3409_v28 = vpop.f32.mrb[17].mxu0  ;;  %v1537_v10 = vrot.slane %v1523_v0, %v12313_v25  ;;  %v460_v14 = vld [vmem:[%s12285_s26 + $0x4f8] sm:$0xff]  ;;  %v11618_v21 = vpack.c.bf16 %v714_v9, %v458_v8 }
 0x17d   : > { %v3479_v29 = vpop.f32.mrb[17].mxu1  ;;  %v11622_v23 = vpack.c.bf16 %v716_v15, %v460_v14  ;;  %v459_v28 = vld [vmem:[%s12285_s26 + $0x4f0] sm:$0xff]  ;;  %v724_v0 = vld [vmem:[%s12285_s26 + $0xd38] sm:$0x3] }
 0x17e   : > { %v3478_v35 = vadd.f32 %v3477_v22, %v3408_v27  ;;  %v1539_v22 = vcombine.high %v1537_v10, %v1537_v10  ;;  %v713_v27 = vld [vmem:[%s12285_s26 + $0xce0] sm:$0x3]  ;;  %v715_v29 = vld [vmem:[%s12285_s26 + $0xcf0] sm:$0x3] }
 0x17f   : > { %v11624_v43 = vpack.c.bf16 %v715_v29, %v459_v28 }
 0x180   : > { %7186 = vmatmul.mubr.f32.vlgmr.msra.gmra.mrb[70].mxu0 %v1479_v60  ;;  %v1521_v60 = vcombine.high %v1513_v45, %v1513_v45 }
 0x181   : > { %7256 = vmatmul.mubr.f32.vlgmr.msra.gmra.mrb[70].mxu1 %v1486_v1  ;;  %11597 = vmatpush1.bf16.xpose.msra.mxu0 %v11596_v33  ;;  %v453_v1 = vld [vmem:[%s12285_s26 + $0x4c0] sm:$0xff]  ;;  %v462_v33 = vld [vmem:[%s12285_s26 + $0x508] sm:$0xff] }
 0x182   : > { %11601 = vmatpush1.bf16.xpose.msra.mxu1 %v11600_v34  ;;  %7325 = vmatprep.mubr.f32.mxu0 %v1504_v36  ;;  %v11612_v17 = vpack.c.bf16 %v709_v2, %v453_v1  ;;  %v718_v34 = vld [vmem:[%s12285_s26 + $0xd08] sm:$0x3] }
 0x183   : > { %11603 = vmatprep.subr.bf16.mxu0 %v11602_v37  ;;  %v3547_v46 = vpop.f32.mrb[18].mxu0  ;;  %7395 = vmatprep.mubr.f32.mxu1 %v1505_v38  ;;  %v278_v1 = vld [vmem:[%s12279_s17 + $0x148] sm:$0xff] }
 0x184   : > { %v3617_v47 = vpop.f32.mrb[18].mxu1  ;;  %11607 = vmatprep.subr.bf16.mxu1 %v11606_v39  ;;  %v3548_v51 = vadd.f32 %v3547_v46, %v3478_v35  ;;  %v3549_v52 = vpop.f32.mrb[19].mxu0  ;;  %v1554_v35 = vrot.slane %v1540_v24, %v12313_v25  ;;  %v464_v39 = vld [vmem:[%s12285_s26 + $0x518] sm:$0xff]  ;;  %v11626_v46 = vpack.c.bf16 %v718_v34, %v462_v33  ;;  %v1574_v9 = vcombine.high %v278_v1, %v278_v1 }
 0x185   : > { %v3619_v53 = vpop.f32.mrb[19].mxu1  ;;  %v11630_v48 = vpack.c.bf16 %v720_v40, %v464_v39  ;;  %v463_v52 = vld [vmem:[%s12285_s26 + $0x510] sm:$0xff]  ;;  %v1581_v14 = vrot.slane %v278_v1, %v12313_v25  ;;  %v728_v24 = vld [vmem:[%s12285_s26 + $0xd58] sm:$0x3] }
 0x186   : > { %v3618_v59 = vadd.f32 %v3617_v47, %v3548_v51  ;;  %v1556_v47 = vcombine.high %v1554_v35, %v1554_v35  ;;  %v717_v51 = vld [vmem:[%s12285_s26 + $0xd00] sm:$0x3]  ;;  %v719_v53 = vld [vmem:[%s12285_s26 + $0xd10] sm:$0x3] }
 0x187   : > { %v11632_v3 = vpack.c.bf16 %v719_v53, %v463_v52 }
 0x188   : > { %7326 = vmatmul.mubr.f32.vlgmr.msra.gmra.mrb[72].mxu0 %v1496_v20  ;;  %v1538_v20 = vcombine.high %v1530_v5, %v1530_v5 }
 0x189   : > { %7396 = vmatmul.mubr.f32.vlgmr.msra.gmra.mrb[72].mxu1 %v1503_v26  ;;  %11605 = vmatpush1.bf16.xpose.msra.mxu0 %v11604_v57  ;;  %v457_v26 = vld [vmem:[%s12285_s26 + $0x4e0] sm:$0xff]  ;;  %v466_v57 = vld [vmem:[%s12285_s26 + $0x528] sm:$0xff] }
 0x18a   : > { %11609 = vmatpush1.bf16.xpose.msra.mxu1 %v11608_v58  ;;  %7465 = vmatprep.mubr.f32.mxu0 %v1521_v60  ;;  %v11620_v42 = vpack.c.bf16 %v713_v27, %v457_v26  ;;  %v722_v58 = vld [vmem:[%s12285_s26 + $0xd28] sm:$0x3]  ;;  %v279_v26 = vld [vmem:[%s12279_s17 + $0x150] sm:$0xff] }
 0x18b   : > { %11611 = vmatprep.subr.bf16.mxu0 %v11610_v61  ;;  %v3687_v6 = vpop.f32.mrb[20].mxu0  ;;  %7535 = vmatprep.mubr.f32.mxu1 %v1522_v62  ;;  %v1591_v34 = vcombine.high %v279_v26, %v279_v26  ;;  %v1598_v39 = vrot.slane %v279_v26, %v12313_v25 }
 0x18c   : > { %v3757_v7 = vpop.f32.mrb[20].mxu1  ;;  %11615 = vmatprep.subr.bf16.mxu1 %v11614_v63  ;;  %v3688_v11 = vadd.f32 %v3687_v6, %v3618_v59  ;;  %v3689_v12 = vpop.f32.mrb[21].mxu0  ;;  %v1571_v59 = vrot.slane %v1557_v49, %v12313_v25  ;;  %v468_v63 = vld [vmem:[%s12285_s26 + $0x538] sm:$0xff]  ;;  %v11634_v6 = vpack.c.bf16 %v722_v58, %v466_v57 }
 0x18d   : > { %v3759_v13 = vpop.f32.mrb[21].mxu1  ;;  %v11638_v8 = vpack.c.bf16 %v724_v0, %v468_v63  ;;  %v467_v12 = vld [vmem:[%s12285_s26 + $0x530] sm:$0xff]  ;;  %v732_v49 = vld [vmem:[%s12285_s26 + $0xd78] sm:$0x3] }
 0x18e   : > { %v3758_v19 = vadd.f32 %v3757_v7, %v3688_v11  ;;  %v1573_v7 = vcombine.high %v1571_v59, %v1571_v59  ;;  %v721_v11 = vld [vmem:[%s12285_s26 + $0xd20] sm:$0x3]  ;;  %v723_v13 = vld [vmem:[%s12285_s26 + $0xd30] sm:$0x3] }
 0x18f   : > { %v11640_v28 = vpack.c.bf16 %v723_v13, %v467_v12 }
 0x190   : > { %7466 = vmatmul.mubr.f32.vlgmr.msra.gmra.mrb[74].mxu0 %v1513_v45  ;;  %v1555_v45 = vcombine.high %v1547_v30, %v1547_v30 }
 0x191   : > { %7536 = vmatmul.mubr.f32.vlgmr.msra.gmra.mrb[74].mxu1 %v1520_v50  ;;  %11613 = vmatpush1.bf16.xpose.msra.mxu0 %v11612_v17  ;;  %v461_v50 = vld [vmem:[%s12285_s26 + $0x500] sm:$0xff]  ;;  %v470_v17 = vld [vmem:[%s12285_s26 + $0x548] sm:$0xff] }
 0x192   : > { %11617 = vmatpush1.bf16.xpose.msra.mxu1 %v11616_v18  ;;  %7605 = vmatprep.mubr.f32.mxu0 %v1538_v20  ;;  %v11628_v2 = vpack.c.bf16 %v717_v51, %v461_v50  ;;  %v726_v18 = vld [vmem:[%s12285_s26 + $0xd48] sm:$0x3]  ;;  %v280_v50 = vld [vmem:[%s12279_s17 + $0x158] sm:$0xff] }
 0x193   : > { %11619 = vmatprep.subr.bf16.mxu0 %v11618_v21  ;;  %v3827_v31 = vpop.f32.mrb[22].mxu0  ;;  %7675 = vmatprep.mubr.f32.mxu1 %v1539_v22  ;;  %v1608_v58 = vcombine.high %v280_v50, %v280_v50  ;;  %v1615_v63 = vrot.slane %v280_v50, %v12313_v25 }
 0x194   : > { %v3897_v32 = vpop.f32.mrb[22].mxu1  ;;  %11623 = vmatprep.subr.bf16.mxu1 %v11622_v23  ;;  %v3828_v36 = vadd.f32 %v3827_v31, %v3758_v19  ;;  %v3829_v37 = vpop.f32.mrb[23].mxu0  ;;  %v1588_v19 = vrot.slane %v1574_v9, %v12313_v25  ;;  %v472_v23 = vld [vmem:[%s12285_s26 + $0x558] sm:$0xff]  ;;  %v11642_v31 = vpack.c.bf16 %v726_v18, %v470_v17 }
 0x195   : > { %v3899_v38 = vpop.f32.mrb[23].mxu1  ;;  %v11646_v33 = vpack.c.bf16 %v728_v24, %v472_v23  ;;  %v471_v37 = vld [vmem:[%s12285_s26 + $0x550] sm:$0xff]  ;;  %v736_v9 = vld [vmem:[%s12285_s26 + $0xd98] sm:$0x3] }
 0x196   : > { %v3898_v44 = vadd.f32 %v3897_v32, %v3828_v36  ;;  %v1590_v32 = vcombine.high %v1588_v19, %v1588_v19  ;;  %v725_v36 = vld [vmem:[%s12285_s26 + $0xd40] sm:$0x3]  ;;  %v727_v38 = vld [vmem:[%s12285_s26 + $0xd50] sm:$0x3] }
 0x197   : > { %v11648_v52 = vpack.c.bf16 %v727_v38, %v471_v37 }
 0x198   : > { %7606 = vmatmul.mubr.f32.vlgmr.msra.gmra.mrb[76].mxu0 %v1530_v5  ;;  %v1572_v5 = vcombine.high %v1564_v54, %v1564_v54 }
 0x199   : > { %7676 = vmatmul.mubr.f32.vlgmr.msra.gmra.mrb[76].mxu1 %v1537_v10  ;;  %11621 = vmatpush1.bf16.xpose.msra.mxu0 %v11620_v42  ;;  %v465_v10 = vld [vmem:[%s12285_s26 + $0x520] sm:$0xff]  ;;  %v474_v42 = vld [vmem:[%s12285_s26 + $0x568] sm:$0xff] }
 0x19a   : > { %11625 = vmatpush1.bf16.xpose.msra.mxu1 %v11624_v43  ;;  %7745 = vmatprep.mubr.f32.mxu0 %v1555_v45  ;;  %v11636_v27 = vpack.c.bf16 %v721_v11, %v465_v10  ;;  %v730_v43 = vld [vmem:[%s12285_s26 + $0xd68] sm:$0x3]  ;;  %v281_v10 = vld [vmem:[%s12279_s17 + $0x160] sm:$0xff] }
 0x19b   : > { %11627 = vmatprep.subr.bf16.mxu0 %v11626_v46  ;;  %v3967_v55 = vpop.f32.mrb[24].mxu0  ;;  %7815 = vmatprep.mubr.f32.mxu1 %v1556_v47  ;;  %v1625_v18 = vcombine.high %v281_v10, %v281_v10  ;;  %v1632_v23 = vrot.slane %v281_v10, %v12313_v25 }
 0x19c   : > { %v4037_v56 = vpop.f32.mrb[24].mxu1  ;;  %11631 = vmatprep.subr.bf16.mxu1 %v11630_v48  ;;  %v3968_v60 = vadd.f32 %v3967_v55, %v3898_v44  ;;  %v3969_v61 = vpop.f32.mrb[25].mxu0  ;;  %v1605_v44 = vrot.slane %v1591_v34, %v12313_v25  ;;  %v476_v48 = vld [vmem:[%s12285_s26 + $0x578] sm:$0xff]  ;;  %v11650_v55 = vpack.c.bf16 %v730_v43, %v474_v42 }
 0x19d   : > { %v4039_v62 = vpop.f32.mrb[25].mxu1  ;;  %v11654_v57 = vpack.c.bf16 %v732_v49, %v476_v48  ;;  %v475_v61 = vld [vmem:[%s12285_s26 + $0x570] sm:$0xff]  ;;  %v740_v34 = vld [vmem:[%s12285_s26 + $0xdb8] sm:$0x3] }
 0x19e   : > { %v4038_v4 = vadd.f32 %v4037_v56, %v3968_v60  ;;  %v1607_v56 = vcombine.high %v1605_v44, %v1605_v44  ;;  %v729_v60 = vld [vmem:[%s12285_s26 + $0xd60] sm:$0x3]  ;;  %v731_v62 = vld [vmem:[%s12285_s26 + $0xd70] sm:$0x3] }
 0x19f   : > { %v11656_v12 = vpack.c.bf16 %v731_v62, %v475_v61 }
 0x1a0   : > { %7746 = vmatmul.mubr.f32.vlgmr.msra.gmra.mrb[78].mxu0 %v1547_v30  ;;  %v1589_v30 = vcombine.high %v1581_v14, %v1581_v14 }
 0x1a1   : > { %7816 = vmatmul.mubr.f32.vlgmr.msra.gmra.mrb[78].mxu1 %v1554_v35  ;;  %11629 = vmatpush1.bf16.xpose.msra.mxu0 %v11628_v2  ;;  %v469_v35 = vld [vmem:[%s12285_s26 + $0x540] sm:$0xff]  ;;  %v478_v2 = vld [vmem:[%s12285_s26 + $0x588] sm:$0xff] }
 0x1a2   : > { %11633 = vmatpush1.bf16.xpose.msra.mxu1 %v11632_v3  ;;  %7885 = vmatprep.mubr.f32.mxu0 %v1572_v5  ;;  %v11644_v51 = vpack.c.bf16 %v725_v36, %v469_v35  ;;  %v734_v3 = vld [vmem:[%s12285_s26 + $0xd88] sm:$0x3] }
 0x1a3   : > { %11635 = vmatprep.subr.bf16.mxu0 %v11634_v6  ;;  %v4107_v15 = vpop.f32.mrb[26].mxu0  ;;  %7955 = vmatprep.mubr.f32.mxu1 %v1573_v7  ;;  %v282_v35 = vld [vmem:[%s12279_s17 + $0x168] sm:$0xff] }
 0x1a4   : > { %v4177_v16 = vpop.f32.mrb[26].mxu1  ;;  %11639 = vmatprep.subr.bf16.mxu1 %v11638_v8  ;;  %v4108_v20 = vadd.f32 %v4107_v15, %v4038_v4  ;;  %v4109_v21 = vpop.f32.mrb[27].mxu0  ;;  %v1622_v4 = vrot.slane %v1608_v58, %v12313_v25  ;;  %v480_v8 = vld [vmem:[%s12285_s26 + $0x598] sm:$0xff]  ;;  %v11658_v15 = vpack.c.bf16 %v734_v3, %v478_v2  ;;  %v1642_v43 = vcombine.high %v282_v35, %v282_v35 }
 0x1a5   : > { %v4179_v22 = vpop.f32.mrb[27].mxu1  ;;  %v11662_v17 = vpack.c.bf16 %v736_v9, %v480_v8  ;;  %v479_v21 = vld [vmem:[%s12285_s26 + $0x590] sm:$0xff]  ;;  %v1649_v48 = vrot.slane %v282_v35, %v12313_v25  ;;  %v744_v58 = vld [vmem:[%s12285_s26 + $0xdd8] sm:$0x3] }
 0x1a6   : > { %v4178_v29 = vadd.f32 %v4177_v16, %v4108_v20  ;;  %v1624_v16 = vcombine.high %v1622_v4, %v1622_v4  ;;  %v733_v20 = vld [vmem:[%s12285_s26 + $0xd80] sm:$0x3]  ;;  %v735_v22 = vld [vmem:[%s12285_s26 + $0xd90] sm:$0x3] }
 0x1a7   : > { %v11664_v37 = vpack.c.bf16 %v735_v22, %v479_v21 }
 0x1a8   : > { %7886 = vmatmul.mubr.f32.vlgmr.msra.gmra.mrb[80].mxu0 %v1564_v54  ;;  %v1606_v54 = vcombine.high %v1598_v39, %v1598_v39 }
 0x1a9   : > { %7956 = vmatmul.mubr.f32.vlgmr.msra.gmra.mrb[80].mxu1 %v1571_v59  ;;  %11637 = vmatpush1.bf16.xpose.msra.mxu0 %v11636_v27  ;;  %v473_v59 = vld [vmem:[%s12285_s26 + $0x560] sm:$0xff]  ;;  %v482_v27 = vld [vmem:[%s12285_s26 + $0x5a8] sm:$0xff] }
 0x1aa   : > { %11641 = vmatpush1.bf16.xpose.msra.mxu1 %v11640_v28  ;;  %8025 = vmatprep.mubr.f32.mxu0 %v1589_v30  ;;  %v11652_v11 = vpack.c.bf16 %v729_v60, %v473_v59  ;;  %v738_v28 = vld [vmem:[%s12285_s26 + $0xda8] sm:$0x3]  ;;  %v283_v59 = vld [vmem:[%s12279_s17 + $0x170] sm:$0xff] }
 0x1ab   : > { %11643 = vmatprep.subr.bf16.mxu0 %v11642_v31  ;;  %v4247_v40 = vpop.f32.mrb[28].mxu0  ;;  %8095 = vmatprep.mubr.f32.mxu1 %v1590_v32  ;;  %v1659_v3 = vcombine.high %v283_v59, %v283_v59  ;;  %v1666_v8 = vrot.slane %v283_v59, %v12313_v25 }
 0x1ac   : > { %v4317_v41 = vpop.f32.mrb[28].mxu1  ;;  %11647 = vmatprep.subr.bf16.mxu1 %v11646_v33  ;;  %v4248_v45 = vadd.f32 %v4247_v40, %v4178_v29  ;;  %v4249_v46 = vpop.f32.mrb[29].mxu0  ;;  %v1639_v29 = vrot.slane %v1625_v18, %v12313_v25  ;;  %v484_v33 = vld [vmem:[%s12285_s26 + $0x5b8] sm:$0xff]  ;;  %v11666_v40 = vpack.c.bf16 %v738_v28, %v482_v27 }
 0x1ad   : > { %v4319_v47 = vpop.f32.mrb[29].mxu1  ;;  %v11670_v42 = vpack.c.bf16 %v740_v34, %v484_v33  ;;  %v483_v46 = vld [vmem:[%s12285_s26 + $0x5b0] sm:$0xff]  ;;  %v748_v18 = vld [vmem:[%s12285_s26 + $0xdf8] sm:$0x3] }
 0x1ae   : > { %v4318_v53 = vadd.f32 %v4317_v41, %v4248_v45  ;;  %v1641_v41 = vcombine.high %v1639_v29, %v1639_v29  ;;  %v737_v45 = vld [vmem:[%s12285_s26 + $0xda0] sm:$0x3]  ;;  %v739_v47 = vld [vmem:[%s12285_s26 + $0xdb0] sm:$0x3] }
 0x1af   : > { %v11672_v61 = vpack.c.bf16 %v739_v47, %v483_v46 }
 0x1b0   : > { %8026 = vmatmul.mubr.f32.vlgmr.msra.gmra.mrb[82].mxu0 %v1581_v14  ;;  %v1623_v14 = vcombine.high %v1615_v63, %v1615_v63 }
 0x1b1   : > { %8096 = vmatmul.mubr.f32.vlgmr.msra.gmra.mrb[82].mxu1 %v1588_v19  ;;  %11645 = vmatpush1.bf16.xpose.msra.mxu0 %v11644_v51  ;;  %v477_v19 = vld [vmem:[%s12285_s26 + $0x580] sm:$0xff]  ;;  %v486_v51 = vld [vmem:[%s12285_s26 + $0x5c8] sm:$0xff] }
 0x1b2   : > { %11649 = vmatpush1.bf16.xpose.msra.mxu1 %v11648_v52  ;;  %8165 = vmatprep.mubr.f32.mxu0 %v1606_v54  ;;  %v11660_v36 = vpack.c.bf16 %v733_v20, %v477_v19  ;;  %v742_v52 = vld [vmem:[%s12285_s26 + $0xdc8] sm:$0x3]  ;;  %v284_v19 = vld [vmem:[%s12279_s17 + $0x178] sm:$0xff] }
 0x1b3   : > { %11651 = vmatprep.subr.bf16.mxu0 %v11650_v55  ;;  %v4387_v0 = vpop.f32.mrb[30].mxu0  ;;  %8235 = vmatprep.mubr.f32.mxu1 %v1607_v56  ;;  %v1676_v28 = vcombine.high %v284_v19, %v284_v19  ;;  %v1683_v33 = vrot.slane %v284_v19, %v12313_v25 }
 0x1b4   : > { %v4457_v1 = vpop.f32.mrb[30].mxu1  ;;  %11655 = vmatprep.subr.bf16.mxu1 %v11654_v57  ;;  %v4388_v5 = vadd.f32 %v4387_v0, %v4318_v53  ;;  %v4389_v6 = vpop.f32.mrb[31].mxu0  ;;  %v1656_v53 = vrot.slane %v1642_v43, %v12313_v25  ;;  %v488_v57 = vld [vmem:[%s12285_s26 + $0x5d8] sm:$0xff]  ;;  %v11674_v0 = vpack.c.bf16 %v742_v52, %v486_v51 }
 0x1b5   : > { %v4459_v7 = vpop.f32.mrb[31].mxu1  ;;  %v11678_v2 = vpack.c.bf16 %v744_v58, %v488_v57  ;;  %v487_v6 = vld [vmem:[%s12285_s26 + $0x5d0] sm:$0xff]  ;;  %v752_v43 = vld [vmem:[%s12285_s26 + $0xe18] sm:$0x3] }
 0x1b6   : > { %v4458_v13 = vadd.f32 %v4457_v1, %v4388_v5  ;;  %v1658_v1 = vcombine.high %v1656_v53, %v1656_v53  ;;  %v741_v5 = vld [vmem:[%s12285_s26 + $0xdc0] sm:$0x3]  ;;  %v743_v7 = vld [vmem:[%s12285_s26 + $0xdd0] sm:$0x3] }
 0x1b7   : > { %v11680_v21 = vpack.c.bf16 %v743_v7, %v487_v6 }
 0x1b8   : > { %8166 = vmatmul.mubr.f32.vlgmr.msra.gmra.mrb[84].mxu0 %v1598_v39  ;;  %v1640_v39 = vcombine.high %v1632_v23, %v1632_v23 }
 0x1b9   : > { %8236 = vmatmul.mubr.f32.vlgmr.msra.gmra.mrb[84].mxu1 %v1605_v44  ;;  %11653 = vmatpush1.bf16.xpose.msra.mxu0 %v11652_v11  ;;  %v481_v44 = vld [vmem:[%s12285_s26 + $0x5a0] sm:$0xff]  ;;  %v490_v11 = vld [vmem:[%s12285_s26 + $0x5e8] sm:$0xff] }
 0x1ba   : > { %11657 = vmatpush1.bf16.xpose.msra.mxu1 %v11656_v12  ;;  %8305 = vmatprep.mubr.f32.mxu0 %v1623_v14  ;;  %v11668_v60 = vpack.c.bf16 %v737_v45, %v481_v44  ;;  %v746_v12 = vld [vmem:[%s12285_s26 + $0xde8] sm:$0x3]  ;;  %v285_v44 = vld [vmem:[%s12279_s17 + $0x180] sm:$0xff] }
 0x1bb   : > { %11659 = vmatprep.subr.bf16.mxu0 %v11658_v15  ;;  %v4527_v24 = vpop.f32.mrb[32].mxu0  ;;  %8375 = vmatprep.mubr.f32.mxu1 %v1624_v16  ;;  %v1693_v52 = vcombine.high %v285_v44, %v285_v44  ;;  %v1700_v57 = vrot.slane %v285_v44, %v12313_v25 }
 0x1bc   : > { %v4597_v26 = vpop.f32.mrb[32].mxu1  ;;  %11663 = vmatprep.subr.bf16.mxu1 %v11662_v17  ;;  %v4528_v30 = vadd.f32 %v4527_v24, %v4458_v13  ;;  %v4529_v31 = vpop.f32.mrb[33].mxu0  ;;  %v1673_v13 = vrot.slane %v1659_v3, %v12313_v25  ;;  %v492_v17 = vld [vmem:[%s12285_s26 + $0x5f8] sm:$0xff]  ;;  %v11682_v24 = vpack.c.bf16 %v746_v12, %v490_v11 }
 0x1bd   : > { %v4599_v32 = vpop.f32.mrb[33].mxu1  ;;  %v11686_v27 = vpack.c.bf16 %v748_v18, %v492_v17  ;;  %v491_v31 = vld [vmem:[%s12285_s26 + $0x5f0] sm:$0xff]  ;;  %v756_v3 = vld [vmem:[%s12285_s26 + $0xe38] sm:$0x3] }
 0x1be   : > { %v4598_v38 = vadd.f32 %v4597_v26, %v4528_v30  ;;  %v1675_v26 = vcombine.high %v1673_v13, %v1673_v13  ;;  %v745_v30 = vld [vmem:[%s12285_s26 + $0xde0] sm:$0x3]  ;;  %v747_v32 = vld [vmem:[%s12285_s26 + $0xdf0] sm:$0x3] }
 0x1bf   : > { %v11688_v46 = vpack.c.bf16 %v747_v32, %v491_v31 }
 0x1c0   : > { %8306 = vmatmul.mubr.f32.vlgmr.msra.gmra.mrb[86].mxu0 %v1615_v63  ;;  %v1657_v63 = vcombine.high %v1649_v48, %v1649_v48 }
 0x1c1   : > { %8376 = vmatmul.mubr.f32.vlgmr.msra.gmra.mrb[86].mxu1 %v1622_v4  ;;  %11661 = vmatpush1.bf16.xpose.msra.mxu0 %v11660_v36  ;;  %v485_v4 = vld [vmem:[%s12285_s26 + $0x5c0] sm:$0xff]  ;;  %v494_v36 = vld [vmem:[%s12285_s26 + $0x608] sm:$0xff] }
 0x1c2   : > { %11665 = vmatpush1.bf16.xpose.msra.mxu1 %v11664_v37  ;;  %8445 = vmatprep.mubr.f32.mxu0 %v1640_v39  ;;  %v11676_v20 = vpack.c.bf16 %v741_v5, %v485_v4  ;;  %v750_v37 = vld [vmem:[%s12285_s26 + $0xe08] sm:$0x3] }
 0x1c3   : > { %11667 = vmatprep.subr.bf16.mxu0 %v11666_v40  ;;  %v4667_v49 = vpop.f32.mrb[34].mxu0  ;;  %8515 = vmatprep.mubr.f32.mxu1 %v1641_v41  ;;  %v286_v4 = vld [vmem:[%s12279_s17 + $0x188] sm:$0xff] }
 0x1c4   : > { %v4737_v50 = vpop.f32.mrb[34].mxu1  ;;  %11671 = vmatprep.subr.bf16.mxu1 %v11670_v42  ;;  %v4668_v54 = vadd.f32 %v4667_v49, %v4598_v38  ;;  %v4669_v55 = vpop.f32.mrb[35].mxu0  ;;  %v1690_v38 = vrot.slane %v1676_v28, %v12313_v25  ;;  %v496_v42 = vld [vmem:[%s12285_s26 + $0x618] sm:$0xff]  ;;  %v11690_v49 = vpack.c.bf16 %v750_v37, %v494_v36  ;;  %v1710_v12 = vcombine.high %v286_v4, %v286_v4 }
 0x1c5   : > { %v4739_v56 = vpop.f32.mrb[35].mxu1  ;;  %v11694_v51 = vpack.c.bf16 %v752_v43, %v496_v42  ;;  %v495_v55 = vld [vmem:[%s12285_s26 + $0x610] sm:$0xff]  ;;  %v1717_v17 = vrot.slane %v286_v4, %v12313_v25  ;;  %v760_v28 = vld [vmem:[%s12285_s26 + $0xe58] sm:$0x3] }
 0x1c6   : > { %v4738_v62 = vadd.f32 %v4737_v50, %v4668_v54  ;;  %v1692_v50 = vcombine.high %v1690_v38, %v1690_v38  ;;  %v749_v54 = vld [vmem:[%s12285_s26 + $0xe00] sm:$0x3]  ;;  %v751_v56 = vld [vmem:[%s12285_s26 + $0xe10] sm:$0x3] }
 0x1c7   : > { %v11696_v6 = vpack.c.bf16 %v751_v56, %v495_v55 }
 0x1c8   : > { %8446 = vmatmul.mubr.f32.vlgmr.msra.gmra.mrb[88].mxu0 %v1632_v23  ;;  %v1674_v23 = vcombine.high %v1666_v8, %v1666_v8 }
 0x1c9   : > { %8516 = vmatmul.mubr.f32.vlgmr.msra.gmra.mrb[88].mxu1 %v1639_v29  ;;  %11669 = vmatpush1.bf16.xpose.msra.mxu0 %v11668_v60  ;;  %v489_v29 = vld [vmem:[%s12285_s26 + $0x5e0] sm:$0xff]  ;;  %v498_v60 = vld [vmem:[%s12285_s26 + $0x628] sm:$0xff] }
 0x1ca   : > { %11673 = vmatpush1.bf16.xpose.msra.mxu1 %v11672_v61  ;;  %8585 = vmatprep.mubr.f32.mxu0 %v1657_v63  ;;  %v11684_v45 = vpack.c.bf16 %v745_v30, %v489_v29  ;;  %v754_v61 = vld [vmem:[%s12285_s26 + $0xe28] sm:$0x3]  ;;  %v287_v29 = vld [vmem:[%s12279_s17 + $0x190] sm:$0xff] }
 0x1cb   : > { %11675 = vmatprep.subr.bf16.mxu0 %v11674_v0  ;;  %v4807_v9 = vpop.f32.mrb[36].mxu0  ;;  %8655 = vmatprep.mubr.f32.mxu1 %v1658_v1  ;;  %v1727_v37 = vcombine.high %v287_v29, %v287_v29  ;;  %v1734_v42 = vrot.slane %v287_v29, %v12313_v25 }
 0x1cc   : > { %v4877_v10 = vpop.f32.mrb[36].mxu1  ;;  %11679 = vmatprep.subr.bf16.mxu1 %v11678_v2  ;;  %v4808_v14 = vadd.f32 %v4807_v9, %v4738_v62  ;;  %v4809_v15 = vpop.f32.mrb[37].mxu0  ;;  %v1707_v62 = vrot.slane %v1693_v52, %v12313_v25  ;;  %v500_v2 = vld [vmem:[%s12285_s26 + $0x638] sm:$0xff]  ;;  %v11698_v9 = vpack.c.bf16 %v754_v61, %v498_v60 }
 0x1cd   : > { %v4879_v16 = vpop.f32.mrb[37].mxu1  ;;  %v11702_v11 = vpack.c.bf16 %v756_v3, %v500_v2  ;;  %v499_v15 = vld [vmem:[%s12285_s26 + $0x630] sm:$0xff]  ;;  %v764_v52 = vld [vmem:[%s12285_s26 + $0xe78] sm:$0x3] }
 0x1ce   : > { %v4878_v22 = vadd.f32 %v4877_v10, %v4808_v14  ;;  %v1709_v10 = vcombine.high %v1707_v62, %v1707_v62  ;;  %v753_v14 = vld [vmem:[%s12285_s26 + $0xe20] sm:$0x3]  ;;  %v755_v16 = vld [vmem:[%s12285_s26 + $0xe30] sm:$0x3] }
 0x1cf   : > { %v11704_v31 = vpack.c.bf16 %v755_v16, %v499_v15 }
 0x1d0   : > { %8586 = vmatmul.mubr.f32.vlgmr.msra.gmra.mrb[90].mxu0 %v1649_v48  ;;  %v1691_v48 = vcombine.high %v1683_v33, %v1683_v33 }
 0x1d1   : > { %8656 = vmatmul.mubr.f32.vlgmr.msra.gmra.mrb[90].mxu1 %v1656_v53  ;;  %11677 = vmatpush1.bf16.xpose.msra.mxu0 %v11676_v20  ;;  %v493_v53 = vld [vmem:[%s12285_s26 + $0x600] sm:$0xff]  ;;  %v502_v20 = vld [vmem:[%s12285_s26 + $0x648] sm:$0xff] }
 0x1d2   : > { %11681 = vmatpush1.bf16.xpose.msra.mxu1 %v11680_v21  ;;  %8725 = vmatprep.mubr.f32.mxu0 %v1674_v23  ;;  %v11692_v5 = vpack.c.bf16 %v749_v54, %v493_v53  ;;  %v758_v21 = vld [vmem:[%s12285_s26 + $0xe48] sm:$0x3]  ;;  %v288_v53 = vld [vmem:[%s12279_s17 + $0x198] sm:$0xff] }
 0x1d3   : > { %11683 = vmatprep.subr.bf16.mxu0 %v11682_v24  ;;  %v4947_v34 = vpop.f32.mrb[38].mxu0  ;;  %8795 = vmatprep.mubr.f32.mxu1 %v1675_v26  ;;  %v1744_v61 = vcombine.high %v288_v53, %v288_v53  ;;  %v1751_v2 = vrot.slane %v288_v53, %v12313_v25 }
 0x1d4   : > { %v5017_v35 = vpop.f32.mrb[38].mxu1  ;;  %11687 = vmatprep.subr.bf16.mxu1 %v11686_v27  ;;  %v4948_v39 = vadd.f32 %v4947_v34, %v4878_v22  ;;  %v4949_v40 = vpop.f32.mrb[39].mxu0  ;;  %v1724_v22 = vrot.slane %v1710_v12, %v12313_v25  ;;  %v504_v27 = vld [vmem:[%s12285_s26 + $0x658] sm:$0xff]  ;;  %v11706_v34 = vpack.c.bf16 %v758_v21, %v502_v20 }
 0x1d5   : > { %v5019_v41 = vpop.f32.mrb[39].mxu1  ;;  %v11710_v36 = vpack.c.bf16 %v760_v28, %v504_v27  ;;  %v503_v40 = vld [vmem:[%s12285_s26 + $0x650] sm:$0xff]  ;;  %v768_v12 = vld [vmem:[%s12285_s26 + $0xe98] sm:$0x3] }
 0x1d6   : > { %v5018_v47 = vadd.f32 %v5017_v35, %v4948_v39  ;;  %v1726_v35 = vcombine.high %v1724_v22, %v1724_v22  ;;  %v757_v39 = vld [vmem:[%s12285_s26 + $0xe40] sm:$0x3]  ;;  %v759_v41 = vld [vmem:[%s12285_s26 + $0xe50] sm:$0x3] }
 0x1d7   : > { %v11712_v55 = vpack.c.bf16 %v759_v41, %v503_v40 }
 0x1d8   : > { %8726 = vmatmul.mubr.f32.vlgmr.msra.gmra.mrb[92].mxu0 %v1666_v8  ;;  %v1708_v8 = vcombine.high %v1700_v57, %v1700_v57 }
 0x1d9   : > { %8796 = vmatmul.mubr.f32.vlgmr.msra.gmra.mrb[92].mxu1 %v1673_v13  ;;  %11685 = vmatpush1.bf16.xpose.msra.mxu0 %v11684_v45  ;;  %v497_v13 = vld [vmem:[%s12285_s26 + $0x620] sm:$0xff]  ;;  %v506_v45 = vld [vmem:[%s12285_s26 + $0x668] sm:$0xff] }
 0x1da   : > { %11689 = vmatpush1.bf16.xpose.msra.mxu1 %v11688_v46  ;;  %8865 = vmatprep.mubr.f32.mxu0 %v1691_v48  ;;  %v11700_v30 = vpack.c.bf16 %v753_v14, %v497_v13  ;;  %v762_v46 = vld [vmem:[%s12285_s26 + $0xe68] sm:$0x3]  ;;  %v289_v13 = vld [vmem:[%s12279_s17 + $0x1a0] sm:$0xff] }
 0x1db   : > { %11691 = vmatprep.subr.bf16.mxu0 %v11690_v49  ;;  %v5087_v58 = vpop.f32.mrb[40].mxu0  ;;  %8935 = vmatprep.mubr.f32.mxu1 %v1692_v50  ;;  %v1761_v21 = vcombine.high %v289_v13, %v289_v13  ;;  %v1768_v27 = vrot.slane %v289_v13, %v12313_v25 }
 0x1dc   : > { %v5157_v59 = vpop.f32.mrb[40].mxu1  ;;  %11695 = vmatprep.subr.bf16.mxu1 %v11694_v51  ;;  %v5088_v63 = vadd.f32 %v5087_v58, %v5018_v47  ;;  %v5089_v0 = vpop.f32.mrb[41].mxu0  ;;  %v1741_v47 = vrot.slane %v1727_v37, %v12313_v25  ;;  %v508_v51 = vld [vmem:[%s12285_s26 + $0x678] sm:$0xff]  ;;  %v11714_v58 = vpack.c.bf16 %v762_v46, %v506_v45 }
 0x1dd   : > { %v5159_v1 = vpop.f32.mrb[41].mxu1  ;;  %v11718_v60 = vpack.c.bf16 %v764_v52, %v508_v51  ;;  %v507_v0 = vld [vmem:[%s12285_s26 + $0x670] sm:$0xff]  ;;  %v772_v37 = vld [vmem:[%s12285_s26 + $0xeb8] sm:$0x3] }
 0x1de   : > { %v5158_v7 = vadd.f32 %v5157_v59, %v5088_v63  ;;  %v1743_v59 = vcombine.high %v1741_v47, %v1741_v47  ;;  %v761_v63 = vld [vmem:[%s12285_s26 + $0xe60] sm:$0x3]  ;;  %v763_v1 = vld [vmem:[%s12285_s26 + $0xe70] sm:$0x3] }
 0x1df   : > { %v11720_v15 = vpack.c.bf16 %v763_v1, %v507_v0 }
 0x1e0   : > { %8866 = vmatmul.mubr.f32.vlgmr.msra.gmra.mrb[94].mxu0 %v1683_v33  ;;  %v1725_v33 = vcombine.high %v1717_v17, %v1717_v17 }
 0x1e1   : > { %8936 = vmatmul.mubr.f32.vlgmr.msra.gmra.mrb[94].mxu1 %v1690_v38  ;;  %11693 = vmatpush1.bf16.xpose.msra.mxu0 %v11692_v5  ;;  %v501_v38 = vld [vmem:[%s12285_s26 + $0x640] sm:$0xff]  ;;  %v510_v5 = vld [vmem:[%s12285_s26 + $0x688] sm:$0xff] }
 0x1e2   : > { %11697 = vmatpush1.bf16.xpose.msra.mxu1 %v11696_v6  ;;  %9005 = vmatprep.mubr.f32.mxu0 %v1708_v8  ;;  %v11708_v54 = vpack.c.bf16 %v757_v39, %v501_v38  ;;  %v766_v6 = vld [vmem:[%s12285_s26 + $0xe88] sm:$0x3] }
 0x1e3   : > { %11699 = vmatprep.subr.bf16.mxu0 %v11698_v9  ;;  %v5227_v18 = vpop.f32.mrb[42].mxu0  ;;  %9075 = vmatprep.mubr.f32.mxu1 %v1709_v10  ;;  %v290_v38 = vld [vmem:[%s12279_s17 + $0x1a8] sm:$0xff] }
 0x1e4   : > { %v5297_v19 = vpop.f32.mrb[42].mxu1  ;;  %11703 = vmatprep.subr.bf16.mxu1 %v11702_v11  ;;  %v5228_v23 = vadd.f32 %v5227_v18, %v5158_v7  ;;  %v5229_v24 = vpop.f32.mrb[43].mxu0  ;;  %v1758_v7 = vrot.slane %v1744_v61, %v12313_v25  ;;  %v512_v11 = vld [vmem:[%s12285_s26 + $0x698] sm:$0xff]  ;;  %v11722_v18 = vpack.c.bf16 %v766_v6, %v510_v5  ;;  %v1778_v46 = vcombine.high %v290_v38, %v290_v38 }
 0x1e5   : > { %v5299_v26 = vpop.f32.mrb[43].mxu1  ;;  %v11726_v20 = vpack.c.bf16 %v768_v12, %v512_v11  ;;  %v511_v24 = vld [vmem:[%s12285_s26 + $0x690] sm:$0xff]  ;;  %v1785_v51 = vrot.slane %v290_v38, %v12313_v25  ;;  %v776_v61 = vld [vmem:[%s12285_s26 + $0xed8] sm:$0x3] }
 0x1e6   : > { %v5298_v32 = vadd.f32 %v5297_v19, %v5228_v23  ;;  %v1760_v19 = vcombine.high %v1758_v7, %v1758_v7  ;;  %v765_v23 = vld [vmem:[%s12285_s26 + $0xe80] sm:$0x3]  ;;  %v767_v26 = vld [vmem:[%s12285_s26 + $0xe90] sm:$0x3] }
 0x1e7   : > { %v11728_v40 = vpack.c.bf16 %v767_v26, %v511_v24 }
 0x1e8   : > { %9006 = vmatmul.mubr.f32.vlgmr.msra.gmra.mrb[96].mxu0 %v1700_v57  ;;  %v1742_v57 = vcombine.high %v1734_v42, %v1734_v42 }
 0x1e9   : > { %9076 = vmatmul.mubr.f32.vlgmr.msra.gmra.mrb[96].mxu1 %v1707_v62  ;;  %11701 = vmatpush1.bf16.xpose.msra.mxu0 %v11700_v30  ;;  %v505_v62 = vld [vmem:[%s12285_s26 + $0x660] sm:$0xff]  ;;  %v514_v30 = vld [vmem:[%s12285_s26 + $0x6a8] sm:$0xff] }
 0x1ea   : > { %11705 = vmatpush1.bf16.xpose.msra.mxu1 %v11704_v31  ;;  %9145 = vmatprep.mubr.f32.mxu0 %v1725_v33  ;;  %v11716_v14 = vpack.c.bf16 %v761_v63, %v505_v62  ;;  %v770_v31 = vld [vmem:[%s12285_s26 + $0xea8] sm:$0x3]  ;;  %v291_v62 = vld [vmem:[%s12279_s17 + $0x1b0] sm:$0xff] }
 0x1eb   : > { %11707 = vmatprep.subr.bf16.mxu0 %v11706_v34  ;;  %v5367_v43 = vpop.f32.mrb[44].mxu0  ;;  %9215 = vmatprep.mubr.f32.mxu1 %v1726_v35  ;;  %v1795_v6 = vcombine.high %v291_v62, %v291_v62  ;;  %v1802_v11 = vrot.slane %v291_v62, %v12313_v25 }
 0x1ec   : > { %v5437_v44 = vpop.f32.mrb[44].mxu1  ;;  %11711 = vmatprep.subr.bf16.mxu1 %v11710_v36  ;;  %v5368_v48 = vadd.f32 %v5367_v43, %v5298_v32  ;;  %v5369_v49 = vpop.f32.mrb[45].mxu0  ;;  %v1775_v32 = vrot.slane %v1761_v21, %v12313_v25  ;;  %v516_v36 = vld [vmem:[%s12285_s26 + $0x6b8] sm:$0xff]  ;;  %v11730_v43 = vpack.c.bf16 %v770_v31, %v514_v30 }
 0x1ed   : > { %v5439_v50 = vpop.f32.mrb[45].mxu1  ;;  %v11734_v45 = vpack.c.bf16 %v772_v37, %v516_v36  ;;  %v515_v49 = vld [vmem:[%s12285_s26 + $0x6b0] sm:$0xff]  ;;  %v780_v21 = vld [vmem:[%s12285_s26 + $0xef8] sm:$0x3] }
 0x1ee   : > { %v5438_v56 = vadd.f32 %v5437_v44, %v5368_v48  ;;  %v1777_v44 = vcombine.high %v1775_v32, %v1775_v32  ;;  %v769_v48 = vld [vmem:[%s12285_s26 + $0xea0] sm:$0x3]  ;;  %v771_v50 = vld [vmem:[%s12285_s26 + $0xeb0] sm:$0x3] }
 0x1ef   : > { %v11736_v0 = vpack.c.bf16 %v771_v50, %v515_v49 }
 0x1f0   : > { %9146 = vmatmul.mubr.f32.vlgmr.msra.gmra.mrb[98].mxu0 %v1717_v17  ;;  %v1759_v17 = vcombine.high %v1751_v2, %v1751_v2 }
 0x1f1   : > { %9216 = vmatmul.mubr.f32.vlgmr.msra.gmra.mrb[98].mxu1 %v1724_v22  ;;  %11709 = vmatpush1.bf16.xpose.msra.mxu0 %v11708_v54  ;;  %v509_v22 = vld [vmem:[%s12285_s26 + $0x680] sm:$0xff]  ;;  %v518_v54 = vld [vmem:[%s12285_s26 + $0x6c8] sm:$0xff] }
 0x1f2   : > { %11713 = vmatpush1.bf16.xpose.msra.mxu1 %v11712_v55  ;;  %9285 = vmatprep.mubr.f32.mxu0 %v1742_v57  ;;  %v11724_v39 = vpack.c.bf16 %v765_v23, %v509_v22  ;;  %v774_v55 = vld [vmem:[%s12285_s26 + $0xec8] sm:$0x3]  ;;  %v292_v22 = vld [vmem:[%s12279_s17 + $0x1b8] sm:$0xff] }
 0x1f3   : > { %11715 = vmatprep.subr.bf16.mxu0 %v11714_v58  ;;  %v5507_v3 = vpop.f32.mrb[46].mxu0  ;;  %9355 = vmatprep.mubr.f32.mxu1 %v1743_v59  ;;  %v1812_v31 = vcombine.high %v292_v22, %v292_v22  ;;  %v1819_v36 = vrot.slane %v292_v22, %v12313_v25 }
 0x1f4   : > { %v5577_v4 = vpop.f32.mrb[46].mxu1  ;;  %11719 = vmatprep.subr.bf16.mxu1 %v11718_v60  ;;  %v5508_v8 = vadd.f32 %v5507_v3, %v5438_v56  ;;  %v5509_v9 = vpop.f32.mrb[47].mxu0  ;;  %v1792_v56 = vrot.slane %v1778_v46, %v12313_v25  ;;  %v520_v60 = vld [vmem:[%s12285_s26 + $0x6d8] sm:$0xff]  ;;  %v11738_v3 = vpack.c.bf16 %v774_v55, %v518_v54 }
 0x1f5   : > { %v5579_v10 = vpop.f32.mrb[47].mxu1  ;;  %v11742_v5 = vpack.c.bf16 %v776_v61, %v520_v60  ;;  %v519_v9 = vld [vmem:[%s12285_s26 + $0x6d0] sm:$0xff]  ;;  %v784_v46 = vld [vmem:[%s12285_s26 + $0xf18] sm:$0x3] }
 0x1f6   : > { %v5578_v16 = vadd.f32 %v5577_v4, %v5508_v8  ;;  %v1794_v4 = vcombine.high %v1792_v56, %v1792_v56  ;;  %v773_v8 = vld [vmem:[%s12285_s26 + $0xec0] sm:$0x3]  ;;  %v775_v10 = vld [vmem:[%s12285_s26 + $0xed0] sm:$0x3] }
 0x1f7   : > { %v11744_v24 = vpack.c.bf16 %v775_v10, %v519_v9 }
 0x1f8   : > { %9286 = vmatmul.mubr.f32.vlgmr.msra.gmra.mrb[100].mxu0 %v1734_v42  ;;  %v1776_v42 = vcombine.high %v1768_v27, %v1768_v27 }
 0x1f9   : > { %9356 = vmatmul.mubr.f32.vlgmr.msra.gmra.mrb[100].mxu1 %v1741_v47  ;;  %11717 = vmatpush1.bf16.xpose.msra.mxu0 %v11716_v14  ;;  %v513_v47 = vld [vmem:[%s12285_s26 + $0x6a0] sm:$0xff]  ;;  %v522_v14 = vld [vmem:[%s12285_s26 + $0x6e8] sm:$0xff] }
 0x1fa   : > { %11721 = vmatpush1.bf16.xpose.msra.mxu1 %v11720_v15  ;;  %9425 = vmatprep.mubr.f32.mxu0 %v1759_v17  ;;  %v11732_v63 = vpack.c.bf16 %v769_v48, %v513_v47  ;;  %v778_v15 = vld [vmem:[%s12285_s26 + $0xee8] sm:$0x3]  ;;  %v293_v47 = vld [vmem:[%s12279_s17 + $0x1c0] sm:$0xff] }
 0x1fb   : > { %11723 = vmatprep.subr.bf16.mxu0 %v11722_v18  ;;  %v5647_v28 = vpop.f32.mrb[48].mxu0  ;;  %9495 = vmatprep.mubr.f32.mxu1 %v1760_v19  ;;  %v1829_v55 = vcombine.high %v293_v47, %v293_v47  ;;  %v1836_v60 = vrot.slane %v293_v47, %v12313_v25 }
 0x1fc   : > { %v5717_v29 = vpop.f32.mrb[48].mxu1  ;;  %11727 = vmatprep.subr.bf16.mxu1 %v11726_v20  ;;  %v5648_v33 = vadd.f32 %v5647_v28, %v5578_v16  ;;  %v5649_v34 = vpop.f32.mrb[49].mxu0  ;;  %v1809_v16 = vrot.slane %v1795_v6, %v12313_v25  ;;  %v524_v20 = vld [vmem:[%s12285_s26 + $0x6f8] sm:$0xff]  ;;  %v11746_v28 = vpack.c.bf16 %v778_v15, %v522_v14 }
 0x1fd   : > { %v5719_v35 = vpop.f32.mrb[49].mxu1  ;;  %v11750_v30 = vpack.c.bf16 %v780_v21, %v524_v20  ;;  %v523_v34 = vld [vmem:[%s12285_s26 + $0x6f0] sm:$0xff]  ;;  %v788_v6 = vld [vmem:[%s12285_s26 + $0xf38] sm:$0x3] }
 0x1fe   : > { %v5718_v41 = vadd.f32 %v5717_v29, %v5648_v33  ;;  %v1811_v29 = vcombine.high %v1809_v16, %v1809_v16  ;;  %v777_v33 = vld [vmem:[%s12285_s26 + $0xee0] sm:$0x3]  ;;  %v779_v35 = vld [vmem:[%s12285_s26 + $0xef0] sm:$0x3] }
 0x1ff   : > { %v11752_v49 = vpack.c.bf16 %v779_v35, %v523_v34 }
 0x200   : > { %9426 = vmatmul.mubr.f32.vlgmr.msra.gmra.mrb[102].mxu0 %v1751_v2  ;;  %v1793_v2 = vcombine.high %v1785_v51, %v1785_v51 }
 0x201   : > { %9496 = vmatmul.mubr.f32.vlgmr.msra.gmra.mrb[102].mxu1 %v1758_v7  ;;  %11725 = vmatpush1.bf16.xpose.msra.mxu0 %v11724_v39  ;;  %v517_v7 = vld [vmem:[%s12285_s26 + $0x6c0] sm:$0xff]  ;;  %v526_v39 = vld [vmem:[%s12285_s26 + $0x708] sm:$0xff] }
 0x202   : > { %11729 = vmatpush1.bf16.xpose.msra.mxu1 %v11728_v40  ;;  %9565 = vmatprep.mubr.f32.mxu0 %v1776_v42  ;;  %v11740_v23 = vpack.c.bf16 %v773_v8, %v517_v7  ;;  %v782_v40 = vld [vmem:[%s12285_s26 + $0xf08] sm:$0x3] }
 0x203   : > { %11731 = vmatprep.subr.bf16.mxu0 %v11730_v43  ;;  %v5787_v52 = vpop.f32.mrb[50].mxu0  ;;  %9635 = vmatprep.mubr.f32.mxu1 %v1777_v44  ;;  %v294_v7 = vld [vmem:[%s12279_s17 + $0x1c8] sm:$0xff] }
 0x204   : > { %v5857_v53 = vpop.f32.mrb[50].mxu1  ;;  %11735 = vmatprep.subr.bf16.mxu1 %v11734_v45  ;;  %v5788_v57 = vadd.f32 %v5787_v52, %v5718_v41  ;;  %v5789_v58 = vpop.f32.mrb[51].mxu0  ;;  %v1826_v41 = vrot.slane %v1812_v31, %v12313_v25  ;;  %v528_v45 = vld [vmem:[%s12285_s26 + $0x718] sm:$0xff]  ;;  %v11754_v52 = vpack.c.bf16 %v782_v40, %v526_v39  ;;  %v1846_v15 = vcombine.high %v294_v7, %v294_v7 }
 0x205   : > { %v5859_v59 = vpop.f32.mrb[51].mxu1  ;;  %v11758_v54 = vpack.c.bf16 %v784_v46, %v528_v45  ;;  %v527_v58 = vld [vmem:[%s12285_s26 + $0x710] sm:$0xff]  ;;  %v1853_v20 = vrot.slane %v294_v7, %v12313_v25  ;;  %v792_v31 = vld [vmem:[%s12285_s26 + $0xf58] sm:$0x3] }
 0x206   : > { %v5858_v1 = vadd.f32 %v5857_v53, %v5788_v57  ;;  %v1828_v53 = vcombine.high %v1826_v41, %v1826_v41  ;;  %v781_v57 = vld [vmem:[%s12285_s26 + $0xf00] sm:$0x3]  ;;  %v783_v59 = vld [vmem:[%s12285_s26 + $0xf10] sm:$0x3] }
 0x207   : > { %v11760_v9 = vpack.c.bf16 %v783_v59, %v527_v58 }
 0x208   : > { %9566 = vmatmul.mubr.f32.vlgmr.msra.gmra.mrb[104].mxu0 %v1768_v27  ;;  %v1810_v27 = vcombine.high %v1802_v11, %v1802_v11 }
 0x209   : > { %9636 = vmatmul.mubr.f32.vlgmr.msra.gmra.mrb[104].mxu1 %v1775_v32  ;;  %11733 = vmatpush1.bf16.xpose.msra.mxu0 %v11732_v63  ;;  %v521_v32 = vld [vmem:[%s12285_s26 + $0x6e0] sm:$0xff]  ;;  %v530_v63 = vld [vmem:[%s12285_s26 + $0x728] sm:$0xff] }
 0x20a   : > { %11737 = vmatpush1.bf16.xpose.msra.mxu1 %v11736_v0  ;;  %9705 = vmatprep.mubr.f32.mxu0 %v1793_v2  ;;  %v11748_v48 = vpack.c.bf16 %v777_v33, %v521_v32  ;;  %v786_v0 = vld [vmem:[%s12285_s26 + $0xf28] sm:$0x3]  ;;  %v295_v32 = vld [vmem:[%s12279_s17 + $0x1d0] sm:$0xff] }
 0x20b   : > { %11739 = vmatprep.subr.bf16.mxu0 %v11738_v3  ;;  %v5927_v12 = vpop.f32.mrb[52].mxu0  ;;  %9775 = vmatprep.mubr.f32.mxu1 %v1794_v4  ;;  %v1863_v40 = vcombine.high %v295_v32, %v295_v32  ;;  %v1870_v45 = vrot.slane %v295_v32, %v12313_v25 }
 0x20c   : > { %v5997_v13 = vpop.f32.mrb[52].mxu1  ;;  %11743 = vmatprep.subr.bf16.mxu1 %v11742_v5  ;;  %v5928_v17 = vadd.f32 %v5927_v12, %v5858_v1  ;;  %v5929_v18 = vpop.f32.mrb[53].mxu0  ;;  %v1843_v1 = vrot.slane %v1829_v55, %v12313_v25  ;;  %v532_v5 = vld [vmem:[%s12285_s26 + $0x738] sm:$0xff]  ;;  %v11762_v12 = vpack.c.bf16 %v786_v0, %v530_v63 }
 0x20d   : > { %v5999_v19 = vpop.f32.mrb[53].mxu1  ;;  %v11766_v14 = vpack.c.bf16 %v788_v6, %v532_v5  ;;  %v531_v18 = vld [vmem:[%s12285_s26 + $0x730] sm:$0xff]  ;;  %v796_v55 = vld [vmem:[%s12285_s26 + $0xf78] sm:$0x3] }
 0x20e   : > { %v5998_v26 = vadd.f32 %v5997_v13, %v5928_v17  ;;  %v1845_v13 = vcombine.high %v1843_v1, %v1843_v1  ;;  %v785_v17 = vld [vmem:[%s12285_s26 + $0xf20] sm:$0x3]  ;;  %v787_v19 = vld [vmem:[%s12285_s26 + $0xf30] sm:$0x3] }
 0x20f   : > { %v11768_v34 = vpack.c.bf16 %v787_v19, %v531_v18 }
 0x210   : > { %9706 = vmatmul.mubr.f32.vlgmr.msra.gmra.mrb[106].mxu0 %v1785_v51  ;;  %v1827_v51 = vcombine.high %v1819_v36, %v1819_v36 }
 0x211   : > { %9776 = vmatmul.mubr.f32.vlgmr.msra.gmra.mrb[106].mxu1 %v1792_v56  ;;  %11741 = vmatpush1.bf16.xpose.msra.mxu0 %v11740_v23  ;;  %v525_v56 = vld [vmem:[%s12285_s26 + $0x700] sm:$0xff]  ;;  %v534_v23 = vld [vmem:[%s12285_s26 + $0x748] sm:$0xff] }
 0x212   : > { %11745 = vmatpush1.bf16.xpose.msra.mxu1 %v11744_v24  ;;  %9845 = vmatprep.mubr.f32.mxu0 %v1810_v27  ;;  %v11756_v8 = vpack.c.bf16 %v781_v57, %v525_v56  ;;  %v790_v24 = vld [vmem:[%s12285_s26 + $0xf48] sm:$0x3]  ;;  %v296_v56 = vld [vmem:[%s12279_s17 + $0x1d8] sm:$0xff] }
 0x213   : > { %11747 = vmatprep.subr.bf16.mxu0 %v11746_v28  ;;  %v6067_v37 = vpop.f32.mrb[54].mxu0  ;;  %9915 = vmatprep.mubr.f32.mxu1 %v1811_v29  ;;  %v1880_v0 = vcombine.high %v296_v56, %v296_v56  ;;  %v1887_v5 = vrot.slane %v296_v56, %v12313_v25 }
 0x214   : > { %v6137_v38 = vpop.f32.mrb[54].mxu1  ;;  %11751 = vmatprep.subr.bf16.mxu1 %v11750_v30  ;;  %v6068_v42 = vadd.f32 %v6067_v37, %v5998_v26  ;;  %v6069_v43 = vpop.f32.mrb[55].mxu0  ;;  %v1860_v26 = vrot.slane %v1846_v15, %v12313_v25  ;;  %v536_v30 = vld [vmem:[%s12285_s26 + $0x758] sm:$0xff]  ;;  %v11770_v37 = vpack.c.bf16 %v790_v24, %v534_v23 }
 0x215   : > { %v6139_v44 = vpop.f32.mrb[55].mxu1  ;;  %v11774_v39 = vpack.c.bf16 %v792_v31, %v536_v30  ;;  %v535_v43 = vld [vmem:[%s12285_s26 + $0x750] sm:$0xff]  ;;  %v800_v15 = vld [vmem:[%s12285_s26 + $0xf98] sm:$0x3] }
 0x216   : > { %v6138_v50 = vadd.f32 %v6137_v38, %v6068_v42  ;;  %v1862_v38 = vcombine.high %v1860_v26, %v1860_v26  ;;  %v789_v42 = vld [vmem:[%s12285_s26 + $0xf40] sm:$0x3]  ;;  %v791_v44 = vld [vmem:[%s12285_s26 + $0xf50] sm:$0x3] }
 0x217   : > { %v11776_v58 = vpack.c.bf16 %v791_v44, %v535_v43 }
 0x218   : > { %9846 = vmatmul.mubr.f32.vlgmr.msra.gmra.mrb[108].mxu0 %v1802_v11  ;;  %v1844_v11 = vcombine.high %v1836_v60, %v1836_v60 }
 0x219   : > { %9916 = vmatmul.mubr.f32.vlgmr.msra.gmra.mrb[108].mxu1 %v1809_v16  ;;  %11749 = vmatpush1.bf16.xpose.msra.mxu0 %v11748_v48  ;;  %v529_v16 = vld [vmem:[%s12285_s26 + $0x720] sm:$0xff]  ;;  %v538_v48 = vld [vmem:[%s12285_s26 + $0x768] sm:$0xff] }
 0x21a   : > { %11753 = vmatpush1.bf16.xpose.msra.mxu1 %v11752_v49  ;;  %9985 = vmatprep.mubr.f32.mxu0 %v1827_v51  ;;  %v11764_v33 = vpack.c.bf16 %v785_v17, %v529_v16  ;;  %v794_v49 = vld [vmem:[%s12285_s26 + $0xf68] sm:$0x3]  ;;  %v297_v16 = vld [vmem:[%s12279_s17 + $0x1e0] sm:$0xff] }
 0x21b   : > { %11755 = vmatprep.subr.bf16.mxu0 %v11754_v52  ;;  %v6207_v61 = vpop.f32.mrb[56].mxu0  ;;  %10055 = vmatprep.mubr.f32.mxu1 %v1828_v53  ;;  %v1897_v24 = vcombine.high %v297_v16, %v297_v16  ;;  %v1904_v30 = vrot.slane %v297_v16, %v12313_v25 }
 0x21c   : > { %v6277_v62 = vpop.f32.mrb[56].mxu1  ;;  %11759 = vmatprep.subr.bf16.mxu1 %v11758_v54  ;;  %v6208_v2 = vadd.f32 %v6207_v61, %v6138_v50  ;;  %v6209_v3 = vpop.f32.mrb[57].mxu0  ;;  %v1877_v50 = vrot.slane %v1863_v40, %v12313_v25  ;;  %v540_v54 = vld [vmem:[%s12285_s26 + $0x778] sm:$0xff]  ;;  %v11778_v61 = vpack.c.bf16 %v794_v49, %v538_v48 }
 0x21d   : > { %v6279_v4 = vpop.f32.mrb[57].mxu1  ;;  %v11782_v63 = vpack.c.bf16 %v796_v55, %v540_v54  ;;  %v539_v3 = vld [vmem:[%s12285_s26 + $0x770] sm:$0xff]  ;;  %v804_v40 = vld [vmem:[%s12285_s26 + $0xfb8] sm:$0x3] }
 0x21e   : > { %v6278_v10 = vadd.f32 %v6277_v62, %v6208_v2  ;;  %v1879_v62 = vcombine.high %v1877_v50, %v1877_v50  ;;  %v793_v2 = vld [vmem:[%s12285_s26 + $0xf60] sm:$0x3]  ;;  %v795_v4 = vld [vmem:[%s12285_s26 + $0xf70] sm:$0x3] }
 0x21f   : > { %v11784_v18 = vpack.c.bf16 %v795_v4, %v539_v3 }
 0x220   : > { %9986 = vmatmul.mubr.f32.vlgmr.msra.gmra.mrb[110].mxu0 %v1819_v36  ;;  %v1861_v36 = vcombine.high %v1853_v20, %v1853_v20 }
 0x221   : > { %10056 = vmatmul.mubr.f32.vlgmr.msra.gmra.mrb[110].mxu1 %v1826_v41  ;;  %11757 = vmatpush1.bf16.xpose.msra.mxu0 %v11756_v8  ;;  %v533_v41 = vld [vmem:[%s12285_s26 + $0x740] sm:$0xff]  ;;  %v542_v8 = vld [vmem:[%s12285_s26 + $0x788] sm:$0xff] }
 0x222   : > { %11761 = vmatpush1.bf16.xpose.msra.mxu1 %v11760_v9  ;;  %10125 = vmatprep.mubr.f32.mxu0 %v1844_v11  ;;  %v11772_v57 = vpack.c.bf16 %v789_v42, %v533_v41  ;;  %v798_v9 = vld [vmem:[%s12285_s26 + $0xf88] sm:$0x3] }
 0x223   : > { %11763 = vmatprep.subr.bf16.mxu0 %v11762_v12  ;;  %v6347_v21 = vpop.f32.mrb[58].mxu0  ;;  %10195 = vmatprep.mubr.f32.mxu1 %v1845_v13  ;;  %v298_v41 = vld [vmem:[%s12279_s17 + $0x1e8] sm:$0xff] }
 0x224   : > { %v6417_v22 = vpop.f32.mrb[58].mxu1  ;;  %11767 = vmatprep.subr.bf16.mxu1 %v11766_v14  ;;  %v6348_v27 = vadd.f32 %v6347_v21, %v6278_v10  ;;  %v6349_v28 = vpop.f32.mrb[59].mxu0  ;;  %v1894_v10 = vrot.slane %v1880_v0, %v12313_v25  ;;  %v544_v14 = vld [vmem:[%s12285_s26 + $0x798] sm:$0xff]  ;;  %v11786_v21 = vpack.c.bf16 %v798_v9, %v542_v8  ;;  %v1914_v49 = vcombine.high %v298_v41, %v298_v41 }
 0x225   : > { %v6419_v29 = vpop.f32.mrb[59].mxu1  ;;  %v11790_v23 = vpack.c.bf16 %v800_v15, %v544_v14  ;;  %v543_v28 = vld [vmem:[%s12285_s26 + $0x790] sm:$0xff]  ;;  %v1921_v54 = vrot.slane %v298_v41, %v12313_v25  ;;  %v808_v0 = vld [vmem:[%s12285_s26 + $0xfd8] sm:$0x3] }
 0x226   : > { %v6418_v35 = vadd.f32 %v6417_v22, %v6348_v27  ;;  %v1896_v22 = vcombine.high %v1894_v10, %v1894_v10  ;;  %v797_v27 = vld [vmem:[%s12285_s26 + $0xf80] sm:$0x3]  ;;  %v799_v29 = vld [vmem:[%s12285_s26 + $0xf90] sm:$0x3] }
 0x227   : > { %v11792_v43 = vpack.c.bf16 %v799_v29, %v543_v28 }
 0x228   : > { %10126 = vmatmul.mubr.f32.vlgmr.msra.gmra.mrb[112].mxu0 %v1836_v60  ;;  %v1878_v60 = vcombine.high %v1870_v45, %v1870_v45 }
 0x229   : > { %10196 = vmatmul.mubr.f32.vlgmr.msra.gmra.mrb[112].mxu1 %v1843_v1  ;;  %11765 = vmatpush1.bf16.xpose.msra.mxu0 %v11764_v33  ;;  %v537_v1 = vld [vmem:[%s12285_s26 + $0x760] sm:$0xff]  ;;  %v546_v33 = vld [vmem:[%s12285_s26 + $0x7a8] sm:$0xff] }
 0x22a   : > { %11769 = vmatpush1.bf16.xpose.msra.mxu1 %v11768_v34  ;;  %10265 = vmatprep.mubr.f32.mxu0 %v1861_v36  ;;  %v11780_v17 = vpack.c.bf16 %v793_v2, %v537_v1  ;;  %v802_v34 = vld [vmem:[%s12285_s26 + $0xfa8] sm:$0x3]  ;;  %v299_v1 = vld [vmem:[%s12279_s17 + $0x1f0] sm:$0xff] }
 0x22b   : > { %11771 = vmatprep.subr.bf16.mxu0 %v11770_v37  ;;  %v6487_v46 = vpop.f32.mrb[60].mxu0  ;;  %10335 = vmatprep.mubr.f32.mxu1 %v1862_v38  ;;  %v1931_v9 = vcombine.high %v299_v1, %v299_v1  ;;  %v1938_v14 = vrot.slane %v299_v1, %v12313_v25 }
 0x22c   : > { %v6557_v47 = vpop.f32.mrb[60].mxu1  ;;  %11775 = vmatprep.subr.bf16.mxu1 %v11774_v39  ;;  %v6488_v51 = vadd.f32 %v6487_v46, %v6418_v35  ;;  %v6489_v52 = vpop.f32.mrb[61].mxu0  ;;  %v1911_v35 = vrot.slane %v1897_v24, %v12313_v25  ;;  %v548_v39 = vld [vmem:[%s12285_s26 + $0x7b8] sm:$0xff]  ;;  %v11794_v46 = vpack.c.bf16 %v802_v34, %v546_v33 }
 0x22d   : > { %v6559_v53 = vpop.f32.mrb[61].mxu1  ;;  %v11798_v48 = vpack.c.bf16 %v804_v40, %v548_v39  ;;  %v547_v52 = vld [vmem:[%s12285_s26 + $0x7b0] sm:$0xff]  ;;  %v556_v24 = vld [vmem:[%s12285_s26 + $0x7f8] sm:$0xff] }
 0x22e   : > { %v6558_v59 = vadd.f32 %v6557_v47, %v6488_v51  ;;  %v1913_v47 = vcombine.high %v1911_v35, %v1911_v35  ;;  %v801_v51 = vld [vmem:[%s12285_s26 + $0xfa0] sm:$0x3]  ;;  %v803_v53 = vld [vmem:[%s12285_s26 + $0xfb0] sm:$0x3] }
 0x22f   : > { %v11800_v3 = vpack.c.bf16 %v803_v53, %v547_v52 }
 0x230   : > { %10266 = vmatmul.mubr.f32.vlgmr.msra.gmra.mrb[114].mxu0 %v1853_v20  ;;  %v1895_v20 = vcombine.high %v1887_v5, %v1887_v5 }
 0x231   : > { %10336 = vmatmul.mubr.f32.vlgmr.msra.gmra.mrb[114].mxu1 %v1860_v26  ;;  %11773 = vmatpush1.bf16.xpose.msra.mxu0 %v11772_v57  ;;  %v541_v26 = vld [vmem:[%s12285_s26 + $0x780] sm:$0xff]  ;;  %v550_v57 = vld [vmem:[%s12285_s26 + $0x7c8] sm:$0xff] }
 0x232   : > { %11777 = vmatpush1.bf16.xpose.msra.mxu1 %v11776_v58  ;;  %10405 = vmatprep.mubr.f32.mxu0 %v1878_v60  ;;  %v11788_v42 = vpack.c.bf16 %v797_v27, %v541_v26  ;;  %v806_v58 = vld [vmem:[%s12285_s26 + $0xfc8] sm:$0x3]  ;;  %v812_v26 = vld [vmem:[%s12285_s26 + $0xff8] sm:$0x3] }
 0x233   : > { %11779 = vmatprep.subr.bf16.mxu0 %v11778_v61  ;;  %v6627_v6 = vpop.f32.mrb[62].mxu0  ;;  %10475 = vmatprep.mubr.f32.mxu1 %v1879_v62  ;;  %v11814_v34 = vpack.c.bf16 %v812_v26, %v556_v24 }
 0x234   : > { %v6697_v7 = vpop.f32.mrb[62].mxu1  ;;  %11783 = vmatprep.subr.bf16.mxu1 %v11782_v63  ;;  %v6628_v11 = vadd.f32 %v6627_v6, %v6558_v59  ;;  %v6629_v12 = vpop.f32.mrb[63].mxu0  ;;  %v1928_v59 = vrot.slane %v1914_v49, %v12313_v25  ;;  %v552_v63 = vld [vmem:[%s12285_s26 + $0x7d8] sm:$0xff]  ;;  %v11802_v6 = vpack.c.bf16 %v806_v58, %v550_v57 }
 0x235   : > { %v6699_v13 = vpop.f32.mrb[63].mxu1  ;;  %v11806_v8 = vpack.c.bf16 %v808_v0, %v552_v63  ;;  %v551_v12 = vld [vmem:[%s12285_s26 + $0x7d0] sm:$0xff] }
 0x236   : > { %v6698_v19 = vadd.f32 %v6697_v7, %v6628_v11  ;;  %v1930_v7 = vcombine.high %v1928_v59, %v1928_v59  ;;  %v805_v11 = vld [vmem:[%s12285_s26 + $0xfc0] sm:$0x3]  ;;  %v807_v13 = vld [vmem:[%s12285_s26 + $0xfd0] sm:$0x3] }
 0x237   : > { %v11808_v28 = vpack.c.bf16 %v807_v13, %v551_v12 }
 0x238   : > { %10406 = vmatmul.mubr.f32.vlgmr.msra.gmra.mrb[116].mxu0 %v1870_v45  ;;  %v1912_v45 = vcombine.high %v1904_v30, %v1904_v30 }
 0x239   : > { %10476 = vmatmul.mubr.f32.vlgmr.msra.gmra.mrb[116].mxu1 %v1877_v50  ;;  %11781 = vmatpush1.bf16.xpose.msra.mxu0 %v11780_v17  ;;  %v545_v50 = vld [vmem:[%s12285_s26 + $0x7a0] sm:$0xff]  ;;  %v554_v17 = vld [vmem:[%s12285_s26 + $0x7e8] sm:$0xff] }
 0x23a   : > { %11785 = vmatpush1.bf16.xpose.msra.mxu1 %v11784_v18  ;;  %10545 = vmatprep.mubr.f32.mxu0 %v1895_v20  ;;  %v11796_v2 = vpack.c.bf16 %v801_v51, %v545_v50  ;;  %v810_v18 = vld [vmem:[%s12285_s26 + $0xfe8] sm:$0x3]  ;;  %v300_v20 = vld [vmem:[%s12279_s17 + $0x1f8] sm:$0xff] }
 0x23b   : > { %11787 = vmatprep.subr.bf16.mxu0 %v11786_v21  ;;  %v6767_v31 = vpop.f32.mrb[64].mxu0  ;;  %10615 = vmatprep.mubr.f32.mxu1 %v1896_v22  ;;  %v1955_v39 = vrot.slane %v300_v20, %v12313_v25 }
 0x23c   : > { %v6837_v32 = vpop.f32.mrb[64].mxu1  ;;  %11791 = vmatprep.subr.bf16.mxu1 %v11790_v23  ;;  %v6768_v36 = vadd.f32 %v6767_v31, %v6698_v19  ;;  %v6769_v37 = vpop.f32.mrb[65].mxu0  ;;  %v1945_v19 = vrot.slane %v1931_v9, %v12313_v25  ;;  %v11810_v31 = vpack.c.bf16 %v810_v18, %v554_v17 }
 0x23d   : > { %v6839_v38 = vpop.f32.mrb[65].mxu1  ;;  %v555_v37 = vld [vmem:[%s12285_s26 + $0x7f0] sm:$0xff]  ;;  %v1963_v49 = vcombine.high %v1955_v39, %v1955_v39 }
 0x23e   : > { %v6838_v44 = vadd.f32 %v6837_v32, %v6768_v36  ;;  %v1948_v32 = vcombine.high %v300_v20, %v300_v20  ;;  %v1947_v33 = vcombine.high %v1945_v19, %v1945_v19  ;;  %v809_v36 = vld [vmem:[%s12285_s26 + $0xfe0] sm:$0x3]  ;;  %v811_v38 = vld [vmem:[%s12285_s26 + $0xff0] sm:$0x3] }
 0x240   : > { %10546 = vmatmul.mubr.f32.vlgmr.msra.gmra.mrb[118].mxu0 %v1887_v5  ;;  %v1929_v5 = vcombine.high %v1921_v54, %v1921_v54  ;;  %v1962_v40 = vrot.slane %v1948_v32, %v12313_v25 }
 0x241   : > { %10616 = vmatmul.mubr.f32.vlgmr.msra.gmra.mrb[118].mxu1 %v1894_v10  ;;  %11789 = vmatpush1.bf16.xpose.msra.mxu0 %v11788_v42  ;;  %v549_v10 = vld [vmem:[%s12285_s26 + $0x7c0] sm:$0xff] }
 0x242   : > { %11793 = vmatpush1.bf16.xpose.msra.mxu1 %v11792_v43  ;;  %10685 = vmatprep.mubr.f32.mxu0 %v1912_v45  ;;  %v11804_v27 = vpack.c.bf16 %v805_v11, %v549_v10  ;;  %v1964_v50 = vcombine.high %v1962_v40, %v1962_v40 }
 0x243   : > { %11795 = vmatprep.subr.bf16.mxu0 %v11794_v46  ;;  %v6907_v55 = vpop.f32.mrb[66].mxu0  ;;  %10755 = vmatprep.mubr.f32.mxu1 %v1913_v47  ;;  %v11816_v47 = vpack.c.bf16 %v811_v38, %v555_v37 }
 0x244   : > { %v6977_v56 = vpop.f32.mrb[66].mxu1  ;;  %11799 = vmatprep.subr.bf16.mxu1 %v11798_v48  ;;  %v6908_v60 = vadd.f32 %v6907_v55, %v6838_v44  ;;  %v6909_v61 = vpop.f32.mrb[67].mxu0 }
 0x245   : > { %v6979_v62 = vpop.f32.mrb[67].mxu1 }
 0x246   : > { %v6978_v4 = vadd.f32 %v6977_v56, %v6908_v60 }
 0x248   : > { %10686 = vmatmul.mubr.f32.vlgmr.msra.gmra.mrb[120].mxu0 %v1904_v30  ;;  %v1946_v30 = vcombine.high %v1938_v14, %v1938_v14 }
 0x249   : > { %10756 = vmatmul.mubr.f32.vlgmr.msra.gmra.mrb[120].mxu1 %v1911_v35  ;;  %11797 = vmatpush1.bf16.xpose.msra.mxu0 %v11796_v2  ;;  %v553_v35 = vld [vmem:[%s12285_s26 + $0x7e0] sm:$0xff] }
 0x24a   : > { %11801 = vmatpush1.bf16.xpose.msra.mxu1 %v11800_v3  ;;  %10825 = vmatprep.mubr.f32.mxu0 %v1929_v5  ;;  %v11812_v46 = vpack.c.bf16 %v809_v36, %v553_v35 }
 0x24b   : > { %11803 = vmatprep.subr.bf16.mxu0 %v11802_v6  ;;  %v7047_v15 = vpop.f32.mrb[68].mxu0  ;;  %10895 = vmatprep.mubr.f32.mxu1 %v1930_v7 }
 0x24c   : > { %v7117_v16 = vpop.f32.mrb[68].mxu1  ;;  %11807 = vmatprep.subr.bf16.mxu1 %v11806_v8  ;;  %v7048_v21 = vadd.f32 %v7047_v15, %v6978_v4  ;;  %v7049_v22 = vpop.f32.mrb[69].mxu0 }
 0x24d   : > { %v7119_v23 = vpop.f32.mrb[69].mxu1 }
 0x24e   : > { %v7118_v29 = vadd.f32 %v7117_v16, %v7048_v21 }
 0x250   : > { %10826 = vmatmul.mubr.f32.vlgmr.msra.gmra.mrb[122].mxu0 %v1921_v54 }
 0x251   : > { %10896 = vmatmul.mubr.f32.vlgmr.msra.gmra.mrb[122].mxu1 %v1928_v59  ;;  %11805 = vmatpush1.bf16.xpose.msra.mxu0 %v11804_v27 }
 0x252   : > { %11809 = vmatpush1.bf16.xpose.msra.mxu1 %v11808_v28  ;;  %10965 = vmatprep.mubr.f32.mxu0 %v1946_v30 }
 0x253   : > { %11811 = vmatprep.subr.bf16.mxu0 %v11810_v31  ;;  %v7187_v41 = vpop.f32.mrb[70].mxu0  ;;  %11035 = vmatprep.mubr.f32.mxu1 %v1947_v33 }
 0x254   : > { %v7257_v42 = vpop.f32.mrb[70].mxu1  ;;  %11815 = vmatprep.subr.bf16.mxu1 %v11814_v34  ;;  %v7188_v43 = vadd.f32 %v7187_v41, %v7118_v29  ;;  %v7189_v44 = vpop.f32.mrb[71].mxu0 }
 0x255   : > { %v7259_v45 = vpop.f32.mrb[71].mxu1 }
 0x256   : > { %v7258_v48 = vadd.f32 %v7257_v42, %v7188_v43 }
 0x258   : > { %10966 = vmatmul.mubr.f32.vlgmr.msra.gmra.mrb[124].mxu0 %v1938_v14 }
 0x259   : > { %11036 = vmatmul.mubr.f32.vlgmr.msra.gmra.mrb[124].mxu1 %v1945_v19  ;;  %11813 = vmatpush1.bf16.xpose.msra.mxu0 %v11812_v46 }
 0x25a   : > { %11817 = vmatpush1.bf16.xpose.msra.mxu1 %v11816_v47  ;;  %11105 = vmatprep.mubr.f32.mxu0 %v1963_v49 }
 0x25b   : > { %11175 = vmatprep.mubr.f32.mxu1 %v1964_v50  ;;  %v7327_v51 = vpop.f32.mrb[72].mxu0 }
 0x25c   : > { %v7397_v25 = vpop.f32.mrb[72].mxu1  ;;  %v7328_v52 = vadd.f32 %v7327_v51, %v7258_v48  ;;  %v7329_v53 = vpop.f32.mrb[73].mxu0 }
 0x25d   : > { %v7399_v54 = vpop.f32.mrb[73].mxu1 }
 0x25e   : > { %v7398_v55 = vadd.f32 %v7397_v25, %v7328_v52 }
 0x260   : > { %11106 = vmatmul.mubr.f32.vlgmr.msra.gmra.mrb[126].mxu0 %v1955_v39 }
 0x261   : > { %11176 = vmatmul.mubr.f32.vlgmr.msra.gmra.mrb[126].mxu1 %v1962_v40 }
 0x263   : > { %v7467_v56 = vpop.f32.mrb[74].mxu0 }
 0x264   : > { %v7537_v57 = vpop.f32.mrb[74].mxu1  ;;  %v7468_v58 = vadd.f32 %v7467_v56, %v7398_v55  ;;  %v7469_v59 = vpop.f32.mrb[75].mxu0 }
 0x265   : > { %v7539_v60 = vpop.f32.mrb[75].mxu1 }
 0x266   : > { %v7538_v61 = vadd.f32 %v7537_v57, %v7468_v58 }
 0x26b   : > { %v7607_v62 = vpop.f32.mrb[76].mxu0 }
 0x26c   : > { %v7677_v63 = vpop.f32.mrb[76].mxu1  ;;  %v7608_v0 = vadd.f32 %v7607_v62, %v7538_v61  ;;  %v7609_v1 = vpop.f32.mrb[77].mxu0 }
 0x26d   : > { %v7679_v2 = vpop.f32.mrb[77].mxu1 }
 0x26e   : > { %v7678_v3 = vadd.f32 %v7677_v63, %v7608_v0 }
 0x273   : > { %v7747_v4 = vpop.f32.mrb[78].mxu0 }
 0x274   : > { %v7817_v5 = vpop.f32.mrb[78].mxu1  ;;  %v7748_v6 = vadd.f32 %v7747_v4, %v7678_v3  ;;  %v7749_v7 = vpop.f32.mrb[79].mxu0 }
 0x275   : > { %v7819_v8 = vpop.f32.mrb[79].mxu1 }
 0x276   : > { %v7818_v9 = vadd.f32 %v7817_v5, %v7748_v6 }
 0x27b   : > { %v7887_v10 = vpop.f32.mrb[80].mxu0 }
 0x27c   : > { %v7957_v11 = vpop.f32.mrb[80].mxu1  ;;  %v7888_v12 = vadd.f32 %v7887_v10, %v7818_v9  ;;  %v7889_v13 = vpop.f32.mrb[81].mxu0 }
 0x27d   : > { %v7959_v14 = vpop.f32.mrb[81].mxu1 }
 0x27e   : > { %v7958_v15 = vadd.f32 %v7957_v11, %v7888_v12 }
 0x283   : > { %v8027_v16 = vpop.f32.mrb[82].mxu0 }
 0x284   : > { %v8097_v17 = vpop.f32.mrb[82].mxu1  ;;  %v8028_v18 = vadd.f32 %v8027_v16, %v7958_v15  ;;  %v8029_v19 = vpop.f32.mrb[83].mxu0 }
 0x285   : > { %v8099_v20 = vpop.f32.mrb[83].mxu1 }
 0x286   : > { %v8098_v21 = vadd.f32 %v8097_v17, %v8028_v18 }
 0x28b   : > { %v8167_v22 = vpop.f32.mrb[84].mxu0 }
 0x28c   : > { %v8237_v23 = vpop.f32.mrb[84].mxu1  ;;  %v8168_v24 = vadd.f32 %v8167_v22, %v8098_v21  ;;  %v8169_v26 = vpop.f32.mrb[85].mxu0 }
 0x28d   : > { %v8239_v27 = vpop.f32.mrb[85].mxu1 }
 0x28e   : > { %v8238_v28 = vadd.f32 %v8237_v23, %v8168_v24 }
 0x293   : > { %v8307_v29 = vpop.f32.mrb[86].mxu0 }
 0x294   : > { %v8377_v30 = vpop.f32.mrb[86].mxu1  ;;  %v8308_v31 = vadd.f32 %v8307_v29, %v8238_v28  ;;  %v8309_v32 = vpop.f32.mrb[87].mxu0 }
 0x295   : > { %v8379_v33 = vpop.f32.mrb[87].mxu1 }
 0x296   : > { %v8378_v34 = vadd.f32 %v8377_v30, %v8308_v31 }
 0x29b   : > { %v8447_v35 = vpop.f32.mrb[88].mxu0 }
 0x29c   : > { %v8517_v36 = vpop.f32.mrb[88].mxu1  ;;  %v8448_v37 = vadd.f32 %v8447_v35, %v8378_v34  ;;  %v8449_v38 = vpop.f32.mrb[89].mxu0 }
 0x29d   : > { %v8519_v39 = vpop.f32.mrb[89].mxu1 }
 0x29e   : > { %v8518_v40 = vadd.f32 %v8517_v36, %v8448_v37 }
 0x2a3   : > { %v8587_v41 = vpop.f32.mrb[90].mxu0 }
 0x2a4   : > { %v8657_v42 = vpop.f32.mrb[90].mxu1  ;;  %v8588_v43 = vadd.f32 %v8587_v41, %v8518_v40  ;;  %v8589_v44 = vpop.f32.mrb[91].mxu0 }
 0x2a5   : > { %v8659_v45 = vpop.f32.mrb[91].mxu1 }
 0x2a6   : > { %v8658_v46 = vadd.f32 %v8657_v42, %v8588_v43 }
 0x2ab   : > { %v8727_v47 = vpop.f32.mrb[92].mxu0 }
 0x2ac   : > { %v8797_v48 = vpop.f32.mrb[92].mxu1  ;;  %v8728_v49 = vadd.f32 %v8727_v47, %v8658_v46  ;;  %v8729_v50 = vpop.f32.mrb[93].mxu0 }
 0x2ad   : > { %v8799_v51 = vpop.f32.mrb[93].mxu1 }
 0x2ae   : > { %v8798_v25 = vadd.f32 %v8797_v48, %v8728_v49 }
 0x2b3   : > { %v8867_v52 = vpop.f32.mrb[94].mxu0 }
 0x2b4   : > { %v8937_v53 = vpop.f32.mrb[94].mxu1  ;;  %v8868_v54 = vadd.f32 %v8867_v52, %v8798_v25  ;;  %v8869_v55 = vpop.f32.mrb[95].mxu0 }
 0x2b5   : > { %v8939_v56 = vpop.f32.mrb[95].mxu1 }
 0x2b6   : > { %v8938_v57 = vadd.f32 %v8937_v53, %v8868_v54 }
 0x2bb   : > { %v9007_v58 = vpop.f32.mrb[96].mxu0 }
 0x2bc   : > { %v9077_v59 = vpop.f32.mrb[96].mxu1  ;;  %v9008_v60 = vadd.f32 %v9007_v58, %v8938_v57  ;;  %v9009_v61 = vpop.f32.mrb[97].mxu0 }
 0x2bd   : > { %v9079_v62 = vpop.f32.mrb[97].mxu1 }
 0x2be   : > { %v9078_v63 = vadd.f32 %v9077_v59, %v9008_v60 }
 0x2c3   : > { %v9147_v0 = vpop.f32.mrb[98].mxu0 }
 0x2c4   : > { %v9217_v1 = vpop.f32.mrb[98].mxu1  ;;  %v9148_v2 = vadd.f32 %v9147_v0, %v9078_v63  ;;  %v9149_v3 = vpop.f32.mrb[99].mxu0 }
 0x2c5   : > { %v9219_v4 = vpop.f32.mrb[99].mxu1 }
 0x2c6   : > { %v9218_v5 = vadd.f32 %v9217_v1, %v9148_v2 }
 0x2cb   : > { %v9287_v6 = vpop.f32.mrb[100].mxu0 }
 0x2cc   : > { %v9357_v7 = vpop.f32.mrb[100].mxu1  ;;  %v9288_v8 = vadd.f32 %v9287_v6, %v9218_v5  ;;  %v9289_v9 = vpop.f32.mrb[101].mxu0 }
 0x2cd   : > { %v9359_v10 = vpop.f32.mrb[101].mxu1 }
 0x2ce   : > { %v9358_v11 = vadd.f32 %v9357_v7, %v9288_v8 }
 0x2d3   : > { %v9427_v12 = vpop.f32.mrb[102].mxu0 }
 0x2d4   : > { %v9497_v13 = vpop.f32.mrb[102].mxu1  ;;  %v9428_v14 = vadd.f32 %v9427_v12, %v9358_v11  ;;  %v9429_v15 = vpop.f32.mrb[103].mxu0 }
 0x2d5   : > { %v9499_v16 = vpop.f32.mrb[103].mxu1 }
 0x2d6   : > { %v9498_v17 = vadd.f32 %v9497_v13, %v9428_v14 }
 0x2db   : > { %v9567_v18 = vpop.f32.mrb[104].mxu0 }
 0x2dc   : > { %v9637_v19 = vpop.f32.mrb[104].mxu1  ;;  %v9568_v20 = vadd.f32 %v9567_v18, %v9498_v17  ;;  %v9569_v21 = vpop.f32.mrb[105].mxu0 }
 0x2dd   : > { %v9639_v22 = vpop.f32.mrb[105].mxu1 }
 0x2de   : > { %v9638_v23 = vadd.f32 %v9637_v19, %v9568_v20 }
 0x2e3   : > { %v9707_v24 = vpop.f32.mrb[106].mxu0 }
 0x2e4   : > { %v9777_v26 = vpop.f32.mrb[106].mxu1  ;;  %v9708_v27 = vadd.f32 %v9707_v24, %v9638_v23  ;;  %v9709_v28 = vpop.f32.mrb[107].mxu0 }
 0x2e5   : > { %v9779_v29 = vpop.f32.mrb[107].mxu1 }
 0x2e6   : > { %v9778_v30 = vadd.f32 %v9777_v26, %v9708_v27  ;;  %v236_v26 = vld [vmem:[%s12296_s22] sm:$0x3] }
 0x2eb   : > { %v9847_v31 = vpop.f32.mrb[108].mxu0 }
 0x2ec   : > { %v9917_v32 = vpop.f32.mrb[108].mxu1  ;;  %v9848_v33 = vadd.f32 %v9847_v31, %v9778_v30  ;;  %v9849_v34 = vpop.f32.mrb[109].mxu0 }
 0x2ed   : > { %v9919_v35 = vpop.f32.mrb[109].mxu1 }
 0x2ee   : > { %v9918_v36 = vadd.f32 %v9917_v32, %v9848_v33 }
 0x2f3   : > { %v9987_v37 = vpop.f32.mrb[110].mxu0 }
 0x2f4   : > { %v10057_v38 = vpop.f32.mrb[110].mxu1  ;;  %v9988_v39 = vadd.f32 %v9987_v37, %v9918_v36  ;;  %v9989_v40 = vpop.f32.mrb[111].mxu0 }
 0x2f5   : > { %v10059_v41 = vpop.f32.mrb[111].mxu1 }
 0x2f6   : > { %v10058_v42 = vadd.f32 %v10057_v38, %v9988_v39 }
 0x2fb   : > { %v10127_v43 = vpop.f32.mrb[112].mxu0 }
 0x2fc   : > { %v10197_v44 = vpop.f32.mrb[112].mxu1  ;;  %v10128_v45 = vadd.f32 %v10127_v43, %v10058_v42  ;;  %v10129_v46 = vpop.f32.mrb[113].mxu0 }
 0x2fd   : > { %v10199_v47 = vpop.f32.mrb[113].mxu1 }
 0x2fe   : > { %v10198_v48 = vadd.f32 %v10197_v44, %v10128_v45 }
 0x303   : > { %v10267_v49 = vpop.f32.mrb[114].mxu0 }
 0x304   : > { %v10337_v50 = vpop.f32.mrb[114].mxu1  ;;  %v10268_v51 = vadd.f32 %v10267_v49, %v10198_v48  ;;  %v10269_v25 = vpop.f32.mrb[115].mxu0 }
 0x305   : > { %v10339_v52 = vpop.f32.mrb[115].mxu1 }
 0x306   : > { %v10338_v53 = vadd.f32 %v10337_v50, %v10268_v51 }
 0x30b   : > { %v10407_v54 = vpop.f32.mrb[116].mxu0 }
 0x30c   : > { %v10477_v55 = vpop.f32.mrb[116].mxu1  ;;  %v10408_v56 = vadd.f32 %v10407_v54, %v10338_v53  ;;  %v10409_v57 = vpop.f32.mrb[117].mxu0 }
 0x30d   : > { %v10479_v58 = vpop.f32.mrb[117].mxu1 }
 0x30e   : > { %v10478_v59 = vadd.f32 %v10477_v55, %v10408_v56 }
 0x313   : > { %v10547_v60 = vpop.f32.mrb[118].mxu0 }
 0x314   : > { %v10617_v61 = vpop.f32.mrb[118].mxu1  ;;  %v10548_v62 = vadd.f32 %v10547_v60, %v10478_v59  ;;  %v10549_v63 = vpop.f32.mrb[119].mxu0 }
 0x315   : > { %v10619_v0 = vpop.f32.mrb[119].mxu1 }
 0x316   : > { %v10618_v1 = vadd.f32 %v10617_v61, %v10548_v62 }
 0x31b   : > { %v10687_v2 = vpop.f32.mrb[120].mxu0 }
 0x31c   : > { %v10757_v3 = vpop.f32.mrb[120].mxu1  ;;  %v10688_v4 = vadd.f32 %v10687_v2, %v10618_v1  ;;  %v10689_v5 = vpop.f32.mrb[121].mxu0 }
 0x31d   : > { %v10759_v6 = vpop.f32.mrb[121].mxu1 }
 0x31e   : > { %v10758_v7 = vadd.f32 %v10757_v3, %v10688_v4 }
 0x323   : > { %v10827_v8 = vpop.f32.mrb[122].mxu0 }
 0x324   : > { %v10897_v9 = vpop.f32.mrb[122].mxu1  ;;  %v10828_v10 = vadd.f32 %v10827_v8, %v10758_v7  ;;  %v10829_v11 = vpop.f32.mrb[123].mxu0 }
 0x325   : > { %v10899_v12 = vpop.f32.mrb[123].mxu1 }
 0x326   : > { %v10898_v13 = vadd.f32 %v10897_v9, %v10828_v10 }
 0x32b   : > { %v10967_v14 = vpop.f32.mrb[124].mxu0 }
 0x32c   : > { %v11037_v15 = vpop.f32.mrb[124].mxu1  ;;  %v10968_v16 = vadd.f32 %v10967_v14, %v10898_v13  ;;  %v10969_v17 = vpop.f32.mrb[125].mxu0 }
 0x32d   : > { %v11039_v18 = vpop.f32.mrb[125].mxu1 }
 0x32e   : > { %v11038_v19 = vadd.f32 %v11037_v15, %v10968_v16 }
 0x333   : > { %v11107_v20 = vpop.f32.mrb[126].mxu0 }
 0x334   : > { %v11177_v21 = vpop.f32.mrb[126].mxu1  ;;  %v11108_v22 = vadd.f32 %v11107_v20, %v11038_v19  ;;  %v11109_v23 = vpop.f32.mrb[127].mxu0 }
 0x335   : > { %v11179_v24 = vpop.f32.mrb[127].mxu1 }
 0x336   : > { %v11178_v27 = vadd.f32 %v11177_v21, %v11108_v22 }
 0x338   : > { %v11181_v28 = vadd.f32 %v11178_v27, %v236_v26 }
 0x33a   : > { %11183 = vst.msk [vmem:[%s12296_s22] sm:$0x3] %vm11182_vm1, %v11181_v28 }
 0x33b PF: > { %s18_s16 = sadd.s32 1, %s12093_s16   ;;  %s13041_s9 = smov %s12069_s10 }
 0x33c   : > { %p15_p5 = scmp.ge.s32.totalorder %s18_s16, 8   ;;  %s13042_s10 = smov %s12073_s11 }
 0x33d   : > { %s13043_s11 = smov %s12190_s5  ;;  %s13044_s12 = smov %s12085_s14 }
 0x33e   : > { %s13045_s13 = smov %s12089_s15  ;;  %s13046_s14 = smov %s13049_s18 }
 0x33f   : > { %s13047_s15 = smov %s13053_s19  ;;  %17 = sbr.rel (!%p15_p5) target bundleno = 7 (0x7), region = 85 }
 0x346   :  { %11203 = vsyncpa [#allocation3], 1 }
 0x347   :  { %11205 = vsyncpa [#allocation3 + $0x1], 1 }
 0x348   :  { %11206 = vsyncpa [#allocation5], 1 }
 0x349   :  { %11208 = vsyncpa [#allocation5 + $0x1], 1 }

</bundles_post_ra>
